<compile_context>
chip_gen: v5e
topology: v5e:2x2
jax: 0.10.0
libtpu: 0.0.40
codegen_flags: <defaults>
</compile_context>

<pallas_src>
import functools

import jax
import jax.numpy as jnp
from jax.experimental import pallas as pl
from jax.experimental.pallas import tpu as pltpu


# ----------------------------- kernel ----------------------------------------


def _fused_rnn_kernel(x_ref, h_ref, wx_ref, wh_ref, b_ref, o_ref,
                      *, hidden_dim, tn):
    """One column tile of: [hidden | sigmoid(out)] = [x h] @ W + b.

    x_ref : (B, input_size)   bf16   (same block every step)
    h_ref : (B, hidden_dim)   bf16   (same block every step)
    wx_ref: (input_size, tn)  bf16   column tile j
    wh_ref: (hidden_dim, tn)  bf16   column tile j
    b_ref : (1, tn)           f32    column tile j
    o_ref : (B, tn)           f32    column tile j
    """
    z = (
        jnp.dot(x_ref[...], wx_ref[...], preferred_element_type=jnp.float32)
        + jnp.dot(h_ref[...], wh_ref[...], preferred_element_type=jnp.float32)
        + b_ref[...]
    )

    # Columns < hidden_dim belong to the i2h (linear) output, columns >=
    # hidden_dim to the i2o (sigmoid) output.  Only the tile that straddles
    # the boundary pays for the per-element predicate.
    col0 = pl.program_id(0) * tn
    col_end = col0 + tn
    fully_sigmoid = col0 >= hidden_dim
    fully_linear = col_end <= hidden_dim
    straddles = jnp.logical_and(col0 < hidden_dim, col_end > hidden_dim)

    @pl.when(fully_sigmoid)
    def _():
        o_ref[...] = jax.nn.sigmoid(z)

    @pl.when(fully_linear)
    def _():
        o_ref[...] = z

    @pl.when(straddles)
    def _():
        cols = col0 + jax.lax.broadcasted_iota(jnp.int32, z.shape, 1)
        o_ref[...] = jnp.where(cols >= hidden_dim, jax.nn.sigmoid(z), z)


# ----------------------------- pallas_call wrapper ----------------------------


def fused_rnn_step(x_bf16, h_bf16, wx, wh, b, *, hidden_dim, tn):
    """Runs the fused column-tiled kernel over all (padded) output columns."""
    B, input_size = x_bf16.shape
    n_pad = wx.shape[1]
    assert n_pad % tn == 0
    n_tiles = n_pad // tn

    kernel = functools.partial(_fused_rnn_kernel, hidden_dim=hidden_dim, tn=tn)

    return pl.pallas_call(
        kernel,
        out_shape=jax.ShapeDtypeStruct((B, n_pad), jnp.float32),
        grid_spec=pltpu.PrefetchScalarGridSpec(
            num_scalar_prefetch=0,
            grid=(n_tiles,),
            in_specs=[
                pl.BlockSpec((B, input_size), lambda j: (0, 0)),
                pl.BlockSpec((B, hidden_dim), lambda j: (0, 0)),
                pl.BlockSpec((input_size, tn), lambda j: (0, j)),
                pl.BlockSpec((hidden_dim, tn), lambda j: (0, j)),
                pl.BlockSpec((1, tn), lambda j: (0, j)),
            ],
            out_specs=pl.BlockSpec((B, tn), lambda j: (0, j)),
        ),
        compiler_params=pltpu.CompilerParams(
            dimension_semantics=("parallel",),
        ),
    )(x_bf16, h_bf16, wx, wh, b)


# Weights are jit ARGUMENTS (not static self) -> no constant-baking / retrace.
@functools.partial(jax.jit, static_argnames=("hidden_dim", "output_size", "tn"))
def rnn_forward(input_tensor, hidden_tensor, wx, wh, b,
                *, hidden_dim, output_size, tn):
    B = input_tensor.shape[0]
    if hidden_tensor.shape[0] != B:
        hidden_tensor = jnp.broadcast_to(
            hidden_tensor, (B, hidden_tensor.shape[1]))
    x_bf16 = input_tensor.astype(jnp.bfloat16)
    h_bf16 = hidden_tensor.astype(jnp.bfloat16)
    full = fused_rnn_step(x_bf16, h_bf16, wx, wh, b,
                          hidden_dim=hidden_dim, tn=tn)
    hidden = full[:, :hidden_dim]
    out = full[:, hidden_dim:hidden_dim + output_size]
    return out, hidden


# ----------------------------- RNN module ------------------------------------


class RNNPallas:
    """Pallas port of the PyTorch RNN module's forward pass."""

    def __init__(self, input_size=2032, output_size=2032, hidden_dim=256,
                 tn=384, key=jax.random.PRNGKey(0)):
        assert tn % 128 == 0, "column tile must be a multiple of the lane width"
        self.input_size = input_size
        self.output_size = output_size
        self.hidden_dim = hidden_dim
        self.tn = tn

        k1, k2, k3, k4 = jax.random.split(key, 4)
        fan_in = input_size + hidden_dim
        bound = 1.0 / jnp.sqrt(fan_in)

        # Per-layer weights in (in_features, out_features) layout
        # (transpose of PyTorch's storage) so the kernel computes y = x @ W + b.
        w_i2h = jax.random.uniform(k1, (fan_in, hidden_dim), jnp.float32,
                                   -bound, bound)
        b_i2h = jax.random.uniform(k2, (1, hidden_dim), jnp.float32,
                                   -bound, bound)
        w_i2o = jax.random.uniform(k3, (fan_in, output_size), jnp.float32,
                                   -bound, bound)
        b_i2o = jax.random.uniform(k4, (1, output_size), jnp.float32,
                                   -bound, bound)

        # ---- Build fused, minimally-padded, bf16 weights ONCE at init -------
        n_real = hidden_dim + output_size                  # 2288
        n_pad = ((n_real + tn - 1) // tn) * tn             # 2304 for tn=384
        self.n_pad = n_pad

        w_fused = jnp.zeros((fan_in, n_pad), jnp.float32)
        w_fused = w_fused.at[:, :hidden_dim].set(w_i2h)
        w_fused = w_fused.at[:, hidden_dim:n_real].set(w_i2o)
        b_fused = jnp.zeros((1, n_pad), jnp.float32)
        b_fused = b_fused.at[:, :hidden_dim].set(b_i2h)
        b_fused = b_fused.at[:, hidden_dim:n_real].set(b_i2o)

        # Split by input rows (x part / hidden part) so forward needs no concat.
        self.wx = w_fused[:input_size, :].astype(jnp.bfloat16)
        self.wh = w_fused[input_size:, :].astype(jnp.bfloat16)
        self.b = b_fused                                   # bias kept in f32

    def init_hidden(self):
        return jnp.zeros((1, self.hidden_dim), jnp.float32)

    def forward(self, input_tensor, hidden_tensor):
        return rnn_forward(input_tensor, hidden_tensor,
                           self.wx, self.wh, self.b,
                           hidden_dim=self.hidden_dim,
                           output_size=self.output_size,
                           tn=self.tn)

    __call__ = forward


# ----------------------------- main ------------------------------------------

if __name__ == "__main__":
    INPUT_SIZE, OUTPUT_SIZE, HIDDEN_DIM, BATCH = 2032, 2032, 256, 2

    model = RNNPallas(INPUT_SIZE, OUTPUT_SIZE, HIDDEN_DIM,
                      key=jax.random.PRNGKey(42))

    key = jax.random.PRNGKey(0)
    x = jax.random.normal(key, (BATCH, INPUT_SIZE), jnp.float32)
    h0 = model.init_hidden()   # (1, hidden_dim); forward broadcasts to batch.

    out, hidden = model.forward(x, h0)
    out, hidden = jax.block_until_ready((out, hidden))

    # ---- sanity check vs. plain-JAX reference on the same bf16 data path ----
    xb = x.astype(jnp.bfloat16).astype(jnp.float32)
    hb = jnp.broadcast_to(h0, (BATCH, HIDDEN_DIM))
    hb = hb.astype(jnp.bfloat16).astype(jnp.float32)
    wxf = model.wx.astype(jnp.float32)
    whf = model.wh.astype(jnp.float32)
    ref_full = xb @ wxf + hb @ whf + model.b
    ref_hidden = ref_full[:, :HIDDEN_DIM]
    ref_out = jax.nn.sigmoid(ref_full[:, HIDDEN_DIM:HIDDEN_DIM + OUTPUT_SIZE])

    assert out.shape == (BATCH, OUTPUT_SIZE)
    assert hidden.shape == (BATCH, HIDDEN_DIM)
    assert jnp.allclose(out, ref_out, atol=1e-2, rtol=1e-2)
    assert jnp.allclose(hidden, ref_hidden, atol=1e-2, rtol=1e-2)

    print("KERNEL_OK")
</pallas_src>

<mosaic_0001>
module attributes {stable_mosaic.version = 11 : i64} {
  func.func @_fused_rnn_kernel(%arg0: i32, %arg1: memref<2x2032xbf16, #tpu.memory_space<vmem>>, %arg2: memref<2x256xbf16, #tpu.memory_space<vmem>>, %arg3: memref<2032x384xbf16, #tpu.memory_space<vmem>>, %arg4: memref<256x384xbf16, #tpu.memory_space<vmem>>, %arg5: memref<1x384xf32, #tpu.memory_space<vmem>>, %arg6: memref<2x384xf32, #tpu.memory_space<vmem>>) attributes {dimension_semantics = [#tpu.dimension_semantics<parallel>], iteration_bounds = array<i64: 6>, scalar_prefetch = 0 : i64, scratch_operands = 0 : i64, tpu.core_type = #tpu.core_type<tc>, window_params = [{pipeline_mode = #tpu.pipeline_mode<synchronous>, transform_indices = @transform_0, window_bounds = array<i64: 2, 2032>}, {pipeline_mode = #tpu.pipeline_mode<synchronous>, transform_indices = @transform_1, window_bounds = array<i64: 2, 256>}, {transform_indices = @transform_2, window_bounds = array<i64: 2032, 384>}, {transform_indices = @transform_3, window_bounds = array<i64: 256, 384>}, {transform_indices = @transform_4, window_bounds = array<i64: 1, 384>}, {transform_indices = @transform_5, window_bounds = array<i64: 2, 384>}]} {
    %c0 = arith.constant 0 : index
    %c0_0 = arith.constant 0 : index
    %0 = vector.load %arg1[%c0, %c0_0] : memref<2x2032xbf16, #tpu.memory_space<vmem>>, vector<2x2032xbf16>
    %c0_1 = arith.constant 0 : index
    %c0_2 = arith.constant 0 : index
    %1 = vector.load %arg3[%c0_1, %c0_2] : memref<2032x384xbf16, #tpu.memory_space<vmem>>, vector<2032x384xbf16>
    %cst = arith.constant dense<0.000000e+00> : vector<2x384xf32>
    %2 = tpu.matmul %0, %1, %cst {dimension_numbers = #tpu.dot_dimension_numbers<[1], [0], [0], [1], [0, 0, 1, 1], [], []>} : vector<2x2032xbf16>, vector<2032x384xbf16>, vector<2x384xf32> -> vector<2x384xf32>
    %c0_3 = arith.constant 0 : index
    %c0_4 = arith.constant 0 : index
    %3 = vector.load %arg2[%c0_3, %c0_4] : memref<2x256xbf16, #tpu.memory_space<vmem>>, vector<2x256xbf16>
    %c0_5 = arith.constant 0 : index
    %c0_6 = arith.constant 0 : index
    %4 = vector.load %arg4[%c0_5, %c0_6] : memref<256x384xbf16, #tpu.memory_space<vmem>>, vector<256x384xbf16>
    %cst_7 = arith.constant dense<0.000000e+00> : vector<2x384xf32>
    %5 = tpu.matmul %3, %4, %cst_7 {dimension_numbers = #tpu.dot_dimension_numbers<[1], [0], [0], [1], [0, 0, 1, 1], [], []>} : vector<2x256xbf16>, vector<256x384xbf16>, vector<2x384xf32> -> vector<2x384xf32>
    %6 = arith.addf %2, %5 : vector<2x384xf32>
    %c0_8 = arith.constant 0 : index
    %c0_9 = arith.constant 0 : index
    %7 = vector.load %arg5[%c0_8, %c0_9] : memref<1x384xf32, #tpu.memory_space<vmem>>, vector<1x384xf32>
    %8 = vector.broadcast %7 : vector<1x384xf32> to vector<2x384xf32>
    %9 = arith.addf %6, %8 : vector<2x384xf32>
    %c384_i32 = arith.constant 384 : i32
    %10 = arith.muli %arg0, %c384_i32 : i32
    %c384_i32_10 = arith.constant 384 : i32
    %11 = arith.addi %10, %c384_i32_10 : i32
    %c256_i32 = arith.constant 256 : i32
    %12 = arith.cmpi sge, %10, %c256_i32 : i32
    %c256_i32_11 = arith.constant 256 : i32
    %13 = arith.cmpi sle, %11, %c256_i32_11 : i32
    %c256_i32_12 = arith.constant 256 : i32
    %14 = arith.cmpi slt, %10, %c256_i32_12 : i32
    %c256_i32_13 = arith.constant 256 : i32
    %15 = arith.cmpi sgt, %11, %c256_i32_13 : i32
    %16 = arith.andi %14, %15 : i1
    %17 = arith.extui %12 : i1 to i32
    %c0_i32 = arith.constant 0 : i32
    %18 = arith.cmpi ne, %17, %c0_i32 : i32
    scf.if %18 {
      %23 = arith.negf %9 : vector<2x384xf32>
      %24 = math.exp %23 : vector<2x384xf32>
      %cst_16 = arith.constant 1.000000e+00 : f32
      %25 = vector.broadcast %cst_16 : f32 to vector<2x384xf32>
      %26 = arith.addf %25, %24 : vector<2x384xf32>
      %27 = arith.divf %25, %26 : vector<2x384xf32>
      %c0_17 = arith.constant 0 : index
      %c0_18 = arith.constant 0 : index
      %28 = vector.load %arg6[%c0_17, %c0_18] : memref<2x384xf32, #tpu.memory_space<vmem>>, vector<2x384xf32>
      tpu.vector_store %arg6[%c0_17, %c0_18], %27 {strides = array<i32>} : memref<2x384xf32, #tpu.memory_space<vmem>>, vector<2x384xf32>,
    } else {
    }
    %19 = arith.extui %13 : i1 to i32
    %c0_i32_14 = arith.constant 0 : i32
    %20 = arith.cmpi ne, %19, %c0_i32_14 : i32
    scf.if %20 {
      %c0_16 = arith.constant 0 : index
      %c0_17 = arith.constant 0 : index
      %23 = vector.load %arg6[%c0_16, %c0_17] : memref<2x384xf32, #tpu.memory_space<vmem>>, vector<2x384xf32>
      tpu.vector_store %arg6[%c0_16, %c0_17], %9 {strides = array<i32>} : memref<2x384xf32, #tpu.memory_space<vmem>>, vector<2x384xf32>,
    } else {
    }
    %21 = arith.extui %16 : i1 to i32
    %c0_i32_15 = arith.constant 0 : i32
    %22 = arith.cmpi ne, %21, %c0_i32_15 : i32
    scf.if %22 {
      %23 = tpu.iota {dimensions = array<i32: 1>} : vector<2x384xi32>
      %24 = vector.broadcast %10 : i32 to vector<2x384xi32>
      %25 = arith.addi %24, %23 : vector<2x384xi32>
      %c256_i32_16 = arith.constant 256 : i32
      %26 = vector.broadcast %c256_i32_16 : i32 to vector<2x384xi32>
      %27 = arith.cmpi sge, %25, %26 : vector<2x384xi32>
      %28 = arith.negf %9 : vector<2x384xf32>
      %29 = math.exp %28 : vector<2x384xf32>
      %cst_17 = arith.constant 1.000000e+00 : f32
      %30 = vector.broadcast %cst_17 : f32 to vector<2x384xf32>
      %31 = arith.addf %30, %29 : vector<2x384xf32>
      %32 = arith.divf %30, %31 : vector<2x384xf32>
      %33 = arith.select %27, %32, %9 : vector<2x384xi1>, vector<2x384xf32>
      %c0_18 = arith.constant 0 : index
      %c0_19 = arith.constant 0 : index
      %34 = vector.load %arg6[%c0_18, %c0_19] : memref<2x384xf32, #tpu.memory_space<vmem>>, vector<2x384xf32>
      tpu.vector_store %arg6[%c0_18, %c0_19], %33 {strides = array<i32>} : memref<2x384xf32, #tpu.memory_space<vmem>>, vector<2x384xf32>,
    } else {
    }
    return
  }
  func.func @transform_0(%arg0: i32) -> (i32, i32) {
    %c0_i32 = arith.constant 0 : i32
    %c0_i32_0 = arith.constant 0 : i32
    %c0_i32_1 = arith.constant 0 : i32
    return %c0_i32, %c0_i32_0 : i32, i32
  }
  func.func @transform_1(%arg0: i32) -> (i32, i32) {
    %c0_i32 = arith.constant 0 : i32
    %c0_i32_0 = arith.constant 0 : i32
    %c0_i32_1 = arith.constant 0 : i32
    return %c0_i32, %c0_i32_0 : i32, i32
  }
  func.func @transform_2(%arg0: i32) -> (i32, i32) {
    %c0_i32 = arith.constant 0 : i32
    %c0_i32_0 = arith.constant 0 : i32
    return %c0_i32, %arg0 : i32, i32
  }
  func.func @transform_3(%arg0: i32) -> (i32, i32) {
    %c0_i32 = arith.constant 0 : i32
    %c0_i32_0 = arith.constant 0 : i32
    return %c0_i32, %arg0 : i32, i32
  }
  func.func @transform_4(%arg0: i32) -> (i32, i32) {
    %c0_i32 = arith.constant 0 : i32
    %c0_i32_0 = arith.constant 0 : i32
    return %c0_i32, %arg0 : i32, i32
  }
  func.func @transform_5(%arg0: i32) -> (i32, i32) {
    %c0_i32 = arith.constant 0 : i32
    %c0_i32_0 = arith.constant 0 : i32
    return %c0_i32, %arg0 : i32, i32
  }
}

</mosaic_0001>

<bundles_post_ra>
// kernel: rnn_forward.1
= control target key start
LH: loop header
LB: loop body
LE: loop exit
PB: predicated region body
PF: predicated region fallthrough
CT: control target
= control target key end

     0   :  { %s7854_s0 = inlined_call_operand.vmem [shape: bf16[2,2032], index: 0, kind: input, shape index: {}]   ;;  %s7855_s1 = inlined_call_operand.vmem [shape: bf16[2,256], index: 1, kind: input, shape index: {}]   ;;  %s7856_s2 = inlined_call_operand.hbm [shape: bf16[2032,2304], index: 2, kind: input, shape index: {}]   ;;  %s7857_s3 = inlined_call_operand.hbm [shape: bf16[256,2304], index: 3, kind: input, shape index: {}]   ;;  %s7858_s4 = inlined_call_operand.hbm [shape: f32[1,2304], index: 4, kind: input, shape index: {}]   ;;  %s7859_s5 = inlined_call_operand.vmem [shape: f32[2,2304], index: 5, kind: output, shape index: {}]  }
   0x1   :  { %7864 = sst [smem:[#allocation11_spill]] %s7857_s3 }
   0x2   :  { %10 = vsyncpa [#allocation3], 0 }
   0x3   :  { %12 = vsyncpa [#allocation3 + $0x1], 0 }
   0x4   :  { %13 = vsyncpa [#allocation5], 0 }
   0x5   :  { %15 = vsyncpa [#allocation5 + $0x1], 0  ;;  %s6664_s18 = smov 0   ;;  %s6666_s19 = smov 0  }
   0x6   :  { %s6668_s20 = smov 0   ;;  %s6670_s21 = smov 0  }
   0x7 LB: > { %7865 = sst [smem:[#allocation9_spill]] %s6625_s20  ;;  %s6683_s22 = sadd.s32 4294967295, %s6629_s21   ;;  %s6629_s21 = sphi %s6670_s21, %s7886_s21   ;;  %s6625_s20 = sphi %s6668_s20, %s7883_s20   ;;  %s6621_s19 = sphi %s6666_s19, %s7885_s19   ;;  %s6617_s18 = sphi %s6664_s18, %s7884_s18  }
   0x8   : > { %s6686_s23 = sadd.s32 1, %s6629_s21   ;;  %s70_s25 = sadd.s32 1, %s6625_s20 }
   0x9   : > { %s67_s24 = ssub.s32 %s6629_s21, %s6686_s23  ;;  %p77_p1 = scmp.ne.s32.totalorder %s6625_s20, %s6621_s19 }
   0xa   : > { %p68_p0 = scmp.eq.s32.totalorder %s67_s24, 0  ;;  %p78_p2 = scmp.eq.s32.totalorder %s6629_s21, 0 }
   0xb   : > { %p83_p3 = scmp.ne.s32.totalorder %s6621_s19, %s6617_s18  ;;  %p84_p5 = scmp.eq.s32.totalorder %s6683_s22, 0 }
   0xc   : > { %s6696_s26 = scalar_select %p68_p0, %s6625_s20, %s70_s25  }
   0xd   : > { %p79_p4 = por %p78_p2, %p77_p1  ;;  %p6427_p6 = scmp.lt.s32.totalorder %s6629_s21, 6 }
   0xe   : > { %7866 = sst [smem:[#allocation10_spill]] %s6696_s26  ;;  %p6700_p7 = por %p84_p5, %p83_p3 }
   0xf   : > { %s6705_s28 = sand.u32 1, %s6625_s20   ;;  %s5974_s29 = smul.u32 12, %s6629_s21 }
  0x10   : > { %p6708_p8 = pnand %p6427_p6, %p79_p4  ;;  %s213_s6 = sand.u32 1, %s6629_s21  }
  0x11   : > { %s6406_s7 = smul.u32 384, %s6705_s28  ;;  %s7869_s3 = sld [smem:[#allocation11_spill]] }
  0x12   : > { %p4243_p9 = scmp.ge.s32.totalorder %s6629_s21, 1  ;;  %s6720_s14 = scalar_lea.sflag [#allocation5], %s213_s6 }
  0x13   : > { %s217_s12 = scalar_lea.vmem [#allocation4], %s6406_s7  ;;  %p6505_p11 = pneg %p6708_p8 }
  0x14   : > { %s225_s13 = sshll.u32 %s217_s12, 4  ;;  %s226_s13 = int_to_ptr.vmem [resolvable:$true] %s225_s13 }
  0x17   : > { %s222_s10 = scalar_lea.hbm %s7869_s3, %s5974_s29  ;;  %s6508_s24 = scalar_lea.hbm %s7869_s3, 2304 }
  0x18   : > { %s223_s11 = sshll.u32 %s222_s10, 4  ;;  %s224_s11 = int_to_ptr.hbm [resolvable:$true] %s223_s11 }
  0x19   : > { %s6501_s15 = sshra.s32 %s224_s11, 4  ;;  %s6502_s15 = int_to_ptr.hbm [resolvable:$true] %s6501_s15 }
  0x1a   : > { %s6503_s16 = scalar_lea.hbm %s6502_s15, 384  ;;  %p6509_p0 = scmp.lt.s32.totalorder %s6502_s15, %s7869_s3 }
  0x1b   : > { %p6504_p10 = scmp.ne.s32.totalorder %s6502_s15, %s6503_s16  ;;  %p6510_p1 = scmp.lt.s32.totalorder %s6508_s24, %s6503_s16 }
  0x1d   : > { %p6506_p12 = pnand %p6505_p11, %p6504_p10  ;;  %p6511_p2 = por %p6510_p1, %p6509_p0 }
  0x1f   : > { %p6507_p13 = pneg %p6506_p12 }
  0x21   : > { %p6512_p3 = pnand %p6511_p2, %p6507_p13 }
  0x23   : > { %6515 = shalt.err (!%p6512_p3)
}
  0x24   : > { %s7860_s6 = smov 1152   ;;  %s7861_s8 = smov 192  }
  0x25   : > { %s7862_s9 = smov 12   ;;  %p252_p4 = scmp.lt.s32.totalorder %s6629_s21, 7 }
  0x26   : > { %6423 = dma.hbm_to_vmem [thread:$0]  (!%p6708_p8), %s224_s11, 6144, %s226_s13, %s6720_s14, %s7860_s6, %s7861_s8, %s7862_s9  }
  0x27   : > { %s6405_s10 = smul.u32 3048, %s6705_s28  ;;  %s200_s16 = scalar_lea.hbm %s7856_s2, %s5974_s29 }
  0x28   : > { %p6748_p5 = pnand %p4243_p9, %p252_p4  ;;  %s201_s18 = sshll.u32 %s200_s16, 4  ;;  %s202_s18 = int_to_ptr.hbm [resolvable:$true] %s201_s18 }
  0x29   : > { %s195_s24 = scalar_lea.vmem [#allocation2], %s6405_s10  ;;  %s6407_s7 = smul.u32 3, %s6705_s28 }
  0x2a   : > { %s203_s25 = sshll.u32 %s195_s24, 4  ;;  %s240_s11 = smul.u32 3, %s6629_s21  ;;  %s204_s25 = int_to_ptr.vmem [resolvable:$true] %s203_s25 }
  0x2b   : > { %s192_s13 = scalar_lea.sflag [#allocation3], %s6705_s28  ;;  %s6531_s6 = sshra.s32 %s202_s18, 4  ;;  %s6532_s6 = int_to_ptr.hbm [resolvable:$true] %s6531_s6 }
  0x2c   : > { %s6533_s8 = scalar_lea.hbm %s6532_s6, 3048  ;;  %s6538_s15 = scalar_lea.hbm %s7856_s2, 18288 }
  0x2d   : > { %p6534_p6 = scmp.ne.s32.totalorder %s6532_s6, %s6533_s8  ;;  %p6539_p9 = scmp.lt.s32.totalorder %s6532_s6, %s7856_s2 }
  0x2e   : > { %p6540_p13 = scmp.lt.s32.totalorder %s6538_s15, %s6533_s8 }
  0x2f   : > { %p6536_p10 = pnand %p6534_p6, %p6505_p11 }
  0x30   : > { %p6541_p0 = por %p6540_p13, %p6539_p9 }
  0x31   : > { %p6537_p12 = pneg %p6536_p10 }
  0x33   : > { %p6542_p1 = pnand %p6541_p0, %p6537_p12 }
  0x35   : > { %6545 = shalt.err (!%p6542_p1)
}
  0x36   : > { %s7871_s21 = smov 12   ;;  %s7872_s28 = smov 192  }
  0x37   : > { %s7873_s10 = smov 1152   ;;  %s243_s29 = scalar_lea.hbm %s7858_s4, %s240_s11 }
  0x38   : > { %6420 = dma.hbm_to_vmem [thread:$0]  (!%p6708_p8), %s202_s18, 48768, %s204_s25, %s192_s13, %s7873_s10, %s7872_s28, %s7871_s21  }
  0x39   : > { %s245_s12 = sshll.u32 %s243_s29, 4  ;;  %s239_s26 = scalar_lea.vmem [#allocation6], %s6407_s7  ;;  %s246_s12 = int_to_ptr.hbm [resolvable:$true] %s245_s12 }
  0x3a   : > { %s247_s20 = sshll.u32 %s239_s26, 4  ;;  %s6561_s6 = sshra.s32 %s246_s12, 4  ;;  %s248_s20 = int_to_ptr.vmem [resolvable:$true] %s247_s20  ;;  %s6562_s6 = int_to_ptr.hbm [resolvable:$true] %s6561_s6 }
  0x3b   : > { %s6563_s8 = scalar_lea.hbm %s6562_s6, 3  ;;  %s6568_s18 = scalar_lea.hbm %s7858_s4, 18 }
  0x3c   : > { %p6564_p2 = scmp.ne.s32.totalorder %s6562_s6, %s6563_s8  ;;  %p6569_p6 = scmp.lt.s32.totalorder %s6562_s6, %s7858_s4 }
  0x3d   : > { %p6570_p10 = scmp.lt.s32.totalorder %s6568_s18, %s6563_s8 }
  0x3e   : > { %p6566_p3 = pnand %p6564_p2, %p6505_p11 }
  0x3f   : > { %p6571_p12 = por %p6570_p10, %p6569_p6 }
  0x40   : > { %p6567_p4 = pneg %p6566_p3 }
  0x42   : > { %p6572_p9 = pnand %p6571_p12, %p6567_p4 }
  0x44   : > { %6575 = shalt.err (!%p6572_p9)
}
  0x45   : > { %6426 = dma.hbm_to_vmem [thread:$0]  (!%p6708_p8), %s246_s12, 48, %s248_s20, %s6720_s14  }
  0x46   : > { %256 = sbr.rel (%p6748_p5) target bundleno = 744 (0x2e8), region = 40  ;;  %s6787_s26 = sand.u32 (!%p6748_p5), 1, %s6621_s19  }
  0x47   : > { %s6408_s7 = smul.u32 (!%p6748_p5), 3048, %s6787_s26  ;;  %s259_s11 = scalar_lea.sflag (!%p6748_p5), [#allocation3], %s6787_s26 }
  0x49   : > { %s6791_s13 = scalar_lea.vmem (!%p6748_p5), [#allocation2], %s6408_s7 }
  0x4b   : > { %6608 = dma.done.wait (%p6700_p7), %s259_s11, 48768  }
  0x4c   : > { %6610 = vsyncadd (%p6700_p7), %s259_s11, 4294918528  ;;  %s268_s20 = sand.u32 1, %s6683_s22   ;;  %s6409_s30 = smul.u32 384, %s6787_s26 }
  0x4d   : > { %s269_s14 = scalar_lea.sflag [#allocation5], %s268_s20 }
  0x4e   : > { %s6799_s17 = scalar_lea.vmem [#allocation4], %s6409_s30 }
  0x4f   : > { %6612 = dma.done.wait (%p6700_p7), %s269_s14, 6192  }
  0x50   : > { %6614 = vsyncadd (%p6700_p7), %s269_s14, 4294961104  ;;  %s323_s16 = smul.u32 3, %s6683_s22  ;;  %v4331_v0 = vld [vmem:[%s6799_s17 + $0xa8] sm:$0xf]  ;;  %v6379_v1 = vld [vmem:[%s6799_s17 + $0xb0] sm:$0xf0] }
  0x51   : > { %v4427_v2 = vld [vmem:[%s6799_s17 + $0x168] sm:$0xf]  ;;  %v4332_v3 = vor.u32 %v6379_v1, %v4331_v0  ;;  %v6403_v4 = vld [vmem:[%s6799_s17 + $0x170] sm:$0xf0]  ;;  %v6378_v5 = vld [vmem:[%s6799_s17 + $0xac] sm:$0xf] }
  0x52   : > { %p324_p8 = scmp.lt.s32.totalorder %s323_s16, 17  ;;  %v4333_v6 = vld [vmem:[%s6799_s17 + $0xb4] sm:$0xf0]  ;;  %v4428_v7 = vor.u32 %v6403_v4, %v4427_v2  ;;  %v6402_v9 = vld [vmem:[%s6799_s17 + $0x16c] sm:$0xf]  ;;  %vm3312_vm0 = vcmask 916480  }
  0x53   : > { %v4336_v8 = vor.u32 %v6378_v5, %v4333_v6  ;;  %v4429_v10 = vld [vmem:[%s6799_s17 + $0x174] sm:$0xf0]  ;;  %v4319_v11 = vld [vmem:[%s6799_s17 + $0x90] sm:$0xf]  ;;  %1167 = vmatpush.bf16.msra.mxu0 %v4332_v3  ;;  %v6376_v13 = vld [vmem:[%s6799_s17 + $0x98] sm:$0xf0] }
  0x54   : > { %s7888_s16 = smov (!%p324_p8, %s323_s16), 17  ;;  %v4432_v12 = vor.u32 %v6402_v9, %v4429_v10  ;;  %v4415_v14 = vld [vmem:[%s6799_s17 + $0x150] sm:$0xf]  ;;  %v6400_v15 = vld [vmem:[%s6799_s17 + $0x158] sm:$0xf0]  ;;  %1180 = vmatpush.bf16.msra.mxu1 %v4428_v7  ;;  %v4320_v16 = vor.u32 %v6376_v13, %v4319_v11  ;;  %s6410_s15 = smul.u32 3, %s6787_s26 }
  0x55   : > { %s4244_s21 = sshll.u32 %s7888_s16, 1  ;;  %1193 = vmatpush.bf16.msra.mxu2 %v4336_v8  ;;  %v4416_v17 = vor.u32 %v6400_v15, %v4415_v14  ;;  %v6375_v18 = vld [vmem:[%s6799_s17 + $0x94] sm:$0xf]  ;;  %v4321_v19 = vld [vmem:[%s6799_s17 + $0x9c] sm:$0xf0]  ;;  %s7772_s25 = smul.u32 384, %s6683_s22 }
  0x56   : > { %s6809_s27 = scalar_lea.vmem %s7859_s5, %s4244_s21  ;;  %v6399_v20 = vld [vmem:[%s6799_s17 + $0x154] sm:$0xf]  ;;  %1206 = vmatpush.bf16.msra.mxu3 %v4432_v12  ;;  %v4324_v21 = vor.u32 %v6375_v18, %v4321_v19  ;;  %v4417_v22 = vld [vmem:[%s6799_s17 + $0x15c] sm:$0xf0]  ;;  %v4307_v23 = vld [vmem:[%s6799_s17 + $0x78] sm:$0xf] }
  0x57   : > { %v6373_v24 = vld [vmem:[%s6799_s17 + $0x80] sm:$0xf0]  ;;  %v4420_v25 = vor.u32 %v6399_v20, %v4417_v22  ;;  %v4403_v26 = vld [vmem:[%s6799_s17 + $0x138] sm:$0xf]  ;;  %v6372_v28 = vld [vmem:[%s6799_s17 + $0x7c] sm:$0xf]  ;;  %1168 = vmatpush.bf16.msra.mxu0 %v4320_v16 }
  0x58   : > { %v6397_v27 = vld [vmem:[%s6799_s17 + $0x140] sm:$0xf0]  ;;  %v4308_v29 = vor.u32 %v6373_v24, %v4307_v23  ;;  %v4309_v30 = vld [vmem:[%s6799_s17 + $0x84] sm:$0xf0]  ;;  %v6396_v31 = vld [vmem:[%s6799_s17 + $0x13c] sm:$0xf]  ;;  %1181 = vmatpush.bf16.msra.mxu1 %v4416_v17 }
  0x59   : > { %v4405_v32 = vld [vmem:[%s6799_s17 + $0x144] sm:$0xf0]  ;;  %1194 = vmatpush.bf16.msra.mxu2 %v4324_v21  ;;  %v4404_v33 = vor.u32 %v6397_v27, %v4403_v26  ;;  %v4312_v34 = vor.u32 %v6372_v28, %v4309_v30  ;;  %v4295_v35 = vld [vmem:[%s6799_s17 + $0x60] sm:$0xf]  ;;  %v6370_v36 = vld [vmem:[%s6799_s17 + $0x68] sm:$0xf0] }
  0x5a   : > { %v4391_v37 = vld [vmem:[%s6799_s17 + $0x120] sm:$0xf]  ;;  %1207 = vmatpush.bf16.msra.mxu3 %v4420_v25  ;;  %v4408_v38 = vor.u32 %v6396_v31, %v4405_v32  ;;  %v6394_v39 = vld [vmem:[%s6799_s17 + $0x128] sm:$0xf0]  ;;  %v6369_v40 = vld [vmem:[%s6799_s17 + $0x64] sm:$0xf]  ;;  %v4296_v44 = vor.u32 %v6370_v36, %v4295_v35 }
  0x5b   : > { %v4297_v41 = vld [vmem:[%s6799_s17 + $0x6c] sm:$0xf0]  ;;  %v6393_v42 = vld [vmem:[%s6799_s17 + $0x124] sm:$0xf]  ;;  %1169 = vmatpush.bf16.msra.mxu0 %v4308_v29  ;;  %v4392_v45 = vor.u32 %v6394_v39, %v4391_v37  ;;  %v4283_v47 = vld [vmem:[%s6799_s17 + $0x48] sm:$0xf] }
  0x5c   : > { %v4393_v43 = vld [vmem:[%s6799_s17 + $0x12c] sm:$0xf0]  ;;  %1182 = vmatpush.bf16.msra.mxu1 %v4404_v33  ;;  %v4300_v46 = vor.u32 %v6369_v40, %v4297_v41  ;;  %v6367_v48 = vld [vmem:[%s6799_s17 + $0x50] sm:$0xf0]  ;;  %v4379_v49 = vld [vmem:[%s6799_s17 + $0x108] sm:$0xf] }
  0x5d   : > { %1195 = vmatpush.bf16.msra.mxu2 %v4312_v34  ;;  %v4396_v50 = vor.u32 %v6393_v42, %v4393_v43  ;;  %v6391_v51 = vld [vmem:[%s6799_s17 + $0x110] sm:$0xf0]  ;;  %v6366_v52 = vld [vmem:[%s6799_s17 + $0x4c] sm:$0xf]  ;;  %v4285_v53 = vld [vmem:[%s6799_s17 + $0x54] sm:$0xf0]  ;;  %v4284_v56 = vor.u32 %v6367_v48, %v4283_v47 }
  0x5e   : > { %1208 = vmatpush.bf16.msra.mxu3 %v4408_v38  ;;  %v6390_v54 = vld [vmem:[%s6799_s17 + $0x10c] sm:$0xf]  ;;  %v4381_v55 = vld [vmem:[%s6799_s17 + $0x114] sm:$0xf0]  ;;  %v4380_v57 = vor.u32 %v6391_v51, %v4379_v49  ;;  %v4288_v58 = vor.u32 %v6366_v52, %v4285_v53  ;;  %v4271_v59 = vld [vmem:[%s6799_s17 + $0x30] sm:$0xf] }
  0x5f   : > { %1170 = vmatpush.bf16.msra.mxu0 %v4296_v44  ;;  %v6364_v60 = vld [vmem:[%s6799_s17 + $0x38] sm:$0xf0]  ;;  %v4367_v61 = vld [vmem:[%s6799_s17 + $0xf0] sm:$0xf]  ;;  %v4384_v62 = vor.u32 %v6390_v54, %v4381_v55  ;;  %v6363_v0 = vld [vmem:[%s6799_s17 + $0x34] sm:$0xf] }
  0x60   : > { %1183 = vmatpush.bf16.msra.mxu1 %v4392_v45  ;;  %v6388_v63 = vld [vmem:[%s6799_s17 + $0xf8] sm:$0xf0]  ;;  %v4273_v1 = vld [vmem:[%s6799_s17 + $0x3c] sm:$0xf0]  ;;  %v6387_v2 = vld [vmem:[%s6799_s17 + $0xf4] sm:$0xf]  ;;  %v4272_v4 = vor.u32 %v6364_v60, %v4271_v59 }
  0x61   : > { %1196 = vmatpush.bf16.msra.mxu2 %v4300_v46  ;;  %v4369_v3 = vld [vmem:[%s6799_s17 + $0xfc] sm:$0xf0]  ;;  %v4368_v5 = vor.u32 %v6388_v63, %v4367_v61  ;;  %v4276_v6 = vor.u32 %v6363_v0, %v4273_v1  ;;  %v4259_v7 = vld [vmem:[%s6799_s17 + $0x18] sm:$0xf]  ;;  %v6361_v8 = vld [vmem:[%s6799_s17 + $0x20] sm:$0xf0] }
  0x62   : > { %1209 = vmatpush.bf16.msra.mxu3 %v4396_v50  ;;  %v4355_v9 = vld [vmem:[%s6799_s17 + $0xd8] sm:$0xf]  ;;  %v4372_v10 = vor.u32 %v6387_v2, %v4369_v3  ;;  %v6385_v11 = vld [vmem:[%s6799_s17 + $0xe0] sm:$0xf0]  ;;  %v6360_v12 = vld [vmem:[%s6799_s17 + $0x1c] sm:$0xf]  ;;  %v4260_v16 = vor.u32 %v6361_v8, %v4259_v7 }
  0x63   : > { %1171 = vmatpush.bf16.msra.mxu0 %v4284_v56  ;;  %v4261_v13 = vld [vmem:[%s6799_s17 + $0x24] sm:$0xf0]  ;;  %v6384_v14 = vld [vmem:[%s6799_s17 + $0xdc] sm:$0xf]  ;;  %v4247_v17 = vld [vmem:[%s6799_s17] sm:$0xf]  ;;  %v4356_v19 = vor.u32 %v6385_v11, %v4355_v9 }
  0x64   : > { %1184 = vmatpush.bf16.msra.mxu1 %v4380_v57  ;;  %v4357_v15 = vld [vmem:[%s6799_s17 + $0xe4] sm:$0xf0]  ;;  %v6358_v18 = vld [vmem:[%s6799_s17 + $0x8] sm:$0xf0]  ;;  %v4264_v20 = vor.u32 %v6360_v12, %v4261_v13  ;;  %v4343_v21 = vld [vmem:[%s6799_s17 + $0xc0] sm:$0xf] }
  0x65   : > { %1197 = vmatpush.bf16.msra.mxu2 %v4288_v58  ;;  %v6382_v22 = vld [vmem:[%s6799_s17 + $0xc8] sm:$0xf0]  ;;  %v6357_v23 = vld [vmem:[%s6799_s17 + $0x4] sm:$0xf]  ;;  %v4360_v24 = vor.u32 %v6384_v14, %v4357_v15  ;;  %v4249_v25 = vld [vmem:[%s6799_s17 + $0xc] sm:$0xf0]  ;;  %v4248_v31 = vor.u32 %v6358_v18, %v4247_v17 }
  0x66   : > { %1210 = vmatpush.bf16.msra.mxu3 %v4384_v62  ;;  %v4339_v26 = vld [vmem:[%s6799_s17 + $0xb0] sm:$0xf]  ;;  %v6380_v27 = vld [vmem:[%s6799_s17 + $0xb8] sm:$0xf0]  ;;  %v4523_v30 = vld [vmem:[%s6791_s13 + $0xa8] sm:$0xf]  ;;  %v4344_v35 = vor.u32 %v6382_v22, %v4343_v21  ;;  %v4252_v36 = vor.u32 %v6357_v23, %v4249_v25 }
  0x67   : > { %1172 = vmatpush.bf16.msra.mxu0 %v4272_v4  ;;  %v4435_v28 = vld [vmem:[%s6799_s17 + $0x170] sm:$0xf]  ;;  %v6404_v29 = vld [vmem:[%s6799_s17 + $0x178] sm:$0xf0]  ;;  %v5998_v32 = vld [vmem:[%s6791_s13 + $0xb0] sm:$0xf0]  ;;  %v4340_v39 = vor.u32 %v6380_v27, %v4339_v26 }
  0x68   : > { %1185 = vmatpush.bf16.msra.mxu1 %v4368_v5  ;;  %v6381_v33 = vld [vmem:[%s6799_s17 + $0xc4] sm:$0xf]  ;;  %v4345_v34 = vld [vmem:[%s6799_s17 + $0xcc] sm:$0xf0]  ;;  %v4619_v37 = vld [vmem:[%s6791_s13 + $0x168] sm:$0xf]  ;;  %v4436_v40 = vor.u32 %v6404_v29, %v4435_v28  ;;  %v4524_v42 = vor.u32 %v5998_v32, %v4523_v30 }
  0x69   : > { %1198 = vmatpush.bf16.msra.mxu2 %v4276_v6  ;;  %v6022_v38 = vld [vmem:[%s6791_s13 + $0x170] sm:$0xf0]  ;;  %v4327_v41 = vld [vmem:[%s6799_s17 + $0x98] sm:$0xf]  ;;  %v4348_v43 = vor.u32 %v6381_v33, %v4345_v34  ;;  %v4511_v48 = vld [vmem:[%s6791_s13 + $0x90] sm:$0xf] }
  0x6a   : > { %1211 = vmatpush.bf16.msra.mxu3 %v4372_v10  ;;  %v6377_v44 = vld [vmem:[%s6799_s17 + $0xa0] sm:$0xf0]  ;;  %v4423_v45 = vld [vmem:[%s6799_s17 + $0x158] sm:$0xf]  ;;  %v4620_v47 = vor.u32 %v6022_v38, %v4619_v37  ;;  %v5995_v49 = vld [vmem:[%s6791_s13 + $0x98] sm:$0xf0] }
  0x6b   : > { %1173 = vmatpush.bf16.msra.mxu0 %v4260_v16  ;;  %v6401_v46 = vld [vmem:[%s6799_s17 + $0x160] sm:$0xf0]  ;;  %v4607_v50 = vld [vmem:[%s6791_s13 + $0x150] sm:$0xf]  ;;  %v6019_v51 = vld [vmem:[%s6791_s13 + $0x158] sm:$0xf0]  ;;  %v4328_v53 = vor.u32 %v6377_v44, %v4327_v41  ;;  %v4512_v56 = vor.u32 %v5995_v49, %v4511_v48 }
  0x6c   : > { %1186 = vmatpush.bf16.msra.mxu1 %v4356_v19  ;;  %v840_v52 = vld [vmem:[%s7855_s1] sm:$0x3]  ;;  %v4424_v54 = vor.u32 %v6401_v46, %v4423_v45  ;;  %v4315_v55 = vld [vmem:[%s6799_s17 + $0x80] sm:$0xf]  ;;  %v6374_v57 = vld [vmem:[%s6799_s17 + $0x88] sm:$0xf0]  ;;  %v4608_v60 = vor.u32 %v6019_v51, %v4607_v50 }
  0x6d   : > { %1199 = vmatpush.bf16.msra.mxu2 %v4264_v20  ;;  %906 = vst [vmem:[#allocation1] ss:$9 sm:$0xff] %v840_v52  ;;  %v4411_v58 = vld [vmem:[%s6799_s17 + $0x140] sm:$0xf]  ;;  %v6398_v59 = vld [vmem:[%s6799_s17 + $0x148] sm:$0xf0]  ;;  %v4316_v1 = vor.u32 %v6374_v57, %v4315_v55 }
  0x6e   : > { %1212 = vmatpush.bf16.msra.mxu3 %v4360_v24  ;;  %v4499_v61 = vld [vmem:[%s6791_s13 + $0x78] sm:$0xf]  ;;  %v5992_v62 = vld [vmem:[%s6791_s13 + $0x80] sm:$0xf0]  ;;  %v4412_v2 = vor.u32 %v6398_v59, %v4411_v58  ;;  %v4487_v10 = vld [vmem:[%s6791_s13 + $0x60] sm:$0xf] }
  0x6f   : > { %1174 = vmatpush.bf16.msra.mxu0 %v4248_v31  ;;  %v4595_v63 = vld [vmem:[%s6791_s13 + $0x138] sm:$0xf]  ;;  %v6016_v0 = vld [vmem:[%s6791_s13 + $0x140] sm:$0xf0]  ;;  %v4500_v5 = vor.u32 %v5992_v62, %v4499_v61  ;;  %v5989_v11 = vld [vmem:[%s6791_s13 + $0x68] sm:$0xf0] }
  0x70   : > { %1187 = vmatpush.bf16.msra.mxu1 %v4344_v35  ;;  %v4303_v3 = vld [vmem:[%s6799_s17 + $0x68] sm:$0xf]  ;;  %v6371_v4 = vld [vmem:[%s6799_s17 + $0x70] sm:$0xf0]  ;;  %v4596_v9 = vor.u32 %v6016_v0, %v4595_v63  ;;  %v4583_v12 = vld [vmem:[%s6791_s13 + $0x120] sm:$0xf]  ;;  %v4488_v19 = vor.u32 %v5989_v11, %v4487_v10 }
  0x71   : > { %1200 = vmatpush.bf16.msra.mxu2 %v4252_v36  ;;  %v4399_v6 = vld [vmem:[%s6799_s17 + $0x128] sm:$0xf]  ;;  %v6395_v7 = vld [vmem:[%s6799_s17 + $0x130] sm:$0xf0]  ;;  %v6013_v13 = vld [vmem:[%s6791_s13 + $0x128] sm:$0xf0]  ;;  %v4304_v16 = vor.u32 %v6371_v4, %v4303_v3 }
  0x72   : > { %1213 = vmatpush.bf16.msra.mxu3 %v4348_v43  ;;  %v330_v8 = vld [vmem:[%s7854_s0] sm:$0xff]  ;;  %v4400_v17 = vor.u32 %v6395_v7, %v4399_v6  ;;  %v4291_v18 = vld [vmem:[%s6799_s17 + $0x50] sm:$0xf]  ;;  %v6368_v20 = vld [vmem:[%s6799_s17 + $0x58] sm:$0xf0]  ;;  %v4584_v23 = vor.u32 %v6013_v13, %v4583_v12  ;;  %s282_s18 = scalar_lea.vmem [#allocation6], %s6410_s15 }
  0x73   : > { %1219 = vmatpush.bf16.msrb.mxu0 %v4340_v39  ;;  %v4387_v21 = vld [vmem:[%s6799_s17 + $0x110] sm:$0xf]  ;;  %v6392_v22 = vld [vmem:[%s6799_s17 + $0x118] sm:$0xf0]  ;;  %v4475_v24 = vld [vmem:[%s6791_s13 + $0x48] sm:$0xf]  ;;  %v4292_v28 = vor.u32 %v6368_v20, %v4291_v18 }
  0x74   : > { %1232 = vmatpush.bf16.msrb.mxu1 %v4436_v40  ;;  %v6913_v14 = vld [vmem:[#allocation1] sm:$0xff]  ;;  %v6915_v15 = vld [vmem:[#allocation1 + $0x9] sm:$0xff]  ;;  %v4388_v29 = vor.u32 %v6392_v22, %v4387_v21  ;;  %v6365_v32 = vld [vmem:[%s6799_s17 + $0x40] sm:$0xf0]  ;;  %s3951_s3 = sadd.s32 384, %s7772_s25  ;;  %p3954_p7 = scmp.lt.s32.totalorder %s7772_s25, 256 }
  0x75   : > { %3315 = vmatpush.bf16.msrb.mxu2 %v4524_v42  ;;  %1246 = vst [vmem:[#allocation1] ss:$9 sm:$0xff] %v330_v8  ;;  %1214 = vmatmul.bf16.vlgmr.msra.gmra.mxu3 %v6915_v15  ;;  %v5986_v25 = vld [vmem:[%s6791_s13 + $0x50] sm:$0xf0]  ;;  %v4571_v26 = vld [vmem:[%s6791_s13 + $0x108] sm:$0xf] }
  0x76   : > { %3328 = vmatpush.bf16.msrb.mxu3 %v4620_v47  ;;  %1201 = vmatmul.bf16.vlgmr.msra.gmra.mxu2 %v6913_v14  ;;  %v6010_v27 = vld [vmem:[%s6791_s13 + $0x110] sm:$0xf0]  ;;  %v4279_v30 = vld [vmem:[%s6799_s17 + $0x38] sm:$0xf]  ;;  %v4476_v31 = vor.u32 %v5986_v25, %v4475_v24  ;;  %v4463_v36 = vld [vmem:[%s6791_s13 + $0x30] sm:$0xf] }
  0x77   : > { %1220 = vmatpush.bf16.msrb.mxu0 %v4328_v53  ;;  %1188 = vmatmul.bf16.vlgmr.msra.gmra.mxu1 %v6915_v15  ;;  %v4375_v33 = vld [vmem:[%s6799_s17 + $0xf8] sm:$0xf]  ;;  %v6389_v34 = vld [vmem:[%s6799_s17 + $0x100] sm:$0xf0]  ;;  %v4572_v35 = vor.u32 %v6010_v27, %v4571_v26  ;;  %v5983_v37 = vld [vmem:[%s6791_s13 + $0x38] sm:$0xf0]  ;;  %v4280_v40 = vor.u32 %v6365_v32, %v4279_v30 }
  0x78   : > { %1233 = vmatpush.bf16.msrb.mxu1 %v4424_v54  ;;  %1175 = vmatmul.bf16.vlgmr.msra.gmra.mxu0 %v6913_v14  ;;  %v4559_v38 = vld [vmem:[%s6791_s13 + $0xf0] sm:$0xf]  ;;  %v6007_v39 = vld [vmem:[%s6791_s13 + $0xf8] sm:$0xf0]  ;;  %v4376_v41 = vor.u32 %v6389_v34, %v4375_v33  ;;  %v4464_v43 = vor.u32 %v5983_v37, %v4463_v36  ;;  %v4451_v48 = vld [vmem:[%s6791_s13 + $0x18] sm:$0xf] }
  0x79   : > { %3316 = vmatpush.bf16.msrb.mxu2 %v4512_v56  ;;  %v4267_v42 = vld [vmem:[%s6799_s17 + $0x20] sm:$0xf]  ;;  %v6362_v44 = vld [vmem:[%s6799_s17 + $0x28] sm:$0xf0]  ;;  %v4560_v47 = vor.u32 %v6007_v39, %v4559_v38  ;;  %v5980_v49 = vld [vmem:[%s6791_s13 + $0x20] sm:$0xf0] }
  0x7a   : > { %3329 = vmatpush.bf16.msrb.mxu3 %v4608_v60  ;;  %v4363_v45 = vld [vmem:[%s6799_s17 + $0xe0] sm:$0xf]  ;;  %v6386_v46 = vld [vmem:[%s6799_s17 + $0xe8] sm:$0xf0]  ;;  %v4547_v50 = vld [vmem:[%s6791_s13 + $0xd8] sm:$0xf]  ;;  %v4268_v52 = vor.u32 %v6362_v44, %v4267_v42  ;;  %v4452_v57 = vor.u32 %v5980_v49, %v4451_v48 }
  0x7b   : > { %1221 = vmatpush.bf16.msrb.mxu0 %v4316_v1  ;;  %v6004_v51 = vld [vmem:[%s6791_s13 + $0xe0] sm:$0xf0]  ;;  %v4364_v53 = vor.u32 %v6386_v46, %v4363_v45  ;;  %v4255_v54 = vld [vmem:[%s6799_s17 + $0x8] sm:$0xf]  ;;  %v4439_v59 = vld [vmem:[%s6791_s13] sm:$0xf] }
  0x7c   : > { %1234 = vmatpush.bf16.msrb.mxu1 %v4412_v2  ;;  %v6359_v55 = vld [vmem:[%s6799_s17 + $0x10] sm:$0xf0]  ;;  %v4351_v56 = vld [vmem:[%s6799_s17 + $0xc8] sm:$0xf]  ;;  %v5977_v60 = vld [vmem:[%s6791_s13 + $0x8] sm:$0xf0]  ;;  %v4548_v61 = vor.u32 %v6004_v51, %v4547_v50 }
  0x7d   : > { %3317 = vmatpush.bf16.msrb.mxu2 %v4500_v5  ;;  %v6383_v58 = vld [vmem:[%s6799_s17 + $0xd0] sm:$0xf0]  ;;  %v4715_v62 = vld [vmem:[%s6791_s13 + $0x228] sm:$0xf]  ;;  %v6046_v63 = vld [vmem:[%s6791_s13 + $0x230] sm:$0xf0]  ;;  %v4256_v4 = vor.u32 %v6359_v55, %v4255_v54  ;;  %v4440_v8 = vor.u32 %v5977_v60, %v4439_v59 }
  0x7e   : > { %3330 = vmatpush.bf16.msrb.mxu3 %v4596_v9  ;;  %v4811_v0 = vld [vmem:[%s6791_s13 + $0x2e8] sm:$0xf]  ;;  %v6070_v1 = vld [vmem:[%s6791_s13 + $0x2f0] sm:$0xf0]  ;;  %v4352_v5 = vor.u32 %v6383_v58, %v4351_v56  ;;  %v4535_v6 = vld [vmem:[%s6791_s13 + $0xc0] sm:$0xf]  ;;  %v4716_v9 = vor.u32 %v6046_v63, %v4715_v62 }
  0x7f   : > { %1222 = vmatpush.bf16.msrb.mxu0 %v4304_v16  ;;  %v4907_v2 = vld [vmem:[%s6791_s13 + $0x3a8] sm:$0xf]  ;;  %v6094_v3 = vld [vmem:[%s6791_s13 + $0x3b0] sm:$0xf0]  ;;  %v6001_v7 = vld [vmem:[%s6791_s13 + $0xc8] sm:$0xf0]  ;;  %v4812_v12 = vor.u32 %v6070_v1, %v4811_v0 }
  0x80   : > { %1235 = vmatpush.bf16.msrb.mxu1 %v4400_v17  ;;  %v5003_v10 = vld [vmem:[%s6791_s13 + $0x468] sm:$0xf]  ;;  %v6118_v11 = vld [vmem:[%s6791_s13 + $0x470] sm:$0xf0]  ;;  %v4908_v13 = vor.u32 %v6094_v3, %v4907_v2  ;;  %v4703_v16 = vld [vmem:[%s6791_s13 + $0x210] sm:$0xf]  ;;  %v4536_v18 = vor.u32 %v6001_v7, %v4535_v6 }
  0x81   : > { %3318 = vmatpush.bf16.msrb.mxu2 %v4488_v19  ;;  %v6043_v17 = vld [vmem:[%s6791_s13 + $0x218] sm:$0xf0]  ;;  %v4799_v19 = vld [vmem:[%s6791_s13 + $0x2d0] sm:$0xf]  ;;  %v5004_v21 = vor.u32 %v6118_v11, %v5003_v10  ;;  %v6040_v30 = vld [vmem:[%s6791_s13 + $0x200] sm:$0xf0] }
  0x82   : > { %3331 = vmatpush.bf16.msrb.mxu3 %v4584_v23  ;;  %v6067_v20 = vld [vmem:[%s6791_s13 + $0x2d8] sm:$0xf0]  ;;  %v4895_v22 = vld [vmem:[%s6791_s13 + $0x390] sm:$0xf]  ;;  %v4704_v25 = vor.u32 %v6043_v17, %v4703_v16  ;;  %v4787_v33 = vld [vmem:[%s6791_s13 + $0x2b8] sm:$0xf] }
  0x83   : > { %1223 = vmatpush.bf16.msrb.mxu0 %v4292_v28  ;;  %v6091_v23 = vld [vmem:[%s6791_s13 + $0x398] sm:$0xf0]  ;;  %v4991_v26 = vld [vmem:[%s6791_s13 + $0x450] sm:$0xf]  ;;  %v4800_v28 = vor.u32 %v6067_v20, %v4799_v19  ;;  %v6064_v34 = vld [vmem:[%s6791_s13 + $0x2c0] sm:$0xf0] }
  0x84   : > { %1236 = vmatpush.bf16.msrb.mxu1 %v4388_v29  ;;  %v6967_v24 = vld [vmem:[#allocation1] sm:$0xff]  ;;  %v4896_v32 = vor.u32 %v6091_v23, %v4895_v22  ;;  %v6088_v37 = vld [vmem:[%s6791_s13 + $0x380] sm:$0xf0]  ;;  %v6037_v42 = vld [vmem:[%s6791_s13 + $0x1e8] sm:$0xf0]  ;;  %p7776_p11 = scmp.gt.s32.totalorder %s3951_s3, 256 }
  0x85   : > { %3319 = vmatpush.bf16.msrb.mxu2 %v4476_v31  ;;  %v6115_v27 = vld [vmem:[%s6791_s13 + $0x458] sm:$0xf0]  ;;  %v4691_v29 = vld [vmem:[%s6791_s13 + $0x1f8] sm:$0xf]  ;;  %v4775_v44 = vld [vmem:[%s6791_s13 + $0x2a0] sm:$0xf] }
  0x86   : > { %3332 = vmatpush.bf16.msrb.mxu3 %v4572_v35  ;;  %v6973_v31 = vld [vmem:[#allocation1 + $0x9] sm:$0xff]  ;;  %v4992_v35 = vor.u32 %v6115_v27, %v4991_v26  ;;  %v4692_v38 = vor.u32 %v6040_v30, %v4691_v29  ;;  %v6061_v45 = vld [vmem:[%s6791_s13 + $0x2a8] sm:$0xf0]  ;;  %v6058_v56 = vld [vmem:[%s6791_s13 + $0x290] sm:$0xf0]  ;;  %p7784_p5 = pnand %p7776_p11, %p3954_p7 }
  0x87   : > { %1224 = vmatpush.bf16.msrb.mxu0 %v4280_v40  ;;  %v4883_v36 = vld [vmem:[%s6791_s13 + $0x378] sm:$0xf]  ;;  %v6112_v40 = vld [vmem:[%s6791_s13 + $0x440] sm:$0xf0]  ;;  %v4967_v49 = vld [vmem:[%s6791_s13 + $0x420] sm:$0xf]  ;;  %v4776_v51 = vor.u32 %v6061_v45, %v4775_v44 }
  0x88   : > { %1237 = vmatpush.bf16.msrb.mxu1 %v4376_v41  ;;  %v4979_v39 = vld [vmem:[%s6791_s13 + $0x438] sm:$0xf]  ;;  %v4679_v41 = vld [vmem:[%s6791_s13 + $0x1e0] sm:$0xf]  ;;  %v6109_v50 = vld [vmem:[%s6791_s13 + $0x428] sm:$0xf0] }
  0x89   : > { %3320 = vmatpush.bf16.msrb.mxu2 %v4464_v43  ;;  %v4884_v43 = vor.u32 %v6088_v37, %v4883_v36  ;;  %v4980_v46 = vor.u32 %v6112_v40, %v4979_v39  ;;  %v4680_v48 = vor.u32 %v6037_v42, %v4679_v41  ;;  %v4763_v55 = vld [vmem:[%s6791_s13 + $0x288] sm:$0xf]  ;;  %v6082_v59 = vld [vmem:[%s6791_s13 + $0x350] sm:$0xf0]  ;;  %v4655_v0 = vld [vmem:[%s6791_s13 + $0x1b0] sm:$0xf] }
  0x8a   : > { %3333 = vmatpush.bf16.msrb.mxu3 %v4560_v47  ;;  %v4871_v47 = vld [vmem:[%s6791_s13 + $0x360] sm:$0xf]  ;;  %v4859_v58 = vld [vmem:[%s6791_s13 + $0x348] sm:$0xf]  ;;  %v6106_v62 = vld [vmem:[%s6791_s13 + $0x410] sm:$0xf0]  ;;  %v4764_v63 = vor.u32 %v6058_v56, %v4763_v55 }
  0x8b   : > { %1225 = vmatpush.bf16.msrb.mxu0 %v4268_v52  ;;  %v4667_v52 = vld [vmem:[%s6791_s13 + $0x1c8] sm:$0xf]  ;;  %v6031_v1 = vld [vmem:[%s6791_s13 + $0x1b8] sm:$0xf0]  ;;  %v4860_v2 = vor.u32 %v6082_v59, %v4859_v58  ;;  %v4751_v3 = vld [vmem:[%s6791_s13 + $0x270] sm:$0xf] }
  0x8c   : > { %1238 = vmatpush.bf16.msrb.mxu1 %v4364_v53  ;;  %v6034_v53 = vld [vmem:[%s6791_s13 + $0x1d0] sm:$0xf0]  ;;  %v4847_v6 = vld [vmem:[%s6791_s13 + $0x330] sm:$0xf]  ;;  %v6079_v7 = vld [vmem:[%s6791_s13 + $0x338] sm:$0xf0] }
  0x8d   : > { %3321 = vmatpush.bf16.msrb.mxu2 %v4452_v57  ;;  %v4968_v57 = vor.u32 %v6109_v50, %v4967_v49  ;;  %v4668_v60 = vor.u32 %v6034_v53, %v4667_v52  ;;  %v6103_v10 = vld [vmem:[%s6791_s13 + $0x3f8] sm:$0xf0]  ;;  %v4848_v16 = vor.u32 %v6079_v7, %v4847_v6  ;;  %v4739_v17 = vld [vmem:[%s6791_s13 + $0x258] sm:$0xf]  ;;  %v4631_v26 = vld [vmem:[%s6791_s13 + $0x180] sm:$0xf] }
  0x8e   : > { %3334 = vmatpush.bf16.msrb.mxu3 %v4548_v61  ;;  %v4955_v61 = vld [vmem:[%s6791_s13 + $0x408] sm:$0xf]  ;;  %v4835_v20 = vld [vmem:[%s6791_s13 + $0x318] sm:$0xf]  ;;  %v6025_v27 = vld [vmem:[%s6791_s13 + $0x188] sm:$0xf0] }
  0x8f   : > { %1226 = vmatpush.bf16.msrb.mxu0 %v4256_v4  ;;  %v6055_v4 = vld [vmem:[%s6791_s13 + $0x278] sm:$0xf0]  ;;  %v4931_v22 = vld [vmem:[%s6791_s13 + $0x3d8] sm:$0xf]  ;;  %v4727_v29 = vld [vmem:[%s6791_s13 + $0x240] sm:$0xf] }
  0x90   : > { %1239 = vmatpush.bf16.msrb.mxu1 %v4352_v5  ;;  %v4956_v5 = vor.u32 %v6106_v62, %v4955_v61  ;;  %v4752_v11 = vor.u32 %v6055_v4, %v4751_v3  ;;  %v6049_v30 = vld [vmem:[%s6791_s13 + $0x248] sm:$0xf0]  ;;  %v6142_v36 = vld [vmem:[%s6791_s13 + $0x530] sm:$0xf0]  ;;  %v5291_v40 = vld [vmem:[%s6791_s13 + $0x6a8] sm:$0xf] }
  0x91   : > { %3322 = vmatpush.bf16.msrb.mxu2 %v4440_v8  ;;  %v4656_v8 = vor.u32 %v6031_v1, %v4655_v0  ;;  %v6166_v39 = vld [vmem:[%s6791_s13 + $0x5f0] sm:$0xf0]  ;;  %v4919_v42 = vld [vmem:[%s6791_s13 + $0x3c0] sm:$0xf]  ;;  %v4728_v44 = vor.u32 %v6049_v30, %v4727_v29  ;;  %v5087_v53 = vld [vmem:[%s6791_s13 + $0x510] sm:$0xf] }
  0x92   : > { %3335 = vmatpush.bf16.msrb.mxu3 %v4536_v18  ;;  %1227 = vmatmul.bf16.vlgmr.msrb.gmra.mxu0 %v6913_v14  ;;  %v4788_v14 = vor.u32 %v6064_v34, %v4787_v33  ;;  %v6052_v18 = vld [vmem:[%s6791_s13 + $0x260] sm:$0xf0]  ;;  %v6073_v34 = vld [vmem:[%s6791_s13 + $0x308] sm:$0xf0]  ;;  %v6190_v41 = vld [vmem:[%s6791_s13 + $0x6b0] sm:$0xf0] }
  0x93   : > { %3341 = vmatpush.bf16.msra.mxu0 %v4716_v9  ;;  %1240 = vmatmul.bf16.vlgmr.msrb.gmra.mxu1 %v6915_v15  ;;  %v6085_v15 = vld [vmem:[%s6791_s13 + $0x368] sm:$0xf0]  ;;  %v4943_v9 = vld [vmem:[%s6791_s13 + $0x3f0] sm:$0xf]  ;;  %v5292_v50 = vor.u32 %v6190_v41, %v5291_v40  ;;  %v7040_v56 = vld [vmem:[#allocation1 + $0x24] sm:$0xff] }
  0x94   : > { %3354 = vmatpush.bf16.msra.mxu1 %v4812_v12  ;;  %3323 = vmatmul.bf16.vlgmr.msrb.gmra.mxu2 %v6967_v24  ;;  %v4872_v54 = vor.u32 %v6085_v15, %v4871_v47  ;;  %v4643_v12 = vld [vmem:[%s6791_s13 + $0x198] sm:$0xf]  ;;  %v4944_v19 = vor.u32 %v6103_v10, %v4943_v9  ;;  %v6214_v47 = vld [vmem:[%s6791_s13 + $0x770] sm:$0xf0]  ;;  %v7035_v52 = vld [vmem:[#allocation1 + $0x12] sm:$0xff] }
  0x95   : > { %3367 = vmatpush.bf16.msra.mxu2 %v4908_v13  ;;  %3336 = vmatmul.bf16.vlgmr.msrb.gmra.mxu3 %v6973_v31  ;;  %v6028_v13 = vld [vmem:[%s6791_s13 + $0x1a0] sm:$0xf0]  ;;  %v7033_v15 = vld [vmem:[#allocation1 + $0x3f] sm:$0xff] }
  0x96   : > { %3380 = vmatpush.bf16.msra.mxu3 %v5004_v21  ;;  %v6076_v21 = vld [vmem:[%s6791_s13 + $0x320] sm:$0xf0]  ;;  %v4644_v23 = vor.u32 %v6028_v13, %v4643_v12  ;;  %v5183_v55 = vld [vmem:[%s6791_s13 + $0x5d0] sm:$0xf]  ;;  %v6163_v59 = vld [vmem:[%s6791_s13 + $0x5d8] sm:$0xf0] }
  0x97   : > { %3342 = vmatpush.bf16.msra.mxu0 %v4704_v25  ;;  %v6100_v25 = vld [vmem:[%s6791_s13 + $0x3e0] sm:$0xf0]  ;;  %v4836_v33 = vor.u32 %v6076_v21, %v4835_v20  ;;  %v7042_v58 = vld [vmem:[#allocation1 + $0x1b] sm:$0xff]  ;;  %v6187_v61 = vld [vmem:[%s6791_s13 + $0x698] sm:$0xf0] }
  0x98   : > { %3355 = vmatpush.bf16.msra.mxu1 %v4800_v28  ;;  %v4740_v28 = vor.u32 %v6052_v18, %v4739_v17  ;;  %v4932_v37 = vor.u32 %v6100_v25, %v4931_v22  ;;  %v5375_v62 = vld [vmem:[%s6791_s13 + $0x750] sm:$0xf]  ;;  %v7051_v1 = vld [vmem:[#allocation1 + $0x2d] sm:$0xff]  ;;  %v5075_v3 = vld [vmem:[%s6791_s13 + $0x4f8] sm:$0xf] }
  0x99   : > { %3368 = vmatpush.bf16.msra.mxu2 %v4896_v32  ;;  %v4823_v32 = vld [vmem:[%s6791_s13 + $0x300] sm:$0xf]  ;;  %v7049_v0 = vld [vmem:[#allocation1 + $0x36] sm:$0xff]  ;;  %v5363_v13 = vld [vmem:[%s6791_s13 + $0x738] sm:$0xf] }
  0x9a   : > { %3381 = vmatpush.bf16.msra.mxu3 %v4992_v35  ;;  %v5099_v35 = vld [vmem:[%s6791_s13 + $0x528] sm:$0xf]  ;;  %v331_v4 = vld [vmem:[%s7854_s0 + $0x8] sm:$0xff]  ;;  %v6133_v21 = vld [vmem:[%s6791_s13 + $0x4e8] sm:$0xf0] }
  0x9b   : > { %3343 = vmatpush.bf16.msra.mxu0 %v4692_v38  ;;  %v5195_v38 = vld [vmem:[%s6791_s13 + $0x5e8] sm:$0xf]  ;;  %v5100_v45 = vor.u32 %v6142_v36, %v5099_v35  ;;  %v6136_v7 = vld [vmem:[%s6791_s13 + $0x500] sm:$0xf0]  ;;  %1256 = vst [vmem:[#allocation1] ss:$9 sm:$0xff] %v331_v4 }
  0x9c   : > { %3356 = vmatpush.bf16.msra.mxu1 %v4788_v14  ;;  %v4632_v14 = vor.u32 %v6025_v27, %v4631_v26  ;;  %v5196_v49 = vor.u32 %v6166_v39, %v5195_v38  ;;  %v6160_v10 = vld [vmem:[%s6791_s13 + $0x5c0] sm:$0xf0]  ;;  %v5076_v17 = vor.u32 %v6136_v7, %v5075_v3  ;;  %v5063_v20 = vld [vmem:[%s6791_s13 + $0x4e0] sm:$0xf]  ;;  %v6157_v25 = vld [vmem:[%s6791_s13 + $0x5a8] sm:$0xf0] }
  0x9d   : > { %3369 = vmatpush.bf16.msra.mxu2 %v4884_v43  ;;  %v6097_v43 = vld [vmem:[%s6791_s13 + $0x3c8] sm:$0xf0]  ;;  %v6184_v12 = vld [vmem:[%s6791_s13 + $0x680] sm:$0xf0]  ;;  %v5159_v22 = vld [vmem:[%s6791_s13 + $0x5a0] sm:$0xf]  ;;  %v5064_v30 = vor.u32 %v6133_v21, %v5063_v20 }
  0x9e   : > { %3382 = vmatpush.bf16.msra.mxu3 %v4980_v46  ;;  %v5387_v46 = vld [vmem:[%s6791_s13 + $0x768] sm:$0xf]  ;;  %v5255_v26 = vld [vmem:[%s6791_s13 + $0x660] sm:$0xf]  ;;  %v6181_v27 = vld [vmem:[%s6791_s13 + $0x668] sm:$0xf0] }
  0x9f   : > { %3344 = vmatpush.bf16.msra.mxu0 %v4680_v48  ;;  %v4824_v48 = vor.u32 %v6073_v34, %v4823_v32  ;;  %v6205_v29 = vld [vmem:[%s6791_s13 + $0x728] sm:$0xf0]  ;;  %v5160_v32 = vor.u32 %v6157_v25, %v5159_v22  ;;  %v5051_v34 = vld [vmem:[%s6791_s13 + $0x4c8] sm:$0xf]  ;;  %v6130_v35 = vld [vmem:[%s6791_s13 + $0x4d0] sm:$0xf0] }
  0xa0   : > { %3357 = vmatpush.bf16.msra.mxu1 %v4776_v51  ;;  %v4920_v51 = vor.u32 %v6097_v43, %v4919_v42  ;;  %v5147_v36 = vld [vmem:[%s6791_s13 + $0x588] sm:$0xf]  ;;  %v6154_v38 = vld [vmem:[%s6791_s13 + $0x590] sm:$0xf0]  ;;  %v5052_v42 = vor.u32 %v6130_v35, %v5051_v34  ;;  %v5219_v3 = vld [vmem:[%s6791_s13 + $0x618] sm:$0xf] }
  0xa1   : > { %3370 = vmatpush.bf16.msra.mxu2 %v4872_v54  ;;  %v6139_v54 = vld [vmem:[%s6791_s13 + $0x518] sm:$0xf0]  ;;  %v5243_v39 = vld [vmem:[%s6791_s13 + $0x648] sm:$0xf]  ;;  %v6178_v40 = vld [vmem:[%s6791_s13 + $0x650] sm:$0xf0]  ;;  %v5148_v43 = vor.u32 %v6154_v38, %v5147_v36 }
  0xa2   : > { %3383 = vmatpush.bf16.msra.mxu3 %v4968_v57  ;;  %v5388_v57 = vor.u32 %v6214_v47, %v5387_v46  ;;  %v6202_v41 = vld [vmem:[%s6791_s13 + $0x710] sm:$0xf0]  ;;  %v6127_v46 = vld [vmem:[%s6791_s13 + $0x4b8] sm:$0xf0]  ;;  %v5135_v47 = vld [vmem:[%s6791_s13 + $0x570] sm:$0xf] }
  0xa3   : > { %3345 = vmatpush.bf16.msra.mxu0 %v4668_v60  ;;  %v5279_v60 = vld [vmem:[%s6791_s13 + $0x690] sm:$0xf]  ;;  %v6172_v4 = vld [vmem:[%s6791_s13 + $0x620] sm:$0xf0]  ;;  %v6238_v20 = vld [vmem:[%s6791_s13 + $0x830] sm:$0xf0] }
  0xa4   : > { %3358 = vmatpush.bf16.msra.mxu1 %v4764_v63  ;;  %v6211_v63 = vld [vmem:[%s6791_s13 + $0x758] sm:$0xf0]  ;;  %v5280_v6 = vor.u32 %v6187_v61, %v5279_v60  ;;  %v5027_v60 = vld [vmem:[%s6791_s13 + $0x498] sm:$0xf]  ;;  %v6124_v61 = vld [vmem:[%s6791_s13 + $0x4a0] sm:$0xf0] }
  0xa5   : > { %3371 = vmatpush.bf16.msra.mxu2 %v4860_v2  ;;  %v5088_v2 = vor.u32 %v6139_v54, %v5087_v53  ;;  %v5376_v9 = vor.u32 %v6211_v63, %v5375_v62  ;;  %v5327_v53 = vld [vmem:[%s6791_s13 + $0x6f0] sm:$0xf]  ;;  %v6199_v54 = vld [vmem:[%s6791_s13 + $0x6f8] sm:$0xf0]  ;;  %v5123_v62 = vld [vmem:[%s6791_s13 + $0x558] sm:$0xf]  ;;  %v5028_v7 = vor.u32 %v6124_v61, %v5027_v60 }
  0xa6   : > { %3384 = vmatpush.bf16.msra.mxu3 %v4956_v5  ;;  %v5184_v5 = vor.u32 %v6163_v59, %v5183_v55  ;;  %v5328_v63 = vor.u32 %v6199_v54, %v5327_v53  ;;  %v5579_v21 = vld [vmem:[%s6791_s13 + $0x8e8] sm:$0xf]  ;;  %v6262_v22 = vld [vmem:[%s6791_s13 + $0x8f0] sm:$0xf0]  ;;  %v5471_v38 = vld [vmem:[%s6791_s13 + $0x810] sm:$0xf] }
  0xa7   : > { %3346 = vmatpush.bf16.msra.mxu0 %v4656_v8  ;;  %v5171_v8 = vld [vmem:[%s6791_s13 + $0x5b8] sm:$0xf]  ;;  %v5771_v34 = vld [vmem:[%s6791_s13 + $0xa68] sm:$0xf]  ;;  %v6310_v35 = vld [vmem:[%s6791_s13 + $0xa70] sm:$0xf0] }
  0xa8   : > { %3359 = vmatpush.bf16.msra.mxu1 %v4752_v11  ;;  %v5267_v11 = vld [vmem:[%s6791_s13 + $0x678] sm:$0xf]  ;;  %v5172_v18 = vor.u32 %v6160_v10, %v5171_v8  ;;  %v5015_v8 = vld [vmem:[%s6791_s13 + $0x480] sm:$0xf]  ;;  %v6232_v53 = vld [vmem:[%s6791_s13 + $0x800] sm:$0xf0] }
  0xa9   : > { %3372 = vmatpush.bf16.msra.mxu2 %v4848_v16  ;;  %v6208_v16 = vld [vmem:[%s6791_s13 + $0x740] sm:$0xf0]  ;;  %v5555_v54 = vld [vmem:[%s6791_s13 + $0x8b8] sm:$0xf] }
  0xaa   : > { %3385 = vmatpush.bf16.msra.mxu3 %v4944_v19  ;;  %v5268_v19 = vor.u32 %v6184_v12, %v5267_v11  ;;  %v5220_v11 = vor.u32 %v6172_v4, %v5219_v3  ;;  %v5111_v12 = vld [vmem:[%s6791_s13 + $0x540] sm:$0xf] }
  0xab   : > { %3347 = vmatpush.bf16.msra.mxu0 %v4644_v23  ;;  %v5364_v23 = vor.u32 %v6208_v16, %v5363_v13  ;;  %v6145_v13 = vld [vmem:[%s6791_s13 + $0x548] sm:$0xf0]  ;;  %v5207_v16 = vld [vmem:[%s6791_s13 + $0x600] sm:$0xf] }
  0xac   : > { %3360 = vmatpush.bf16.msra.mxu1 %v4740_v28  ;;  %v5351_v28 = vld [vmem:[%s6791_s13 + $0x720] sm:$0xf] }
  0xad   : > { %3373 = vmatpush.bf16.msra.mxu2 %v4836_v33  ;;  %v5256_v33 = vor.u32 %v6181_v27, %v5255_v26  ;;  %v6286_v26 = vld [vmem:[%s6791_s13 + $0x9b0] sm:$0xf0]  ;;  %v5303_v27 = vld [vmem:[%s6791_s13 + $0x6c0] sm:$0xf] }
  0xae   : > { %3386 = vmatpush.bf16.msra.mxu3 %v4932_v37  ;;  %v5352_v37 = vor.u32 %v6205_v29, %v5351_v28  ;;  %v6193_v28 = vld [vmem:[%s6791_s13 + $0x6c8] sm:$0xf0]  ;;  %v5112_v29 = vor.u32 %v6145_v13, %v5111_v12  ;;  %v5447_v4 = vld [vmem:[%s6791_s13 + $0x7e0] sm:$0xf] }
  0xaf   : > { %3348 = vmatpush.bf16.msra.mxu0 %v4632_v14  ;;  %v5339_v14 = vld [vmem:[%s6791_s13 + $0x708] sm:$0xf]  ;;  %v5735_v12 = vld [vmem:[%s6791_s13 + $0xa20] sm:$0xf]  ;;  %v6301_v13 = vld [vmem:[%s6791_s13 + $0xa28] sm:$0xf0] }
  0xb0   : > { %3361 = vmatpush.bf16.msra.mxu1 %v4728_v44  ;;  %v5244_v44 = vor.u32 %v6178_v40, %v5243_v39  ;;  %v6235_v39 = vld [vmem:[%s6791_s13 + $0x818] sm:$0xf0]  ;;  %v5567_v40 = vld [vmem:[%s6791_s13 + $0x8d0] sm:$0xf] }
  0xb1   : > { %3374 = vmatpush.bf16.msra.mxu2 %v4824_v48  ;;  %v5340_v48 = vor.u32 %v6202_v41, %v5339_v14  ;;  %v6259_v14 = vld [vmem:[%s6791_s13 + $0x8d8] sm:$0xf0]  ;;  %v5663_v41 = vld [vmem:[%s6791_s13 + $0x990] sm:$0xf] }
  0xb2   : > { %3387 = vmatpush.bf16.msra.mxu3 %v4920_v51  ;;  %3349 = vmatmul.bf16.vlgmr.msra.gmra.mxu0 %v7035_v52  ;;  %v6175_v51 = vld [vmem:[%s6791_s13 + $0x638] sm:$0xf0] }
  0xb3   : > { %3393 = vmatpush.bf16.msrb.mxu0 %v5100_v45  ;;  %3362 = vmatmul.bf16.vlgmr.msra.gmra.mxu1 %v7042_v58  ;;  %v5039_v45 = vld [vmem:[%s6791_s13 + $0x4b0] sm:$0xf] }
  0xb4   : > { %3406 = vmatpush.bf16.msrb.mxu1 %v5196_v49  ;;  %3375 = vmatmul.bf16.vlgmr.msra.gmra.mxu2 %v7040_v56  ;;  %v6151_v49 = vld [vmem:[%s6791_s13 + $0x578] sm:$0xf0]  ;;  %v5040_v55 = vor.u32 %v6127_v46, %v5039_v45  ;;  %v5472_v45 = vor.u32 %v6235_v39, %v5471_v38  ;;  %v5759_v46 = vld [vmem:[%s6791_s13 + $0xa50] sm:$0xf] }
  0xb5   : > { %3419 = vmatpush.bf16.msrb.mxu2 %v5292_v50  ;;  %3388 = vmatmul.bf16.vlgmr.msra.gmra.mxu3 %v7051_v1  ;;  %v5231_v50 = vld [vmem:[%s6791_s13 + $0x630] sm:$0xf] }
  0xb6   : > { %3432 = vmatpush.bf16.msrb.mxu3 %v5388_v57  ;;  %v5136_v57 = vor.u32 %v6151_v49, %v5135_v47  ;;  %v5232_v59 = vor.u32 %v6175_v51, %v5231_v50  ;;  %v6307_v47 = vld [vmem:[%s6791_s13 + $0xa58] sm:$0xf0]  ;;  %v5568_v50 = vor.u32 %v6259_v14, %v5567_v40  ;;  %v5711_v40 = vld [vmem:[%s6791_s13 + $0x9f0] sm:$0xf] }
  0xb7   : > { %3394 = vmatpush.bf16.msrb.mxu0 %v5088_v2  ;;  %v6148_v2 = vld [vmem:[%s6791_s13 + $0x560] sm:$0xf0]  ;;  %v5760_v60 = vor.u32 %v6307_v47, %v5759_v46  ;;  %v6295_v14 = vld [vmem:[%s6791_s13 + $0x9f8] sm:$0xf0]  ;;  %v5603_v47 = vld [vmem:[%s6791_s13 + $0x918] sm:$0xf] }
  0xb8   : > { %3407 = vmatpush.bf16.msrb.mxu1 %v5184_v5  ;;  %v5315_v5 = vld [vmem:[%s6791_s13 + $0x6d8] sm:$0xf]  ;;  %v5124_v10 = vor.u32 %v6148_v2, %v5123_v62  ;;  %v6244_v46 = vld [vmem:[%s6791_s13 + $0x860] sm:$0xf0] }
  0xb9   : > { %3420 = vmatpush.bf16.msrb.mxu2 %v5280_v6  ;;  %v6196_v6 = vld [vmem:[%s6791_s13 + $0x6e0] sm:$0xf0]  ;;  %v5747_v62 = vld [vmem:[%s6791_s13 + $0xa38] sm:$0xf] }
  0xba   : > { %3433 = vmatpush.bf16.msrb.mxu3 %v5376_v9  ;;  %v6121_v9 = vld [vmem:[%s6791_s13 + $0x488] sm:$0xf0]  ;;  %v1258_v49 = vld [vmem:[#allocation1 + $0x9] sm:$0xff] }
  0xbb   : > { %3395 = vmatpush.bf16.msrb.mxu0 %v5076_v17  ;;  %v5316_v17 = vor.u32 %v6196_v6, %v5315_v5  ;;  %v5016_v25 = vor.u32 %v6121_v9, %v5015_v8  ;;  %v6229_v5 = vld [vmem:[%s6791_s13 + $0x7e8] sm:$0xf0]  ;;  %v5543_v6 = vld [vmem:[%s6791_s13 + $0x8a0] sm:$0xf] }
  0xbc   : > { %3408 = vmatpush.bf16.msrb.mxu1 %v5172_v18  ;;  %v6169_v18 = vld [vmem:[%s6791_s13 + $0x608] sm:$0xf0]  ;;  %v5639_v8 = vld [vmem:[%s6791_s13 + $0x960] sm:$0xf] }
  0xbd   : > { %3421 = vmatpush.bf16.msrb.mxu2 %v5268_v19  ;;  %v5483_v19 = vld [vmem:[%s6791_s13 + $0x828] sm:$0xf]  ;;  %v6277_v9 = vld [vmem:[%s6791_s13 + $0x968] sm:$0xf0] }
  0xbe   : > { %3434 = vmatpush.bf16.msrb.mxu3 %v5364_v23  ;;  %v5675_v23 = vld [vmem:[%s6791_s13 + $0x9a8] sm:$0xf] }
  0xbf   : > { %3396 = vmatpush.bf16.msrb.mxu0 %v5064_v30  ;;  %v5208_v30 = vor.u32 %v6169_v18, %v5207_v16  ;;  %v5676_v36 = vor.u32 %v6286_v26, %v5675_v23  ;;  %v5435_v18 = vld [vmem:[%s6791_s13 + $0x7c8] sm:$0xf]  ;;  %v6274_v23 = vld [vmem:[%s6791_s13 + $0x950] sm:$0xf0] }
  0xc0   : > { %3409 = vmatpush.bf16.msrb.mxu1 %v5160_v32  ;;  %v5484_v32 = vor.u32 %v6238_v20, %v5483_v19  ;;  %v6226_v19 = vld [vmem:[%s6791_s13 + $0x7d0] sm:$0xf0]  ;;  %v5531_v20 = vld [vmem:[%s6791_s13 + $0x888] sm:$0xf] }
  0xc1   : > { %3422 = vmatpush.bf16.msrb.mxu2 %v5256_v33  ;;  %v5580_v33 = vor.u32 %v6262_v22, %v5579_v21  ;;  %v6250_v21 = vld [vmem:[%s6791_s13 + $0x890] sm:$0xf0]  ;;  %v5627_v22 = vld [vmem:[%s6791_s13 + $0x948] sm:$0xf]  ;;  %v5436_v26 = vor.u32 %v6226_v19, %v5435_v18  ;;  %v6021_v18 = vld [vmem:[%s6791_s13 + $0x16c] sm:$0xf] }
  0xc2   : > { %3435 = vmatpush.bf16.msrb.mxu3 %v5352_v37  ;;  %v5304_v37 = vor.u32 %v6193_v28, %v5303_v27  ;;  %v5723_v27 = vld [vmem:[%s6791_s13 + $0xa08] sm:$0xf]  ;;  %v6298_v28 = vld [vmem:[%s6791_s13 + $0xa10] sm:$0xf0]  ;;  %v4621_v19 = vld [vmem:[%s6791_s13 + $0x174] sm:$0xf0] }
  0xc3   : > { %3397 = vmatpush.bf16.msrb.mxu0 %v5052_v42  ;;  %v6283_v42 = vld [vmem:[%s6791_s13 + $0x998] sm:$0xf0]  ;;  %v5724_v38 = vor.u32 %v6298_v28, %v5723_v27  ;;  %v5994_v27 = vld [vmem:[%s6791_s13 + $0x94] sm:$0xf]  ;;  %v4513_v28 = vld [vmem:[%s6791_s13 + $0x9c] sm:$0xf0] }
  0xc4   : > { %3410 = vmatpush.bf16.msrb.mxu1 %v5148_v43  ;;  %v1257_v43 = vld [vmem:[#allocation1] sm:$0xff]  ;;  %v5664_v51 = vor.u32 %v6283_v42, %v5663_v41 }
  0xc5   : > { %3423 = vmatpush.bf16.msrb.mxu2 %v5244_v44  ;;  %v5772_v44 = vor.u32 %v6310_v35, %v5771_v34  ;;  %v5519_v34 = vld [vmem:[%s6791_s13 + $0x870] sm:$0xf]  ;;  %v6247_v35 = vld [vmem:[%s6791_s13 + $0x878] sm:$0xf0] }
  0xc6   : > { %3436 = vmatpush.bf16.msrb.mxu3 %v5340_v48  ;;  %v5459_v48 = vld [vmem:[%s6791_s13 + $0x7f8] sm:$0xf]  ;;  %v5520_v41 = vor.u32 %v6247_v35, %v5519_v34  ;;  %v1262_v34 = vld [vmem:[#allocation1 + $0x2d] sm:$0xff] }
  0xc7   : > { %3398 = vmatpush.bf16.msrb.mxu0 %v5040_v55  ;;  %v6256_v55 = vld [vmem:[%s6791_s13 + $0x8c0] sm:$0xf0]  ;;  %v5460_v61 = vor.u32 %v6232_v53, %v5459_v48 }
  0xc8   : > { %3411 = vmatpush.bf16.msrb.mxu1 %v5136_v57  ;;  %v5651_v57 = vld [vmem:[%s6791_s13 + $0x978] sm:$0xf]  ;;  %v5556_v2 = vor.u32 %v6256_v55, %v5555_v54  ;;  %v6268_v48 = vld [vmem:[%s6791_s13 + $0x920] sm:$0xf0]  ;;  %v5399_v54 = vld [vmem:[%s6791_s13 + $0x780] sm:$0xf] }
  0xc9   : > { %3424 = vmatpush.bf16.msrb.mxu2 %v5232_v59  ;;  %v6280_v59 = vld [vmem:[%s6791_s13 + $0x980] sm:$0xf0]  ;;  %v6217_v55 = vld [vmem:[%s6791_s13 + $0x788] sm:$0xf0] }
  0xca   : > { %3437 = vmatpush.bf16.msrb.mxu3 %v5328_v63  ;;  %v6304_v63 = vld [vmem:[%s6791_s13 + $0xa40] sm:$0xf0]  ;;  %v5652_v3 = vor.u32 %v6280_v59, %v5651_v57  ;;  %v5604_v59 = vor.u32 %v6268_v48, %v5603_v47  ;;  %v6015_v47 = vld [vmem:[%s6791_s13 + $0x13c] sm:$0xf]  ;;  %v4597_v48 = vld [vmem:[%s6791_s13 + $0x144] sm:$0xf0] }
  0xcb   : > { %3399 = vmatpush.bf16.msrb.mxu0 %v5028_v7  ;;  %v6253_v7 = vld [vmem:[%s6791_s13 + $0x8a8] sm:$0xf0]  ;;  %v6292_v53 = vld [vmem:[%s6791_s13 + $0x9e0] sm:$0xf0] }
  0xcc   : > { %3412 = vmatpush.bf16.msrb.mxu1 %v5124_v10  ;;  %v5748_v10 = vor.u32 %v6304_v63, %v5747_v62  ;;  %v5544_v16 = vor.u32 %v6253_v7, %v5543_v6  ;;  %v5591_v62 = vld [vmem:[%s6791_s13 + $0x900] sm:$0xf]  ;;  %v6265_v63 = vld [vmem:[%s6791_s13 + $0x908] sm:$0xf0]  ;;  %v6355_v6 = vld [vmem:[%s6791_s13 + $0xbd8] sm:$0xf0] }
  0xcd   : > { %3425 = vmatpush.bf16.msrb.mxu2 %v5220_v11  ;;  %v5448_v11 = vor.u32 %v6229_v5, %v5447_v4  ;;  %v5951_v5 = vld [vmem:[%s6791_s13 + $0xbd0] sm:$0xf]  ;;  %v5997_v7 = vld [vmem:[%s6791_s13 + $0xac] sm:$0xf] }
  0xce   : > { %3438 = vmatpush.bf16.msrb.mxu3 %v5316_v17  ;;  %v5640_v17 = vor.u32 %v6277_v9, %v5639_v8  ;;  %v5400_v8 = vor.u32 %v6217_v55, %v5399_v54  ;;  %v4525_v9 = vld [vmem:[%s6791_s13 + $0xb4] sm:$0xf0]  ;;  %v5915_v54 = vld [vmem:[%s6791_s13 + $0xb88] sm:$0xf]  ;;  %v6346_v55 = vld [vmem:[%s6791_s13 + $0xb90] sm:$0xf0] }
  0xcf   : > { %3400 = vmatpush.bf16.msrb.mxu0 %v5016_v25  ;;  %v5736_v25 = vor.u32 %v6301_v13, %v5735_v12  ;;  %v5592_v13 = vor.u32 %v6265_v63, %v5591_v62  ;;  %v6012_v62 = vld [vmem:[%s6791_s13 + $0x124] sm:$0xf]  ;;  %v4585_v63 = vld [vmem:[%s6791_s13 + $0x12c] sm:$0xf0] }
  0xd0   : > { %3413 = vmatpush.bf16.msrb.mxu1 %v5112_v29  ;;  %v5532_v29 = vor.u32 %v6250_v21, %v5531_v20  ;;  %v4528_v20 = vor.u32 %v5997_v7, %v4525_v9  ;;  %v6343_v7 = vld [vmem:[%s6791_s13 + $0xb78] sm:$0xf0]  ;;  %v4477_v9 = vld [vmem:[%s6791_s13 + $0x54] sm:$0xf0] }
  0xd1   : > { %3426 = vmatpush.bf16.msrb.mxu2 %v5208_v30  ;;  %v5628_v30 = vor.u32 %v6274_v23, %v5627_v22  ;;  %v5855_v22 = vld [vmem:[%s6791_s13 + $0xb10] sm:$0xf]  ;;  %v6331_v23 = vld [vmem:[%s6791_s13 + $0xb18] sm:$0xf0] }
  0xd2   : > { %3439 = vmatpush.bf16.msrb.mxu3 %v5304_v37  ;;  %3401 = vmatmul.bf16.vlgmr.msrb.gmra.mxu0 %v7049_v0  ;;  %v6271_v37 = vld [vmem:[%s6791_s13 + $0x938] sm:$0xf0]  ;;  %v5856_v35 = vor.u32 %v6331_v23, %v5855_v22  ;;  %v5982_v22 = vld [vmem:[%s6791_s13 + $0x34] sm:$0xf]  ;;  %v4465_v23 = vld [vmem:[%s6791_s13 + $0x3c] sm:$0xf0] }
  0xd3   : > { %3445 = vmatpush.bf16.msra.mxu0 %v5484_v32  ;;  %3414 = vmatmul.bf16.vlgmr.msrb.gmra.mxu1 %v7033_v15  ;;  %v5423_v32 = vld [vmem:[%s6791_s13 + $0x7b0] sm:$0xf] }
  0xd4   : > { %3458 = vmatpush.bf16.msra.mxu1 %v5580_v33  ;;  %3427 = vmatmul.bf16.vlgmr.msrb.gmra.mxu2 %v1257_v43  ;;  %v6223_v33 = vld [vmem:[%s6791_s13 + $0x7b8] sm:$0xf0]  ;;  %v5411_v43 = vld [vmem:[%s6791_s13 + $0x798] sm:$0xf] }
  0xd5   : > { %3471 = vmatpush.bf16.msra.mxu2 %v5676_v36  ;;  %3440 = vmatmul.bf16.vlgmr.msrb.gmra.mxu3 %v1258_v49  ;;  %v5615_v36 = vld [vmem:[%s6791_s13 + $0x930] sm:$0xf]  ;;  %v5424_v39 = vor.u32 %v6223_v33, %v5423_v32  ;;  %v5712_v49 = vor.u32 %v6295_v14, %v5711_v40  ;;  %v4624_v32 = vor.u32 %v6021_v18, %v4621_v19  ;;  %v5843_v40 = vld [vmem:[%s6791_s13 + $0xaf8] sm:$0xf]  ;;  %v6328_v14 = vld [vmem:[%s6791_s13 + $0xb00] sm:$0xf0] }
  0xd6   : > { %3484 = vmatpush.bf16.msra.mxu3 %v5772_v44  ;;  %v5616_v42 = vor.u32 %v6271_v37, %v5615_v36  ;;  %v6220_v44 = vld [vmem:[%s6791_s13 + $0x7a0] sm:$0xf0]  ;;  %v1260_v33 = vld [vmem:[#allocation1 + $0x1b] sm:$0xff]  ;;  %v4609_v37 = vld [vmem:[%s6791_s13 + $0x15c] sm:$0xf0] }
  0xd7   : > { %3446 = vmatpush.bf16.msra.mxu0 %v5472_v45  ;;  %v5507_v45 = vld [vmem:[%s6791_s13 + $0x858] sm:$0xf]  ;;  %v6018_v36 = vld [vmem:[%s6791_s13 + $0x154] sm:$0xf]  ;;  %v5807_v18 = vld [vmem:[%s6791_s13 + $0xab0] sm:$0xf] }
  0xd8   : > { %3459 = vmatpush.bf16.msra.mxu1 %v5568_v50  ;;  %v5699_v50 = vld [vmem:[%s6791_s13 + $0x9d8] sm:$0xf]  ;;  %v5508_v57 = vor.u32 %v6244_v46, %v5507_v45  ;;  %v4612_v45 = vor.u32 %v6018_v36, %v4609_v37  ;;  %v5844_v46 = vor.u32 %v6328_v14, %v5843_v40  ;;  %v6319_v19 = vld [vmem:[%s6791_s13 + $0xab8] sm:$0xf0]  ;;  %v6337_v37 = vld [vmem:[%s6791_s13 + $0xb48] sm:$0xf0] }
  0xd9   : > { %3472 = vmatpush.bf16.msra.mxu2 %v5664_v51  ;;  %v5412_v51 = vor.u32 %v6220_v44, %v5411_v43  ;;  %v5700_v4 = vor.u32 %v6292_v53, %v5699_v50  ;;  %v5991_v43 = vld [vmem:[%s6791_s13 + $0x7c] sm:$0xf]  ;;  %v4501_v44 = vld [vmem:[%s6791_s13 + $0x84] sm:$0xf0]  ;;  %v6325_v53 = vld [vmem:[%s6791_s13 + $0xae8] sm:$0xf0] }
  0xda   : > { %3485 = vmatpush.bf16.msra.mxu3 %v5760_v60  ;;  %v5495_v60 = vld [vmem:[%s6791_s13 + $0x840] sm:$0xf]  ;;  %v4504_v50 = vor.u32 %v5991_v43, %v4501_v44  ;;  %v6003_v44 = vld [vmem:[%s6791_s13 + $0xdc] sm:$0xf] }
  0xdb   : > { %3447 = vmatpush.bf16.msra.mxu0 %v5460_v61  ;;  %v6241_v61 = vld [vmem:[%s6791_s13 + $0x848] sm:$0xf0] }
  0xdc   : > { %3460 = vmatpush.bf16.msra.mxu1 %v5556_v2  ;;  %v5867_v2 = vld [vmem:[%s6791_s13 + $0xb28] sm:$0xf]  ;;  %v5496_v12 = vor.u32 %v6241_v61, %v5495_v60  ;;  %v4600_v60 = vor.u32 %v6015_v47, %v4597_v48 }
  0xdd   : > { %3473 = vmatpush.bf16.msra.mxu2 %v5652_v3  ;;  %v6334_v3 = vld [vmem:[%s6791_s13 + $0xb30] sm:$0xf0] }
  0xde   : > { %3486 = vmatpush.bf16.msra.mxu3 %v5748_v10  ;;  %v5687_v10 = vld [vmem:[%s6791_s13 + $0x9c0] sm:$0xf] }
  0xdf   : > { %3448 = vmatpush.bf16.msra.mxu0 %v5448_v11  ;;  %v6289_v11 = vld [vmem:[%s6791_s13 + $0x9c8] sm:$0xf0] }
  0xe0   : > { %3461 = vmatpush.bf16.msra.mxu1 %v5544_v16  ;;  %v5868_v16 = vor.u32 %v6334_v3, %v5867_v2  ;;  %v5688_v21 = vor.u32 %v6289_v11, %v5687_v10  ;;  %v5916_v2 = vor.u32 %v6346_v55, %v5915_v54  ;;  %v4588_v10 = vor.u32 %v6012_v62, %v4585_v63  ;;  %v6042_v55 = vld [vmem:[%s6791_s13 + $0x214] sm:$0xf]  ;;  %v4705_v62 = vld [vmem:[%s6791_s13 + $0x21c] sm:$0xf0]  ;;  %v6093_v63 = vld [vmem:[%s6791_s13 + $0x3ac] sm:$0xf] }
  0xe1   : > { %3474 = vmatpush.bf16.msra.mxu2 %v5640_v17  ;;  %v5952_v17 = vor.u32 %v6355_v6, %v5951_v5  ;;  %v6322_v5 = vld [vmem:[%s6791_s13 + $0xad0] sm:$0xf0]  ;;  %v5903_v6 = vld [vmem:[%s6791_s13 + $0xb70] sm:$0xf] }
  0xe2   : > { %3487 = vmatpush.bf16.msra.mxu3 %v5736_v25  ;;  %v5939_v25 = vld [vmem:[%s6791_s13 + $0xbb8] sm:$0xf] }
  0xe3   : > { %3449 = vmatpush.bf16.msra.mxu0 %v5436_v26  ;;  %v6352_v26 = vld [vmem:[%s6791_s13 + $0xbc0] sm:$0xf0] }
  0xe4   : > { %3462 = vmatpush.bf16.msra.mxu1 %v5532_v29  ;;  %v1259_v29 = vld [vmem:[#allocation1 + $0x12] sm:$0xff] }
  0xe5   : > { %3475 = vmatpush.bf16.msra.mxu2 %v5628_v30  ;;  %v1261_v30 = vld [vmem:[#allocation1 + $0x24] sm:$0xff] }
  0xe6   : > { %3488 = vmatpush.bf16.msra.mxu3 %v5724_v38  ;;  %v5940_v38 = vor.u32 %v6352_v26, %v5939_v25  ;;  %v5808_v26 = vor.u32 %v6319_v19, %v5807_v18  ;;  %v6066_v18 = vld [vmem:[%s6791_s13 + $0x2d4] sm:$0xf]  ;;  %v4801_v19 = vld [vmem:[%s6791_s13 + $0x2dc] sm:$0xf0] }
  0xe7   : > { %3450 = vmatpush.bf16.msra.mxu0 %v5424_v39  ;;  %v4516_v39 = vor.u32 %v5994_v27, %v4513_v28  ;;  %v6006_v27 = vld [vmem:[%s6791_s13 + $0xf4] sm:$0xf]  ;;  %v4561_v28 = vld [vmem:[%s6791_s13 + $0xfc] sm:$0xf0] }
  0xe8   : > { %3463 = vmatpush.bf16.msra.mxu1 %v5520_v41  ;;  %v5927_v41 = vld [vmem:[%s6791_s13 + $0xba0] sm:$0xf]  ;;  %v4564_v14 = vor.u32 %v6006_v27, %v4561_v28  ;;  %v4804_v28 = vor.u32 %v6066_v18, %v4801_v19  ;;  %v6054_v18 = vld [vmem:[%s6791_s13 + $0x274] sm:$0xf] }
  0xe9   : > { %3476 = vmatpush.bf16.msra.mxu2 %v5616_v42  ;;  %v6349_v42 = vld [vmem:[%s6791_s13 + $0xba8] sm:$0xf0]  ;;  %v4897_v27 = vld [vmem:[%s6791_s13 + $0x39c] sm:$0xf0] }
  0xea   : > { %3489 = vmatpush.bf16.msra.mxu3 %v5712_v49  ;;  %v5928_v49 = vor.u32 %v6349_v42, %v5927_v41  ;;  %v6045_v41 = vld [vmem:[%s6791_s13 + $0x22c] sm:$0xf]  ;;  %v4717_v42 = vld [vmem:[%s6791_s13 + $0x234] sm:$0xf0]  ;;  %v4753_v19 = vld [vmem:[%s6791_s13 + $0x27c] sm:$0xf0] }
  0xeb   : > { %3451 = vmatpush.bf16.msra.mxu0 %v5412_v51  ;;  %v5831_v51 = vld [vmem:[%s6791_s13 + $0xae0] sm:$0xf]  ;;  %v4720_v54 = vor.u32 %v6045_v41, %v4717_v42  ;;  %v6087_v41 = vld [vmem:[%s6791_s13 + $0x37c] sm:$0xf]  ;;  %v4885_v42 = vld [vmem:[%s6791_s13 + $0x384] sm:$0xf0] }
  0xec   : > { %3464 = vmatpush.bf16.msra.mxu1 %v5508_v57  ;;  %v5988_v57 = vld [vmem:[%s6791_s13 + $0x64] sm:$0xf]  ;;  %v5832_v61 = vor.u32 %v6325_v53, %v5831_v51  ;;  %v4441_v51 = vld [vmem:[%s6791_s13 + $0xc] sm:$0xf0] }
  0xed   : > { %3477 = vmatpush.bf16.msra.mxu2 %v5604_v59  ;;  %v4489_v59 = vld [vmem:[%s6791_s13 + $0x6c] sm:$0xf0] }
  0xee   : > { %3490 = vmatpush.bf16.msra.mxu3 %v5700_v4  ;;  %v4492_v3 = vor.u32 %v5988_v57, %v4489_v59  ;;  %v5819_v4 = vld [vmem:[%s6791_s13 + $0xac8] sm:$0xf]  ;;  %v6069_v57 = vld [vmem:[%s6791_s13 + $0x2ec] sm:$0xf]  ;;  %v4813_v59 = vld [vmem:[%s6791_s13 + $0x2f4] sm:$0xf0] }
  0xef   : > { %3452 = vmatpush.bf16.msra.mxu0 %v5400_v8  ;;  %v5985_v8 = vld [vmem:[%s6791_s13 + $0x4c] sm:$0xf]  ;;  %v5820_v11 = vor.u32 %v6322_v5, %v5819_v4  ;;  %v6000_v5 = vld [vmem:[%s6791_s13 + $0xc4] sm:$0xf] }
  0xf0   : > { %3465 = vmatpush.bf16.msra.mxu1 %v5496_v12  ;;  %v6009_v12 = vld [vmem:[%s6791_s13 + $0x10c] sm:$0xf] }
  0xf1   : > { %3478 = vmatpush.bf16.msra.mxu2 %v5592_v13  ;;  %v4573_v13 = vld [vmem:[%s6791_s13 + $0x114] sm:$0xf0] }
  0xf2   : > { %3491 = vmatpush.bf16.msra.mxu3 %v5688_v21  ;;  %3453 = vmatmul.bf16.vlgmr.msra.gmra.mxu0 %v1259_v29  ;;  %v6340_v21 = vld [vmem:[%s6791_s13 + $0xb60] sm:$0xf0]  ;;  %v4576_v25 = vor.u32 %v6009_v12, %v4573_v13 }
  0xf3   : > { %3497 = vmatpush.bf16.msrb.mxu0 %v5868_v16  ;;  %3466 = vmatmul.bf16.vlgmr.msra.gmra.mxu1 %v1260_v33  ;;  %v5904_v16 = vor.u32 %v6343_v7, %v5903_v6  ;;  %v6316_v33 = vld [vmem:[%s6791_s13 + $0xaa0] sm:$0xf0]  ;;  %v4537_v6 = vld [vmem:[%s6791_s13 + $0xcc] sm:$0xf0] }
  0xf4   : > { %3511 = vmatpush.bf16.msrb.mxu1 %v5952_v17  ;;  %3479 = vmatmul.bf16.vlgmr.msra.gmra.mxu2 %v1261_v30  ;;  %v4480_v17 = vor.u32 %v5985_v8, %v4477_v9  ;;  %v4468_v30 = vor.u32 %v5982_v22, %v4465_v23  ;;  %v1189_v36 = vpop.f32.mrf.mxu1  ;;  %v4816_v8 = vor.u32 %v6069_v57, %v4813_v59  ;;  %v6117_v9 = vld [vmem:[%s6791_s13 + $0x46c] sm:$0xf]  ;;  %v4693_v22 = vld [vmem:[%s6791_s13 + $0x204] sm:$0xf0]  ;;  %v6108_v59 = vld [vmem:[%s6791_s13 + $0x424] sm:$0xf] }
  0xf5   : > { %3523 = vmatpush.bf16.msrb.mxu2 %v4528_v20  ;;  %3492 = vmatmul.bf16.vlgmr.msra.gmra.mxu3 %v1262_v34  ;;  %v5891_v20 = vld [vmem:[%s6791_s13 + $0xb58] sm:$0xf]  ;;  %v5879_v34 = vld [vmem:[%s6791_s13 + $0xb40] sm:$0xf]  ;;  %v1263_v23 = vld [vmem:[#allocation1 + $0x36] sm:$0xff] }
  0xf6   : > { %3536 = vmatpush.bf16.msrb.mxu3 %v4624_v32  ;;  %v5892_v29 = vor.u32 %v6340_v21, %v5891_v20  ;;  %v5795_v32 = vld [vmem:[%s6791_s13 + $0xa98] sm:$0xf]  ;;  %v5880_v47 = vor.u32 %v6337_v37, %v5879_v34  ;;  %v4540_v20 = vor.u32 %v6000_v5, %v4537_v6  ;;  %v6039_v21 = vld [vmem:[%s6791_s13 + $0x1fc] sm:$0xf]  ;;  %v6030_v5 = vld [vmem:[%s6791_s13 + $0x1b4] sm:$0xf] }
  0xf7   : > { %3498 = vmatpush.bf16.msrb.mxu0 %v5856_v35  ;;  %v1176_v35 = vpop.f32.mrf.mxu0  ;;  %v5796_v43 = vor.u32 %v6316_v33, %v5795_v32  ;;  %v4696_v33 = vor.u32 %v6039_v21, %v4693_v22  ;;  %v6063_v34 = vld [vmem:[%s6791_s13 + $0x2bc] sm:$0xf]  ;;  %v4657_v6 = vld [vmem:[%s6791_s13 + $0x1bc] sm:$0xf0]  ;;  %v4645_v22 = vld [vmem:[%s6791_s13 + $0x1a4] sm:$0xf0] }
  0xf8   : > { %3512 = vmatpush.bf16.msrb.mxu1 %v5940_v38  ;;  %v5979_v38 = vld [vmem:[%s6791_s13 + $0x1c] sm:$0xf]  ;;  %v7228_v40 = vadd.f32 %v1189_v36, %v1176_v35  ;;  %v1215_v53 = vpop.f32.mrf.mxu3  ;;  %v4789_v35 = vld [vmem:[%s6791_s13 + $0x2c4] sm:$0xf0] }
  0xf9   : > { %3524 = vmatpush.bf16.msrb.mxu2 %v4516_v39  ;;  %v4453_v39 = vld [vmem:[%s6791_s13 + $0x24] sm:$0xf0]  ;;  %v6027_v21 = vld [vmem:[%s6791_s13 + $0x19c] sm:$0xf] }
  0xfa   : > { %3537 = vmatpush.bf16.msrb.mxu3 %v4612_v45  ;;  %v4549_v45 = vld [vmem:[%s6791_s13 + $0xe4] sm:$0xf0]  ;;  %v4456_v48 = vor.u32 %v5979_v38, %v4453_v39  ;;  %v6036_v38 = vld [vmem:[%s6791_s13 + $0x1e4] sm:$0xf]  ;;  %v4681_v39 = vld [vmem:[%s6791_s13 + $0x1ec] sm:$0xf0] }
  0xfb   : > { %3499 = vmatpush.bf16.msrb.mxu0 %v5844_v46  ;;  %v5783_v46 = vld [vmem:[%s6791_s13 + $0xa80] sm:$0xf] }
  0xfc   : > { %3513 = vmatpush.bf16.msrb.mxu1 %v5928_v49  ;;  %v6313_v49 = vld [vmem:[%s6791_s13 + $0xa88] sm:$0xf0]  ;;  %v1191_v13 = vpop.f32.mrf.mxu1 }
  0xfd   : > { %3525 = vmatpush.bf16.msrb.mxu2 %v4504_v50  ;;  %v5976_v50 = vld [vmem:[%s6791_s13 + $0x4] sm:$0xf]  ;;  %v5784_v4 = vor.u32 %v6313_v49, %v5783_v46  ;;  %v4684_v46 = vor.u32 %v6036_v38, %v4681_v39  ;;  %v4888_v49 = vor.u32 %v6087_v41, %v4885_v42  ;;  %v6105_v13 = vld [vmem:[%s6791_s13 + $0x40c] sm:$0xf]  ;;  %v6075_v41 = vld [vmem:[%s6791_s13 + $0x31c] sm:$0xf] }
  0xfe   : > { %3538 = vmatpush.bf16.msrb.mxu3 %v4600_v60  ;;  %v1202_v60 = vpop.f32.mrf.mxu2  ;;  %v4444_v7 = vor.u32 %v5976_v50, %v4441_v51  ;;  %v6033_v50 = vld [vmem:[%s6791_s13 + $0x1cc] sm:$0xf]  ;;  %v4669_v51 = vld [vmem:[%s6791_s13 + $0x1d4] sm:$0xf0] }
  0xff   : > { %3500 = vmatpush.bf16.msrb.mxu0 %v5832_v61  ;;  %v4552_v61 = vor.u32 %v6003_v44, %v4549_v45  ;;  %v1178_v12 = vpop.f32.mrf.mxu0  ;;  %v6111_v44 = vld [vmem:[%s6791_s13 + $0x43c] sm:$0xf]  ;;  %v4981_v45 = vld [vmem:[%s6791_s13 + $0x444] sm:$0xf0] }
 0x100   : > { %3514 = vmatpush.bf16.msrb.mxu1 %v5916_v2  ;;  %v4909_v2 = vld [vmem:[%s6791_s13 + $0x3b4] sm:$0xf0]  ;;  %v1217_v32 = vpop.f32.mrf.mxu3 }
 0x101   : > { %3526 = vmatpush.bf16.msrb.mxu2 %v4492_v3  ;;  %v7244_v3 = vadd.f32 %v1215_v53, %v1202_v60  ;;  %v4984_v53 = vor.u32 %v6111_v44, %v4981_v45  ;;  %v4969_v60 = vld [vmem:[%s6791_s13 + $0x42c] sm:$0xf0]  ;;  %v4945_v32 = vld [vmem:[%s6791_s13 + $0x3fc] sm:$0xf0]  ;;  %v4837_v44 = vld [vmem:[%s6791_s13 + $0x324] sm:$0xf0] }
 0x102   : > { %3539 = vmatpush.bf16.msrb.mxu3 %v4588_v10  ;;  %v5005_v10 = vld [vmem:[%s6791_s13 + $0x474] sm:$0xf0]  ;;  %v6141_v45 = vld [vmem:[%s6791_s13 + $0x52c] sm:$0xf] }
 0x103   : > { %3501 = vmatpush.bf16.msrb.mxu0 %v5820_v11  ;;  %v1264_v11 = vld [vmem:[#allocation1 + $0x3f] sm:$0xff] }
 0x104   : > { %3515 = vmatpush.bf16.msrb.mxu1 %v5904_v16  ;;  %v4708_v16 = vor.u32 %v6042_v55, %v4705_v62  ;;  %v4873_v55 = vld [vmem:[%s6791_s13 + $0x36c] sm:$0xf0]  ;;  %v4672_v62 = vor.u32 %v6033_v50, %v4669_v51  ;;  %v6048_v51 = vld [vmem:[%s6791_s13 + $0x244] sm:$0xf] }
 0x105   : > { %3527 = vmatpush.bf16.msrb.mxu2 %v4480_v17  ;;  %v4912_v17 = vor.u32 %v6093_v63, %v4909_v2  ;;  %v6057_v63 = vld [vmem:[%s6791_s13 + $0x28c] sm:$0xf]  ;;  %v4765_v2 = vld [vmem:[%s6791_s13 + $0x294] sm:$0xf0] }
 0x106   : > { %3540 = vmatpush.bf16.msrb.mxu3 %v4576_v25  ;;  %v5008_v25 = vor.u32 %v6117_v9, %v5005_v10  ;;  %v1204_v36 = vpop.f32.mrf.mxu2  ;;  %v6081_v9 = vld [vmem:[%s6791_s13 + $0x34c] sm:$0xf]  ;;  %v4861_v10 = vld [vmem:[%s6791_s13 + $0x354] sm:$0xf0]  ;;  %v4768_v12 = vor.u32 %v6057_v63, %v4765_v2  ;;  %v6138_v63 = vld [vmem:[%s6791_s13 + $0x514] sm:$0xf] }
 0x107   : > { %3502 = vmatpush.bf16.msrb.mxu0 %v5808_v26  ;;  %v6090_v26 = vld [vmem:[%s6791_s13 + $0x394] sm:$0xf]  ;;  %v6051_v36 = vld [vmem:[%s6791_s13 + $0x25c] sm:$0xf]  ;;  %v5089_v2 = vld [vmem:[%s6791_s13 + $0x51c] sm:$0xf0] }
 0x108   : > { %3516 = vmatpush.bf16.msrb.mxu1 %v5892_v29  ;;  %v6114_v29 = vld [vmem:[%s6791_s13 + $0x454] sm:$0xf]  ;;  %v4900_v37 = vor.u32 %v6090_v26, %v4897_v27  ;;  %v4849_v27 = vld [vmem:[%s6791_s13 + $0x33c] sm:$0xf0] }
 0x109   : > { %3528 = vmatpush.bf16.msrb.mxu2 %v4468_v30  ;;  %v4993_v30 = vld [vmem:[%s6791_s13 + $0x45c] sm:$0xf0]  ;;  %v6078_v26 = vld [vmem:[%s6791_s13 + $0x334] sm:$0xf] }
 0x10a   : > { %3541 = vmatpush.bf16.msrb.mxu3 %v4564_v14  ;;  %v4996_v14 = vor.u32 %v6114_v29, %v4993_v30  ;;  %v4756_v29 = vor.u32 %v6054_v18, %v4753_v19  ;;  %v6102_v30 = vld [vmem:[%s6791_s13 + $0x3f4] sm:$0xf]  ;;  %v4852_v39 = vor.u32 %v6078_v26, %v4849_v27  ;;  %v5092_v18 = vor.u32 %v6138_v63, %v5089_v2  ;;  %v5149_v63 = vld [vmem:[%s6791_s13 + $0x594] sm:$0xf0] }
 0x10b   : > { %3503 = vmatpush.bf16.msrb.mxu0 %v5796_v43  ;;  %v4792_v43 = vor.u32 %v6063_v34, %v4789_v35  ;;  %v4648_v35 = vor.u32 %v6027_v21, %v4645_v22  ;;  %v6162_v19 = vld [vmem:[%s6791_s13 + $0x5d4] sm:$0xf] }
 0x10c   : > { %3517 = vmatpush.bf16.msrb.mxu1 %v5880_v47  ;;  %v6060_v47 = vld [vmem:[%s6791_s13 + $0x2a4] sm:$0xf]  ;;  %v6186_v27 = vld [vmem:[%s6791_s13 + $0x694] sm:$0xf] }
 0x10d   : > { %3529 = vmatpush.bf16.msrb.mxu2 %v4456_v48  ;;  %v4777_v48 = vld [vmem:[%s6791_s13 + $0x2ac] sm:$0xf0] }
 0x10e   : > { %3542 = vmatpush.bf16.msrb.mxu3 %v4552_v61  ;;  %v4780_v57 = vor.u32 %v6060_v47, %v4777_v48  ;;  %v6099_v48 = vld [vmem:[%s6791_s13 + $0x3dc] sm:$0xf] }
 0x10f   : > { %3504 = vmatpush.bf16.msrb.mxu0 %v5784_v4  ;;  %5961 = vmatmul.msk.bf16.vlgmr.msrb.gmra.mxu1 %vm3312_vm0, %v1264_v11  ;;  %v1228_v61 = vpop.f32.mrf.mxu0 }
 0x110   : > { %3549 = vmatpush.bf16.msra.mxu1 %v4720_v54  ;;  %v6084_v54 = vld [vmem:[%s6791_s13 + $0x364] sm:$0xf] }
 0x111   : > { %3530 = vmatpush.bf16.msrb.mxu2 %v4444_v7  ;;  %v4876_v4 = vor.u32 %v6084_v54, %v4873_v55  ;;  %v1241_v7 = vpop.f32.mrf.mxu1  ;;  %v6072_v54 = vld [vmem:[%s6791_s13 + $0x304] sm:$0xf]  ;;  %v4840_v55 = vor.u32 %v6075_v41, %v4837_v44  ;;  %v5269_v41 = vld [vmem:[%s6791_s13 + $0x684] sm:$0xf0] }
 0x112   : > { %3543 = vmatpush.bf16.msrb.mxu3 %v4540_v20  ;;  %3505 = vmatmul.bf16.vlgmr.msrb.gmra.mxu0 %v1263_v23  ;;  %v7283_v11 = vadd.f32 %v1241_v7, %v1228_v61  ;;  %v4864_v20 = vor.u32 %v6081_v9, %v4861_v10  ;;  %v5197_v61 = vld [vmem:[%s6791_s13 + $0x5f4] sm:$0xf0]  ;;  %v4921_v9 = vld [vmem:[%s6791_s13 + $0x3cc] sm:$0xf0]  ;;  %v5365_v44 = vld [vmem:[%s6791_s13 + $0x744] sm:$0xf0] }
 0x113   : > { %3562 = vmatpush.bf16.msra.mxu0 %v4816_v8  ;;  %v4972_v8 = vor.u32 %v6108_v59, %v4969_v60  ;;  %v4825_v59 = vld [vmem:[%s6791_s13 + $0x30c] sm:$0xf0]  ;;  %v6165_v60 = vld [vmem:[%s6791_s13 + $0x5ec] sm:$0xf]  ;;  %v5293_v7 = vld [vmem:[%s6791_s13 + $0x6b4] sm:$0xf0] }
 0x114   : > { %3550 = vmatpush.bf16.msra.mxu1 %v4708_v16  ;;  %3531 = vmatmul.bf16.vlgmr.msrb.gmra.mxu2 %v6967_v24  ;;  %v4957_v16 = vld [vmem:[%s6791_s13 + $0x414] sm:$0xf0]  ;;  %v5200_v10 = vor.u32 %v6165_v60, %v5197_v61 }
 0x115   : > { %3575 = vmatpush.bf16.msra.mxu2 %v4912_v17  ;;  %3544 = vmatmul.bf16.vlgmr.msrb.gmra.mxu3 %v6973_v31  ;;  %v4660_v17 = vor.u32 %v6030_v5, %v4657_v6 }
 0x116   : > { %3588 = vmatpush.bf16.msra.mxu3 %v5008_v25  ;;  %v4960_v25 = vor.u32 %v6105_v13, %v4957_v16  ;;  %v5389_v13 = vld [vmem:[%s6791_s13 + $0x774] sm:$0xf0] }
 0x117   : > { %3563 = vmatpush.bf16.msra.mxu0 %v4804_v28  ;;  %v3324_v23 = vpop.f32.mrf.mxu2 }
 0x118   : > { %3551 = vmatpush.bf16.msra.mxu1 %v4696_v33  ;;  %v3325_v28 = vadd.f32 %v3324_v23, %v7228_v40  ;;  %v1230_v33 = vpop.f32.mrf.mxu0  ;;  %v3337_v34 = vpop.f32.mrf.mxu3  ;;  %v6024_v40 = vld [vmem:[%s6791_s13 + $0x184] sm:$0xf]  ;;  %v6135_v23 = vld [vmem:[%s6791_s13 + $0x4fc] sm:$0xf] }
 0x119   : > { %3576 = vmatpush.bf16.msra.mxu2 %v4900_v37  ;;  %v4741_v37 = vld [vmem:[%s6791_s13 + $0x264] sm:$0xf0]  ;;  %v1243_v42 = vpop.f32.mrf.mxu1 }
 0x11a   : > { %3589 = vmatpush.bf16.msra.mxu3 %v4996_v14  ;;  %v7298_v38 = vadd.f32 %v3337_v34, %v3325_v28  ;;  %v4633_v14 = vld [vmem:[%s6791_s13 + $0x18c] sm:$0xf0]  ;;  %v4744_v47 = vor.u32 %v6051_v36, %v4741_v37  ;;  %v5281_v28 = vld [vmem:[%s6791_s13 + $0x69c] sm:$0xf0]  ;;  %v6159_v34 = vld [vmem:[%s6791_s13 + $0x5bc] sm:$0xf] }
 0x11b   : > { %3564 = vmatpush.bf16.msra.mxu0 %v4792_v43  ;;  %v4948_v43 = vor.u32 %v6102_v30, %v4945_v32  ;;  %v4636_v50 = vor.u32 %v6024_v40, %v4633_v14  ;;  %v6210_v30 = vld [vmem:[%s6791_s13 + $0x754] sm:$0xf]  ;;  %v5377_v32 = vld [vmem:[%s6791_s13 + $0x75c] sm:$0xf0]  ;;  %v5284_v36 = vor.u32 %v6186_v27, %v5281_v28  ;;  %v6132_v37 = vld [vmem:[%s6791_s13 + $0x4e4] sm:$0xf] }
 0x11c   : > { %3552 = vmatpush.bf16.msra.mxu1 %v4684_v46  ;;  %v5101_v46 = vld [vmem:[%s6791_s13 + $0x534] sm:$0xf0]  ;;  %v5380_v40 = vor.u32 %v6210_v30, %v5377_v32  ;;  %v6183_v14 = vld [vmem:[%s6791_s13 + $0x67c] sm:$0xf]  ;;  %v5329_v30 = vld [vmem:[%s6791_s13 + $0x6fc] sm:$0xf0] }
 0x11d   : > { %3577 = vmatpush.bf16.msra.mxu2 %v4888_v49  ;;  %v4933_v49 = vld [vmem:[%s6791_s13 + $0x3e4] sm:$0xf0] }
 0x11e   : > { %3590 = vmatpush.bf16.msra.mxu3 %v4984_v53  ;;  %v4729_v53 = vld [vmem:[%s6791_s13 + $0x24c] sm:$0xf0] }
 0x11f   : > { %3565 = vmatpush.bf16.msra.mxu0 %v4780_v57  ;;  %v5104_v57 = vor.u32 %v6141_v45, %v5101_v46  ;;  %v3326_v5 = vpop.f32.mrf.mxu2  ;;  %v4732_v6 = vor.u32 %v6048_v51, %v4729_v53  ;;  %v6156_v46 = vld [vmem:[%s6791_s13 + $0x5a4] sm:$0xf] }
 0x120   : > { %3553 = vmatpush.bf16.msra.mxu1 %v4672_v62  ;;  %v4936_v62 = vor.u32 %v6099_v48, %v4933_v49  ;;  %v3339_v16 = vpop.f32.mrf.mxu3  ;;  %v5272_v48 = vor.u32 %v6183_v14, %v5269_v41  ;;  %v6129_v49 = vld [vmem:[%s6791_s13 + $0x4cc] sm:$0xf]  ;;  %v6180_v53 = vld [vmem:[%s6791_s13 + $0x664] sm:$0xf]  ;;  %v5017_v14 = vld [vmem:[%s6791_s13 + $0x48c] sm:$0xf0] }
 0x121   : > { %3578 = vmatpush.bf16.msra.mxu2 %v4876_v4  ;;  %v6189_v4 = vld [vmem:[%s6791_s13 + $0x6ac] sm:$0xf]  ;;  %v6171_v41 = vld [vmem:[%s6791_s13 + $0x61c] sm:$0xf] }
 0x122   : > { %3591 = vmatpush.bf16.msra.mxu3 %v4972_v8  ;;  %v6096_v8 = vld [vmem:[%s6791_s13 + $0x3c4] sm:$0xf]  ;;  %v5296_v21 = vor.u32 %v6189_v4, %v5293_v7  ;;  %v5041_v7 = vld [vmem:[%s6791_s13 + $0x4bc] sm:$0xf0]  ;;  %v6201_v16 = vld [vmem:[%s6791_s13 + $0x70c] sm:$0xf] }
 0x123   : > { %3566 = vmatpush.bf16.msra.mxu0 %v4768_v12  ;;  %v6213_v12 = vld [vmem:[%s6791_s13 + $0x76c] sm:$0xf]  ;;  %v4924_v22 = vor.u32 %v6096_v8, %v4921_v9 }
 0x124   : > { %3554 = vmatpush.bf16.msra.mxu1 %v4660_v17  ;;  %v4828_v17 = vor.u32 %v6072_v54, %v4825_v59  ;;  %v5392_v26 = vor.u32 %v6213_v12, %v5389_v13  ;;  %v5257_v54 = vld [vmem:[%s6791_s13 + $0x66c] sm:$0xf0]  ;;  %v6177_v9 = vld [vmem:[%s6791_s13 + $0x64c] sm:$0xf] }
 0x125   : > { %3579 = vmatpush.bf16.msra.mxu2 %v4864_v20  ;;  %v5185_v20 = vld [vmem:[%s6791_s13 + $0x5dc] sm:$0xf0]  ;;  %v5353_v59 = vld [vmem:[%s6791_s13 + $0x72c] sm:$0xf0]  ;;  %v5260_v4 = vor.u32 %v6180_v53, %v5257_v54  ;;  %v6144_v53 = vld [vmem:[%s6791_s13 + $0x544] sm:$0xf] }
 0x126   : > { %3592 = vmatpush.bf16.msra.mxu3 %v4960_v25  ;;  %v5077_v25 = vld [vmem:[%s6791_s13 + $0x504] sm:$0xf0]  ;;  %v5113_v54 = vld [vmem:[%s6791_s13 + $0x54c] sm:$0xf0] }
 0x127   : > { %3567 = vmatpush.bf16.msra.mxu0 %v4756_v29  ;;  %v5188_v29 = vor.u32 %v6162_v19, %v5185_v20  ;;  %v5080_v33 = vor.u32 %v6135_v23, %v5077_v25  ;;  %v5137_v19 = vld [vmem:[%s6791_s13 + $0x57c] sm:$0xf0]  ;;  %v6174_v25 = vld [vmem:[%s6791_s13 + $0x634] sm:$0xf] }
 0x128   : > { %3555 = vmatpush.bf16.msra.mxu1 %v4648_v35  ;;  %v5173_v35 = vld [vmem:[%s6791_s13 + $0x5c4] sm:$0xf0] }
 0x129   : > { %3580 = vmatpush.bf16.msra.mxu2 %v4852_v39  ;;  %v5065_v39 = vld [vmem:[%s6791_s13 + $0x4ec] sm:$0xf0]  ;;  %v5176_v42 = vor.u32 %v6159_v34, %v5173_v35  ;;  %v6147_v35 = vld [vmem:[%s6791_s13 + $0x55c] sm:$0xf] }
 0x12a   : > { %3593 = vmatpush.bf16.msra.mxu3 %v4948_v43  ;;  %v6207_v43 = vld [vmem:[%s6791_s13 + $0x73c] sm:$0xf]  ;;  %v5068_v45 = vor.u32 %v6132_v37, %v5065_v39 }
 0x12b   : > { %3568 = vmatpush.bf16.msra.mxu0 %v4744_v47  ;;  %v5161_v47 = vld [vmem:[%s6791_s13 + $0x5ac] sm:$0xf0]  ;;  %v5368_v51 = vor.u32 %v6207_v43, %v5365_v44 }
 0x12c   : > { %3556 = vmatpush.bf16.msra.mxu1 %v4636_v50  ;;  %v5053_v50 = vld [vmem:[%s6791_s13 + $0x4d4] sm:$0xf0] }
 0x12d   : > { %3581 = vmatpush.bf16.msra.mxu2 %v4840_v55  ;;  %v5164_v55 = vor.u32 %v6156_v46, %v5161_v47  ;;  %v5056_v61 = vor.u32 %v6129_v49, %v5053_v50  ;;  %v6237_v46 = vld [vmem:[%s6791_s13 + $0x82c] sm:$0xf]  ;;  %v5485_v47 = vld [vmem:[%s6791_s13 + $0x834] sm:$0xf0]  ;;  %v6195_v49 = vld [vmem:[%s6791_s13 + $0x6dc] sm:$0xf] }
 0x12e   : > { %3594 = vmatpush.bf16.msra.mxu3 %v4936_v62  ;;  %v6153_v62 = vld [vmem:[%s6791_s13 + $0x58c] sm:$0xf]  ;;  %v5317_v50 = vld [vmem:[%s6791_s13 + $0x6e4] sm:$0xf0] }
 0x12f   : > { %3557 = vmatmul.bf16.vlgmr.msra.gmra.mxu1 %v7035_v52  ;;  %3569 = vmatpush.bf16.msra.mxu0 %v4732_v6  ;;  %v3350_v60 = vpop.f32.mrf.mxu0  ;;  %v6126_v6 = vld [vmem:[%s6791_s13 + $0x4b4] sm:$0xf]  ;;  %v5152_v13 = vor.u32 %v6153_v62, %v5149_v63  ;;  %v5581_v62 = vld [vmem:[%s6791_s13 + $0x8f4] sm:$0xf0]  ;;  %v5320_v63 = vor.u32 %v6195_v49, %v5317_v50  ;;  %v6252_v49 = vld [vmem:[%s6791_s13 + $0x8a4] sm:$0xf] }
 0x130   : > { %3601 = vmatpush.bf16.msrb.mxu1 %v5104_v57  ;;  %v6204_v57 = vld [vmem:[%s6791_s13 + $0x724] sm:$0xf]  ;;  %v3351_v2 = vadd.f32 %v3350_v60, %v7298_v38  ;;  %v3363_v5 = vpop.f32.mrf.mxu1  ;;  %v5044_v38 = vor.u32 %v6126_v6, %v5041_v7  ;;  %v5209_v60 = vld [vmem:[%s6791_s13 + $0x60c] sm:$0xf0]  ;;  %v5116_v6 = vor.u32 %v6144_v53, %v5113_v54  ;;  %v5677_v7 = vld [vmem:[%s6791_s13 + $0x9b4] sm:$0xf0] }
 0x131   : > { %3582 = vmatpush.bf16.msra.mxu2 %v4828_v17  ;;  %v5356_v8 = vor.u32 %v6204_v57, %v5353_v59  ;;  %v5341_v17 = vld [vmem:[%s6791_s13 + $0x714] sm:$0xf0]  ;;  %v5488_v59 = vor.u32 %v6237_v46, %v5485_v47  ;;  %v5749_v46 = vld [vmem:[%s6791_s13 + $0xa44] sm:$0xf0]  ;;  %v5545_v50 = vld [vmem:[%s6791_s13 + $0x8ac] sm:$0xf0] }
 0x132   : > { %3595 = vmatpush.bf16.msra.mxu3 %v4924_v22  ;;  %3570 = vmatmul.bf16.vlgmr.msra.gmra.mxu0 %v7042_v58  ;;  %v3364_v12 = vadd.f32 %v3363_v5, %v3351_v2  ;;  %v5029_v22 = vld [vmem:[%s6791_s13 + $0x4a4] sm:$0xf0]  ;;  %v5344_v23 = vor.u32 %v6201_v16, %v5341_v17  ;;  %v6234_v2 = vld [vmem:[%s6791_s13 + $0x814] sm:$0xf]  ;;  %v6285_v5 = vld [vmem:[%s6791_s13 + $0x9ac] sm:$0xf] }
 0x133   : > { %3614 = vmatpush.bf16.msrb.mxu0 %v5200_v10  ;;  %v5245_v10 = vld [vmem:[%s6791_s13 + $0x654] sm:$0xf0]  ;;  %v6225_v53 = vld [vmem:[%s6791_s13 + $0x7cc] sm:$0xf] }
 0x134   : > { %3602 = vmatpush.bf16.msrb.mxu1 %v5092_v18  ;;  %3583 = vmatmul.bf16.vlgmr.msra.gmra.mxu2 %v7040_v56  ;;  %v6150_v18 = vld [vmem:[%s6791_s13 + $0x574] sm:$0xf]  ;;  %v5248_v20 = vor.u32 %v6177_v9, %v5245_v10  ;;  %v5305_v9 = vld [vmem:[%s6791_s13 + $0x6cc] sm:$0xf0]  ;;  %v5773_v16 = vld [vmem:[%s6791_s13 + $0xa74] sm:$0xf0] }
 0x135   : > { %3627 = vmatpush.bf16.msrb.mxu2 %v5296_v21  ;;  %3596 = vmatmul.bf16.vlgmr.msra.gmra.mxu3 %v7051_v1  ;;  %v6123_v21 = vld [vmem:[%s6791_s13 + $0x49c] sm:$0xf]  ;;  %v5140_v28 = vor.u32 %v6150_v18, %v5137_v19  ;;  %v6258_v19 = vld [vmem:[%s6791_s13 + $0x8d4] sm:$0xf]  ;;  %v5437_v54 = vld [vmem:[%s6791_s13 + $0x7d4] sm:$0xf0] }
 0x136   : > { %3640 = vmatpush.bf16.msrb.mxu3 %v5392_v26  ;;  %v5233_v26 = vld [vmem:[%s6791_s13 + $0x63c] sm:$0xf0]  ;;  %v5032_v34 = vor.u32 %v6123_v21, %v5029_v22  ;;  %v5680_v21 = vor.u32 %v6285_v5, %v5677_v7  ;;  %v6222_v7 = vld [vmem:[%s6791_s13 + $0x7b4] sm:$0xf] }
 0x137   : > { %3615 = vmatpush.bf16.msrb.mxu0 %v5188_v29  ;;  %v3376_v27 = vpop.f32.mrf.mxu2  ;;  %v6198_v29 = vld [vmem:[%s6791_s13 + $0x6f4] sm:$0xf]  ;;  %v3352_v37 = vpop.f32.mrf.mxu0  ;;  %v5236_v39 = vor.u32 %v6174_v25, %v5233_v26  ;;  %v5461_v25 = vld [vmem:[%s6791_s13 + $0x804] sm:$0xf0] }
 0x138   : > { %3603 = vmatpush.bf16.msrb.mxu1 %v5080_v33  ;;  %v3377_v32 = vadd.f32 %v3376_v27, %v3364_v12  ;;  %v3389_v33 = vpop.f32.mrf.mxu3  ;;  %v5332_v44 = vor.u32 %v6198_v29, %v5329_v30  ;;  %v6282_v27 = vld [vmem:[%s6791_s13 + $0x994] sm:$0xf]  ;;  %v6228_v37 = vld [vmem:[%s6791_s13 + $0x7e4] sm:$0xf] }
 0x139   : > { %3628 = vmatpush.bf16.msrb.mxu2 %v5284_v36  ;;  %v5125_v36 = vld [vmem:[%s6791_s13 + $0x564] sm:$0xf0]  ;;  %v6306_v30 = vld [vmem:[%s6791_s13 + $0xa54] sm:$0xf] }
 0x13a   : > { %3641 = vmatpush.bf16.msrb.mxu3 %v5380_v40  ;;  %v6120_v40 = vld [vmem:[%s6791_s13 + $0x484] sm:$0xf]  ;;  %v7372_v43 = vadd.f32 %v3389_v33, %v3377_v32  ;;  %v5761_v32 = vld [vmem:[%s6791_s13 + $0xa5c] sm:$0xf0] }
 0x13b   : > { %3616 = vmatpush.bf16.msrb.mxu0 %v5176_v42  ;;  %v3365_v42 = vpop.f32.mrf.mxu1  ;;  %v6464_v47 = vld [vmem:[#allocation1 + $0x9] sm:$0xff] }
 0x13c   : > { %3604 = vmatpush.bf16.msrb.mxu1 %v5068_v45  ;;  %v5221_v45 = vld [vmem:[%s6791_s13 + $0x624] sm:$0xf0]  ;;  %v6463_v42 = vld [vmem:[#allocation1] sm:$0xff] }
 0x13d   : > { %3629 = vmatpush.bf16.msrb.mxu2 %v5272_v48  ;;  %v5128_v48 = vor.u32 %v6147_v35, %v5125_v36  ;;  %v5224_v57 = vor.u32 %v6171_v41, %v5221_v45  ;;  %v5557_v35 = vld [vmem:[%s6791_s13 + $0x8c4] sm:$0xf0]  ;;  %v6303_v45 = vld [vmem:[%s6791_s13 + $0xa3c] sm:$0xf] }
 0x13e   : > { %3642 = vmatpush.bf16.msrb.mxu3 %v5368_v51  ;;  %v5020_v51 = vor.u32 %v6120_v40, %v5017_v14  ;;  %v5764_v40 = vor.u32 %v6306_v30, %v5761_v32  ;;  %v6279_v14 = vld [vmem:[%s6791_s13 + $0x97c] sm:$0xf]  ;;  %v5653_v41 = vld [vmem:[%s6791_s13 + $0x984] sm:$0xf0]  ;;  %v6294_v32 = vld [vmem:[%s6791_s13 + $0x9f4] sm:$0xf] }
 0x13f   : > { %3617 = vmatpush.bf16.msrb.mxu0 %v5164_v55  ;;  %v6168_v55 = vld [vmem:[%s6791_s13 + $0x604] sm:$0xf]  ;;  %v3378_v10 = vpop.f32.mrf.mxu2 }
 0x140   : > { %3605 = vmatpush.bf16.msrb.mxu1 %v5056_v61  ;;  %v6261_v61 = vld [vmem:[%s6791_s13 + $0x8ec] sm:$0xf]  ;;  %v3391_v17 = vpop.f32.mrf.mxu3 }
 0x141   : > { %3630 = vmatpush.bf16.msrb.mxu2 %v5260_v4  ;;  %v5473_v4 = vld [vmem:[%s6791_s13 + $0x81c] sm:$0xf0]  ;;  %v5584_v12 = vor.u32 %v6261_v61, %v5581_v62  ;;  %v6300_v61 = vld [vmem:[%s6791_s13 + $0xa24] sm:$0xf]  ;;  %v5737_v62 = vld [vmem:[%s6791_s13 + $0xa2c] sm:$0xf0] }
 0x142   : > { %3643 = vmatpush.bf16.msrb.mxu3 %v5356_v8  ;;  %v6192_v8 = vld [vmem:[%s6791_s13 + $0x6c4] sm:$0xf]  ;;  %v5476_v18 = vor.u32 %v6234_v2, %v5473_v4  ;;  %v6249_v2 = vld [vmem:[%s6791_s13 + $0x88c] sm:$0xf]  ;;  %v5533_v4 = vld [vmem:[%s6791_s13 + $0x894] sm:$0xf0] }
 0x143   : > { %3618 = vmatpush.bf16.msrb.mxu0 %v5152_v13  ;;  %v6309_v13 = vld [vmem:[%s6791_s13 + $0xa6c] sm:$0xf]  ;;  %v5308_v22 = vor.u32 %v6192_v8, %v5305_v9  ;;  %v5425_v8 = vld [vmem:[%s6791_s13 + $0x7bc] sm:$0xf0]  ;;  %v5536_v17 = vor.u32 %v6249_v2, %v5533_v4  ;;  %v6354_v2 = vld [vmem:[%s6791_s13 + $0xbd4] sm:$0xf] }
 0x144   : > { %3606 = vmatpush.bf16.msrb.mxu1 %v5044_v38  ;;  %v5212_v38 = vor.u32 %v6168_v55, %v5209_v60  ;;  %v5776_v26 = vor.u32 %v6309_v13, %v5773_v16  ;;  %v5752_v55 = vor.u32 %v6303_v45, %v5749_v46  ;;  %v5548_v60 = vor.u32 %v6252_v49, %v5545_v50  ;;  %v6273_v13 = vld [vmem:[%s6791_s13 + $0x94c] sm:$0xf]  ;;  %v5629_v16 = vld [vmem:[%s6791_s13 + $0x954] sm:$0xf0]  ;;  %v5953_v4 = vld [vmem:[%s6791_s13 + $0xbdc] sm:$0xf0] }
 0x145   : > { %3631 = vmatpush.bf16.msrb.mxu2 %v5248_v20  ;;  %v5569_v20 = vld [vmem:[%s6791_s13 + $0x8dc] sm:$0xf0]  ;;  %v5869_v49 = vld [vmem:[%s6791_s13 + $0xb34] sm:$0xf0] }
 0x146   : > { %3644 = vmatpush.bf16.msrb.mxu3 %v5344_v23  ;;  %v6231_v23 = vld [vmem:[%s6791_s13 + $0x7fc] sm:$0xf]  ;;  %v5572_v29 = vor.u32 %v6258_v19, %v5569_v20  ;;  %v5428_v20 = vor.u32 %v6222_v7, %v5425_v8  ;;  %v5857_v7 = vld [vmem:[%s6791_s13 + $0xb1c] sm:$0xf0]  ;;  %v4531_v8 = vld [vmem:[%s6791_s13 + $0xb0] sm:$0xf] }
 0x147   : > { %3619 = vmatpush.bf16.msrb.mxu0 %v5140_v28  ;;  %v5665_v28 = vld [vmem:[%s6791_s13 + $0x99c] sm:$0xf0]  ;;  %v5464_v33 = vor.u32 %v6231_v23, %v5461_v25  ;;  %v6219_v23 = vld [vmem:[%s6791_s13 + $0x79c] sm:$0xf]  ;;  %v5413_v25 = vld [vmem:[%s6791_s13 + $0x7a4] sm:$0xf0] }
 0x148   : > { %3607 = vmatpush.bf16.msrb.mxu1 %v5032_v34  ;;  %v6255_v34 = vld [vmem:[%s6791_s13 + $0x8bc] sm:$0xf]  ;;  %v5668_v36 = vor.u32 %v6282_v27, %v5665_v28  ;;  %v6270_v27 = vld [vmem:[%s6791_s13 + $0x934] sm:$0xf]  ;;  %v5617_v28 = vld [vmem:[%s6791_s13 + $0x93c] sm:$0xf0] }
 0x149   : > { %3632 = vmatpush.bf16.msrb.mxu2 %v5236_v39  ;;  %v5449_v39 = vld [vmem:[%s6791_s13 + $0x7ec] sm:$0xf0] }
 0x14a   : > { %3645 = vmatpush.bf16.msrb.mxu3 %v5332_v44  ;;  %v5560_v44 = vor.u32 %v6255_v34, %v5557_v35  ;;  %v5416_v35 = vor.u32 %v6219_v23, %v5413_v25 }
 0x14b   : > { %3620 = vmatpush.bf16.msrb.mxu0 %v5128_v48  ;;  %v5452_v48 = vor.u32 %v6228_v37, %v5449_v39  ;;  %v5509_v37 = vld [vmem:[%s6791_s13 + $0x864] sm:$0xf0] }
 0x14c   : > { %3608 = vmatpush.bf16.msrb.mxu1 %v5020_v51  ;;  %v5656_v51 = vor.u32 %v6279_v14, %v5653_v41  ;;  %v6216_v14 = vld [vmem:[%s6791_s13 + $0x784] sm:$0xf]  ;;  %v5401_v41 = vld [vmem:[%s6791_s13 + $0x78c] sm:$0xf0] }
 0x14d   : > { %3633 = vmatpush.bf16.msrb.mxu2 %v5224_v57  ;;  %v6276_v57 = vld [vmem:[%s6791_s13 + $0x964] sm:$0xf] }
 0x14e   : > { %3646 = vmatpush.bf16.msrb.mxu3 %v5320_v63  ;;  %v5440_v63 = vor.u32 %v6225_v53, %v5437_v54  ;;  %v6291_v53 = vld [vmem:[%s6791_s13 + $0x9dc] sm:$0xf]  ;;  %v5701_v54 = vld [vmem:[%s6791_s13 + $0x9e4] sm:$0xf0] }
 0x14f   : > { %3609 = vmatmul.bf16.vlgmr.msrb.gmra.mxu1 %v7049_v0  ;;  %3621 = vmatpush.bf16.msrb.mxu0 %v5116_v6  ;;  %v3402_v5 = vpop.f32.mrf.mxu0 }
 0x150   : > { %3653 = vmatpush.bf16.msra.mxu1 %v5488_v59  ;;  %v5641_v59 = vld [vmem:[%s6791_s13 + $0x96c] sm:$0xf0]  ;;  %v3403_v9 = vadd.f32 %v3402_v5, %v7372_v43  ;;  %v3415_v10 = vpop.f32.mrf.mxu1  ;;  %v5632_v43 = vor.u32 %v6273_v13, %v5629_v16  ;;  %v5704_v5 = vor.u32 %v6291_v53, %v5701_v54  ;;  %v6468_v53 = vld [vmem:[#allocation1 + $0x2d] sm:$0xff] }
 0x151   : > { %3634 = vmatpush.bf16.msrb.mxu2 %v5212_v38  ;;  %v5644_v6 = vor.u32 %v6276_v57, %v5641_v59  ;;  %v6297_v38 = vld [vmem:[%s6791_s13 + $0xa0c] sm:$0xf]  ;;  %v6240_v57 = vld [vmem:[%s6791_s13 + $0x844] sm:$0xf]  ;;  %v5497_v59 = vld [vmem:[%s6791_s13 + $0x84c] sm:$0xf0] }
 0x152   : > { %3647 = vmatpush.bf16.msrb.mxu3 %v5308_v22  ;;  %3622 = vmatmul.bf16.vlgmr.msrb.gmra.mxu0 %v7033_v15  ;;  %v3416_v19 = vadd.f32 %v3415_v10, %v3403_v9  ;;  %v5521_v22 = vld [vmem:[%s6791_s13 + $0x87c] sm:$0xf0]  ;;  %v5500_v9 = vor.u32 %v6240_v57, %v5497_v59  ;;  %v5999_v10 = vld [vmem:[%s6791_s13 + $0xb8] sm:$0xf0]  ;;  %v5689_v13 = vld [vmem:[%s6791_s13 + $0x9cc] sm:$0xf0] }
 0x153   : > { %3666 = vmatpush.bf16.msra.mxu0 %v5584_v12  ;;  %v5740_v12 = vor.u32 %v6300_v61, %v5737_v62  ;;  %v4532_v23 = vor.u32 %v5999_v10, %v4531_v8  ;;  %v5917_v57 = vld [vmem:[%s6791_s13 + $0xb94] sm:$0xf0]  ;;  %v6342_v8 = vld [vmem:[%s6791_s13 + $0xb74] sm:$0xf] }
 0x154   : > { %3654 = vmatpush.bf16.msra.mxu1 %v5476_v18  ;;  %3635 = vmatmul.bf16.vlgmr.msrb.gmra.mxu2 %v6463_v42  ;;  %v5725_v18 = vld [vmem:[%s6791_s13 + $0xa14] sm:$0xf0]  ;;  %v6267_v42 = vld [vmem:[%s6791_s13 + $0x91c] sm:$0xf] }
 0x155   : > { %3679 = vmatpush.bf16.msra.mxu2 %v5680_v21  ;;  %3648 = vmatmul.bf16.vlgmr.msrb.gmra.mxu3 %v6464_v47  ;;  %v6246_v21 = vld [vmem:[%s6791_s13 + $0x874] sm:$0xf]  ;;  %v5605_v47 = vld [vmem:[%s6791_s13 + $0x924] sm:$0xf0] }
 0x156   : > { %3692 = vmatpush.bf16.msra.mxu3 %v5776_v26  ;;  %v5728_v26 = vor.u32 %v6297_v38, %v5725_v18  ;;  %v5524_v30 = vor.u32 %v6246_v21, %v5521_v22  ;;  %v5608_v61 = vor.u32 %v6267_v42, %v5605_v47  ;;  %v4627_v38 = vld [vmem:[%s6791_s13 + $0x170] sm:$0xf]  ;;  %v6023_v18 = vld [vmem:[%s6791_s13 + $0x178] sm:$0xf0]  ;;  %v5941_v22 = vld [vmem:[%s6791_s13 + $0xbc4] sm:$0xf0] }
 0x157   : > { %3667 = vmatpush.bf16.msra.mxu0 %v5572_v29  ;;  %v3428_v29 = vpop.f32.mrf.mxu2  ;;  %v6351_v21 = vld [vmem:[%s6791_s13 + $0xbbc] sm:$0xf]  ;;  %v6466_v42 = vld [vmem:[#allocation1 + $0x1b] sm:$0xff] }
 0x158   : > { %3655 = vmatpush.bf16.msra.mxu1 %v5464_v33  ;;  %v5713_v33 = vld [vmem:[%s6791_s13 + $0x9fc] sm:$0xf0]  ;;  %v3429_v34 = vadd.f32 %v3428_v29, %v3416_v19  ;;  %v3441_v39 = vpop.f32.mrf.mxu3  ;;  %v3417_v50 = vpop.f32.mrf.mxu1  ;;  %v4628_v29 = vor.u32 %v6023_v18, %v4627_v38  ;;  %v5993_v47 = vld [vmem:[%s6791_s13 + $0x88] sm:$0xf0]  ;;  %v4483_v38 = vld [vmem:[%s6791_s13 + $0x50] sm:$0xf] }
 0x159   : > { %3680 = vmatpush.bf16.msra.mxu2 %v5668_v36  ;;  %v6243_v36 = vld [vmem:[%s6791_s13 + $0x85c] sm:$0xf]  ;;  %v5716_v46 = vor.u32 %v6294_v32, %v5713_v33  ;;  %v5996_v32 = vld [vmem:[%s6791_s13 + $0xa0] sm:$0xf0]  ;;  %v5944_v33 = vor.u32 %v6351_v21, %v5941_v22  ;;  %v4603_v50 = vld [vmem:[%s6791_s13 + $0x140] sm:$0xf] }
 0x15a   : > { %3693 = vmatpush.bf16.msra.mxu3 %v5764_v40  ;;  %v5620_v40 = vor.u32 %v6270_v27, %v5617_v28  ;;  %v7441_v45 = vadd.f32 %v3441_v39, %v3429_v34  ;;  %v5845_v27 = vld [vmem:[%s6791_s13 + $0xb04] sm:$0xf0]  ;;  %v4615_v34 = vld [vmem:[%s6791_s13 + $0x158] sm:$0xf]  ;;  %v5929_v39 = vld [vmem:[%s6791_s13 + $0xbac] sm:$0xf0] }
 0x15b   : > { %3668 = vmatpush.bf16.msra.mxu0 %v5560_v44  ;;  %v3404_v44 = vpop.f32.mrf.mxu0  ;;  %v6465_v28 = vld [vmem:[#allocation1 + $0x12] sm:$0xff]  ;;  %v5987_v18 = vld [vmem:[%s6791_s13 + $0x58] sm:$0xf0] }
 0x15c   : > { %3656 = vmatpush.bf16.msra.mxu1 %v5452_v48  ;;  %v6333_v48 = vld [vmem:[%s6791_s13 + $0xb2c] sm:$0xf]  ;;  %v4579_v22 = vld [vmem:[%s6791_s13 + $0x110] sm:$0xf] }
 0x15d   : > { %3681 = vmatpush.bf16.msra.mxu2 %v5656_v51  ;;  %v5512_v51 = vor.u32 %v6243_v36, %v5509_v37  ;;  %v5872_v62 = vor.u32 %v6333_v48, %v5869_v49  ;;  %v6348_v37 = vld [vmem:[%s6791_s13 + $0xba4] sm:$0xf]  ;;  %v6467_v48 = vld [vmem:[#allocation1 + $0x24] sm:$0xff] }
 0x15e   : > { %3694 = vmatpush.bf16.msra.mxu3 %v5752_v55  ;;  %v5404_v55 = vor.u32 %v6216_v14, %v5401_v41  ;;  %v6324_v14 = vld [vmem:[%s6791_s13 + $0xae4] sm:$0xf]  ;;  %v5833_v41 = vld [vmem:[%s6791_s13 + $0xaec] sm:$0xf0]  ;;  %v5932_v49 = vor.u32 %v6348_v37, %v5929_v39 }
 0x15f   : > { %3669 = vmatpush.bf16.msra.mxu0 %v5548_v60  ;;  %v6264_v60 = vld [vmem:[%s6791_s13 + $0x904] sm:$0xf]  ;;  %v3430_v16 = vpop.f32.mrf.mxu2  ;;  %v5836_v54 = vor.u32 %v6324_v14, %v5833_v41  ;;  %v5785_v14 = vld [vmem:[%s6791_s13 + $0xa8c] sm:$0xf0] }
 0x160   : > { %3657 = vmatpush.bf16.msra.mxu1 %v5440_v63  ;;  %v5593_v63 = vld [vmem:[%s6791_s13 + $0x90c] sm:$0xf0]  ;;  %v6312_v37 = vld [vmem:[%s6791_s13 + $0xa84] sm:$0xf] }
 0x161   : > { %3682 = vmatpush.bf16.msra.mxu2 %v5644_v6  ;;  %v6330_v6 = vld [vmem:[%s6791_s13 + $0xb14] sm:$0xf]  ;;  %v5596_v19 = vor.u32 %v6264_v60, %v5593_v63  ;;  %v6321_v60 = vld [vmem:[%s6791_s13 + $0xacc] sm:$0xf]  ;;  %v4495_v63 = vld [vmem:[%s6791_s13 + $0x68] sm:$0xf] }
 0x162   : > { %3695 = vmatpush.bf16.msra.mxu3 %v5740_v12  ;;  %v6288_v12 = vld [vmem:[%s6791_s13 + $0x9c4] sm:$0xf] }
 0x163   : > { %3670 = vmatpush.bf16.msra.mxu0 %v5536_v17  ;;  %v5956_v17 = vor.u32 %v6354_v2, %v5953_v4  ;;  %v5692_v25 = vor.u32 %v6288_v12, %v5689_v13  ;;  %v5990_v2 = vld [vmem:[%s6791_s13 + $0x70] sm:$0xf0]  ;;  %v5809_v13 = vld [vmem:[%s6791_s13 + $0xabc] sm:$0xf0]  ;;  %v6336_v41 = vld [vmem:[%s6791_s13 + $0xb44] sm:$0xf] }
 0x164   : > { %3658 = vmatpush.bf16.msra.mxu1 %v5428_v20  ;;  %v5860_v20 = vor.u32 %v6330_v6, %v5857_v7  ;;  %v6014_v6 = vld [vmem:[%s6791_s13 + $0x130] sm:$0xf0]  ;;  %v4496_v10 = vor.u32 %v5990_v2, %v4495_v63  ;;  %v5788_v2 = vor.u32 %v6312_v37, %v5785_v14  ;;  %v6092_v37 = vld [vmem:[%s6791_s13 + $0x3a0] sm:$0xf0] }
 0x165   : > { %3683 = vmatpush.bf16.msra.mxu2 %v5632_v43  ;;  %v3443_v43 = vpop.f32.mrf.mxu3  ;;  %v6318_v12 = vld [vmem:[%s6791_s13 + $0xab4] sm:$0xf]  ;;  %v6116_v14 = vld [vmem:[%s6791_s13 + $0x460] sm:$0xf0] }
 0x166   : > { %3696 = vmatpush.bf16.msra.mxu3 %v5728_v26  ;;  %v6327_v26 = vld [vmem:[%s6791_s13 + $0xafc] sm:$0xf] }
 0x167   : > { %3671 = vmatpush.bf16.msra.mxu0 %v5524_v30  ;;  %v4519_v30 = vld [vmem:[%s6791_s13 + $0x98] sm:$0xf]  ;;  %v5848_v36 = vor.u32 %v6327_v26, %v5845_v27  ;;  %v6011_v43 = vld [vmem:[%s6791_s13 + $0x118] sm:$0xf0]  ;;  %v5893_v26 = vld [vmem:[%s6791_s13 + $0xb64] sm:$0xf0] }
 0x168   : > { %3659 = vmatpush.bf16.msra.mxu1 %v5416_v35  ;;  %v6020_v35 = vld [vmem:[%s6791_s13 + $0x160] sm:$0xf0] }
 0x169   : > { %3684 = vmatpush.bf16.msra.mxu2 %v5620_v40  ;;  %v4520_v40 = vor.u32 %v5996_v32, %v4519_v30  ;;  %v4616_v44 = vor.u32 %v6020_v35, %v4615_v34  ;;  %v4580_v30 = vor.u32 %v6011_v43, %v4579_v22  ;;  %v4471_v32 = vld [vmem:[%s6791_s13 + $0x38] sm:$0xf]  ;;  %v6119_v22 = vld [vmem:[%s6791_s13 + $0x478] sm:$0xf0] }
 0x16a   : > { %3697 = vmatpush.bf16.msra.mxu3 %v5716_v46  ;;  %v4507_v46 = vld [vmem:[%s6791_s13 + $0x80] sm:$0xf]  ;;  %v4567_v35 = vld [vmem:[%s6791_s13 + $0xf8] sm:$0xf] }
 0x16b   : > { %3672 = vmatpush.bf16.msra.mxu0 %v5512_v51  ;;  %v6017_v51 = vld [vmem:[%s6791_s13 + $0x148] sm:$0xf0]  ;;  %v4508_v59 = vor.u32 %v5993_v47, %v4507_v46  ;;  %v4459_v47 = vld [vmem:[%s6791_s13 + $0x20] sm:$0xf] }
 0x16c   : > { %3660 = vmatpush.bf16.msra.mxu1 %v5404_v55  ;;  %v6345_v55 = vld [vmem:[%s6791_s13 + $0xb8c] sm:$0xf] }
 0x16d   : > { %3685 = vmatpush.bf16.msra.mxu2 %v5608_v61  ;;  %v5821_v61 = vld [vmem:[%s6791_s13 + $0xad4] sm:$0xf0]  ;;  %v5920_v4 = vor.u32 %v6345_v55, %v5917_v57  ;;  %v6071_v55 = vld [vmem:[%s6791_s13 + $0x2f8] sm:$0xf0] }
 0x16e   : > { %3698 = vmatpush.bf16.msra.mxu3 %v5704_v5  ;;  %v4591_v5 = vld [vmem:[%s6791_s13 + $0x128] sm:$0xf]  ;;  %v5824_v7 = vor.u32 %v6321_v60, %v5821_v61  ;;  %v4555_v61 = vld [vmem:[%s6791_s13 + $0xe0] sm:$0xf] }
 0x16f   : > { %3661 = vmatmul.bf16.vlgmr.msra.gmra.mxu1 %v6465_v28  ;;  %3673 = vmatpush.bf16.msra.mxu0 %v5500_v9  ;;  %v5905_v9 = vld [vmem:[%s6791_s13 + $0xb7c] sm:$0xf0]  ;;  %v3454_v16 = vpop.f32.mrf.mxu0  ;;  %v4484_v28 = vor.u32 %v5987_v18, %v4483_v38  ;;  %v6095_v38 = vld [vmem:[%s6791_s13 + $0x3b8] sm:$0xf0]  ;;  %v4543_v18 = vld [vmem:[%s6791_s13 + $0xc8] sm:$0xf] }
 0x170   : > { %3705 = vmatpush.bf16.msrb.mxu1 %v5872_v62  ;;  %v4604_v62 = vor.u32 %v6017_v51, %v4603_v50  ;;  %v5908_v21 = vor.u32 %v6342_v8, %v5905_v9  ;;  %v5978_v8 = vld [vmem:[%s6791_s13 + $0x10] sm:$0xf0]  ;;  %v4711_v9 = vld [vmem:[%s6791_s13 + $0x218] sm:$0xf] }
 0x171   : > { %3686 = vmatpush.bf16.msra.mxu2 %v5596_v19  ;;  %v3455_v19 = vadd.f32 %v3454_v16, %v7441_v45  ;;  %v6315_v45 = vld [vmem:[%s6791_s13 + $0xa9c] sm:$0xf]  ;;  %v6068_v16 = vld [vmem:[%s6791_s13 + $0x2e0] sm:$0xf0] }
 0x172   : > { %3699 = vmatpush.bf16.msra.mxu3 %v5692_v25  ;;  %3674 = vmatmul.bf16.vlgmr.msra.gmra.mxu0 %v6466_v42  ;;  %v6339_v25 = vld [vmem:[%s6791_s13 + $0xb5c] sm:$0xf]  ;;  %v5881_v42 = vld [vmem:[%s6791_s13 + $0xb4c] sm:$0xf0] }
 0x173   : > { %3719 = vmatpush.bf16.msrb.mxu0 %v5956_v17  ;;  %v4592_v17 = vor.u32 %v6014_v6, %v4591_v5  ;;  %v5896_v34 = vor.u32 %v6339_v25, %v5893_v26  ;;  %v5884_v60 = vor.u32 %v6336_v41, %v5881_v42  ;;  %v4447_v5 = vld [vmem:[%s6791_s13 + $0x8] sm:$0xf]  ;;  %v4699_v26 = vld [vmem:[%s6791_s13 + $0x200] sm:$0xf] }
 0x174   : > { %3706 = vmatpush.bf16.msrb.mxu1 %v5860_v20  ;;  %3687 = vmatmul.bf16.vlgmr.msra.gmra.mxu2 %v6467_v48  ;;  %v3467_v20 = vpop.f32.mrf.mxu1  ;;  %v4723_v48 = vld [vmem:[%s6791_s13 + $0x230] sm:$0xf]  ;;  %v4687_v42 = vld [vmem:[%s6791_s13 + $0x1e8] sm:$0xf] }
 0x175   : > { %3731 = vmatpush.bf16.msrb.mxu2 %v4532_v23  ;;  %3700 = vmatmul.bf16.vlgmr.msra.gmra.mxu3 %v6468_v53  ;;  %v5812_v23 = vor.u32 %v6318_v12, %v5809_v13  ;;  %v3468_v27 = vadd.f32 %v3467_v20, %v3455_v19  ;;  %v5981_v53 = vld [vmem:[%s6791_s13 + $0x28] sm:$0xf0]  ;;  %v4807_v13 = vld [vmem:[%s6791_s13 + $0x2d8] sm:$0xf]  ;;  %v6002_v19 = vld [vmem:[%s6791_s13 + $0xd0] sm:$0xf0] }
 0x176   : > { %3744 = vmatpush.bf16.msrb.mxu3 %v4628_v29  ;;  %v5797_v29 = vld [vmem:[%s6791_s13 + $0xaa4] sm:$0xf0]  ;;  %v4460_v6 = vor.u32 %v5981_v53, %v4459_v47  ;;  %v4808_v25 = vor.u32 %v6068_v16, %v4807_v13  ;;  %v6032_v13 = vld [vmem:[%s6791_s13 + $0x1c0] sm:$0xf0] }
 0x177   : > { %3720 = vmatpush.bf16.msrb.mxu0 %v5944_v33  ;;  %v5984_v33 = vld [vmem:[%s6791_s13 + $0x40] sm:$0xf0]  ;;  %v3480_v39 = vpop.f32.mrf.mxu2  ;;  %v3456_v57 = vpop.f32.mrf.mxu0  ;;  %v4783_v47 = vld [vmem:[%s6791_s13 + $0x2a8] sm:$0xf] }
 0x178   : > { %3707 = vmatpush.bf16.msrb.mxu1 %v5848_v36  ;;  %v6008_v36 = vld [vmem:[%s6791_s13 + $0x100] sm:$0xf0]  ;;  %v4472_v46 = vor.u32 %v5984_v33, %v4471_v32  ;;  %v3493_v50 = vpop.f32.mrf.mxu3  ;;  %v6065_v32 = vld [vmem:[%s6791_s13 + $0x2c8] sm:$0xf0] }
 0x179   : > { %3732 = vmatpush.bf16.msrb.mxu2 %v4520_v40  ;;  %v5800_v40 = vor.u32 %v6315_v45, %v5797_v29  ;;  %v4568_v51 = vor.u32 %v6008_v36, %v4567_v35  ;;  %v4544_v29 = vor.u32 %v6002_v19, %v4543_v18  ;;  %v4903_v36 = vld [vmem:[%s6791_s13 + $0x398] sm:$0xf] }
 0x17a   : > { %3745 = vmatpush.bf16.msrb.mxu3 %v4616_v44  ;;  %v3481_v44 = vadd.f32 %v3480_v39, %v3468_v27  ;;  %v6041_v27 = vld [vmem:[%s6791_s13 + $0x208] sm:$0xf0] }
 0x17b   : > { %3721 = vmatpush.bf16.msrb.mxu0 %v5932_v49  ;;  %v6047_v49 = vld [vmem:[%s6791_s13 + $0x238] sm:$0xf0]  ;;  %v4700_v39 = vor.u32 %v6041_v27, %v4699_v26 }
 0x17c   : > { %3708 = vmatpush.bf16.msrb.mxu1 %v5836_v54  ;;  %v4819_v54 = vld [vmem:[%s6791_s13 + $0x2f0] sm:$0xf]  ;;  %v3469_v63 = vpop.f32.mrf.mxu1  ;;  %v6107_v26 = vld [vmem:[%s6791_s13 + $0x418] sm:$0xf0] }
 0x17d   : > { %3733 = vmatpush.bf16.msrb.mxu2 %v4508_v59  ;;  %v7513_v59 = vadd.f32 %v3493_v50, %v3481_v44  ;;  %v6038_v44 = vld [vmem:[%s6791_s13 + $0x1f0] sm:$0xf0]  ;;  %v4891_v50 = vld [vmem:[%s6791_s13 + $0x380] sm:$0xf]  ;;  %v4771_v63 = vld [vmem:[%s6791_s13 + $0x290] sm:$0xf] }
 0x17e   : > { %3746 = vmatpush.bf16.msrb.mxu3 %v4604_v62  ;;  %v6005_v62 = vld [vmem:[%s6791_s13 + $0xe8] sm:$0xf0]  ;;  %v4688_v53 = vor.u32 %v6038_v44, %v4687_v42  ;;  %v4639_v42 = vld [vmem:[%s6791_s13 + $0x188] sm:$0xf] }
 0x17f   : > { %3722 = vmatpush.bf16.msrb.mxu0 %v5920_v4  ;;  %v4724_v4 = vor.u32 %v6047_v49, %v4723_v48  ;;  %v4556_v12 = vor.u32 %v6005_v62, %v4555_v61  ;;  %v3482_v43 = vpop.f32.mrf.mxu2  ;;  %v6062_v48 = vld [vmem:[%s6791_s13 + $0x2b0] sm:$0xf0]  ;;  %v6035_v61 = vld [vmem:[%s6791_s13 + $0x1d8] sm:$0xf0] }
 0x180   : > { %3709 = vmatpush.bf16.msrb.mxu1 %v5824_v7  ;;  %v4820_v7 = vor.u32 %v6071_v55, %v4819_v54  ;;  %v3495_v33 = vpop.f32.mrf.mxu3  ;;  %v4987_v54 = vld [vmem:[%s6791_s13 + $0x440] sm:$0xf]  ;;  %v6113_v55 = vld [vmem:[%s6791_s13 + $0x448] sm:$0xf0]  ;;  %v4784_v57 = vor.u32 %v6062_v48, %v4783_v47  ;;  %v6026_v47 = vld [vmem:[%s6791_s13 + $0x190] sm:$0xf0] }
 0x181   : > { %3734 = vmatpush.bf16.msrb.mxu2 %v4496_v10  ;;  %v6044_v10 = vld [vmem:[%s6791_s13 + $0x220] sm:$0xf0]  ;;  %v6053_v33 = vld [vmem:[%s6791_s13 + $0x268] sm:$0xf0]  ;;  %v4735_v48 = vld [vmem:[%s6791_s13 + $0x248] sm:$0xf] }
 0x182   : > { %3747 = vmatpush.bf16.msrb.mxu3 %v4592_v17  ;;  %v4915_v17 = vld [vmem:[%s6791_s13 + $0x3b0] sm:$0xf]  ;;  %v4712_v20 = vor.u32 %v6044_v10, %v4711_v9 }
 0x183   : > { %3723 = vmatpush.bf16.msrb.mxu0 %v5908_v21  ;;  %v5011_v21 = vld [vmem:[%s6791_s13 + $0x470] sm:$0xf]  ;;  %v4916_v45 = vor.u32 %v6095_v38, %v4915_v17  ;;  %v4759_v17 = vld [vmem:[%s6791_s13 + $0x278] sm:$0xf]  ;;  %v6056_v38 = vld [vmem:[%s6791_s13 + $0x280] sm:$0xf0] }
 0x184   : > { %3710 = vmatpush.bf16.msrb.mxu1 %v5812_v23  ;;  %v4448_v23 = vor.u32 %v5978_v8, %v4447_v5  ;;  %v5012_v35 = vor.u32 %v6119_v22, %v5011_v21  ;;  %v6086_v5 = vld [vmem:[%s6791_s13 + $0x370] sm:$0xf0]  ;;  %v7563_v10 = vld [vmem:[%s282_s18] sm:$0x7]  ;;  %v6083_v21 = vld [vmem:[%s6791_s13 + $0x358] sm:$0xf0]  ;;  %v4760_v27 = vor.u32 %v6056_v38, %v4759_v17 }
 0x185   : > { %3735 = vmatpush.bf16.msrb.mxu2 %v4484_v28  ;;  %v7531_v28 = vld [vmem:[#allocation1 + $0x3f] sm:$0xff]  ;;  %v3941_v43 = vperm.slane %v7563_v10, 0  ;;  %v6140_v17 = vld [vmem:[%s6791_s13 + $0x520] sm:$0xf0] }
 0x186   : > { %3748 = vmatpush.bf16.msrb.mxu3 %v4580_v30  ;;  %v4795_v30 = vld [vmem:[%s6791_s13 + $0x2c0] sm:$0xf]  ;;  %v6110_v8 = vld [vmem:[%s6791_s13 + $0x430] sm:$0xf0] }
 0x187   : > { %3724 = vmatpush.bf16.msrb.mxu0 %v5896_v34  ;;  %v7537_v34 = vld [vmem:[#allocation1 + $0x36] sm:$0xff]  ;;  %v4796_v41 = vor.u32 %v6065_v32, %v4795_v30 }
 0x188   : > { %3711 = vmatpush.bf16.msrb.mxu1 %v5800_v40  ;;  %v4999_v40 = vld [vmem:[%s6791_s13 + $0x458] sm:$0xf] }
 0x189   : > { %3736 = vmatpush.bf16.msrb.mxu2 %v4472_v46  ;;  %v4904_v46 = vor.u32 %v6092_v37, %v4903_v36  ;;  %v5000_v49 = vor.u32 %v6116_v14, %v4999_v40  ;;  %v4855_v36 = vld [vmem:[%s6791_s13 + $0x338] sm:$0xf]  ;;  %v6080_v37 = vld [vmem:[%s6791_s13 + $0x340] sm:$0xf0] }
 0x18a   : > { %3749 = vmatpush.bf16.msrb.mxu3 %v4568_v51  ;;  %v6089_v51 = vld [vmem:[%s6791_s13 + $0x388] sm:$0xf0]  ;;  %v4951_v14 = vld [vmem:[%s6791_s13 + $0x3f8] sm:$0xf] }
 0x18b   : > { %3725 = vmatpush.bf16.msrb.mxu0 %v5884_v60  ;;  %v4675_v60 = vld [vmem:[%s6791_s13 + $0x1d0] sm:$0xf]  ;;  %v4892_v62 = vor.u32 %v6089_v51, %v4891_v50  ;;  %v4856_v51 = vor.u32 %v6080_v37, %v4855_v36  ;;  %v6161_v36 = vld [vmem:[%s6791_s13 + $0x5c8] sm:$0xf0] }
 0x18c   : > { %3712 = vmatpush.bf16.msrb.mxu1 %v5788_v2  ;;  %v4988_v2 = vor.u32 %v6113_v55, %v4987_v54  ;;  %v5107_v54 = vld [vmem:[%s6791_s13 + $0x530] sm:$0xf]  ;;  %v6143_v55 = vld [vmem:[%s6791_s13 + $0x538] sm:$0xf0] }
 0x18d   : > { %3737 = vmatpush.bf16.msrb.mxu2 %v4460_v6  ;;  %v3519_v6 = vpop.f32.mrf.mxu1 }
 0x18e   : > { %3750 = vmatpush.bf16.msrb.mxu3 %v4556_v12  ;;  %5962 = vmatmul.msk.bf16.vlgmr.msrb.gmra.mxu0 %vm3312_vm0, %v7531_v28  ;;  %v4663_v12 = vld [vmem:[%s6791_s13 + $0x1b8] sm:$0xf] }
 0x18f   : > { %3757 = vmatpush.bf16.msra.mxu0 %v4724_v4  ;;  %3713 = vmatmul.bf16.vlgmr.msrb.gmra.mxu1 %v7537_v34  ;;  %v4879_v4 = vld [vmem:[%s6791_s13 + $0x368] sm:$0xf]  ;;  %v3506_v18 = vpop.f32.mrf.mxu0 }
 0x190   : > { %3770 = vmatpush.bf16.msra.mxu1 %v4820_v7  ;;  %v4975_v7 = vld [vmem:[%s6791_s13 + $0x428] sm:$0xf]  ;;  %v4880_v16 = vor.u32 %v6086_v5, %v4879_v4  ;;  %v3507_v22 = vadd.f32 %v3506_v18, %v7513_v59  ;;  %v4747_v59 = vld [vmem:[%s6791_s13 + $0x260] sm:$0xf]  ;;  %v4640_v4 = vor.u32 %v6026_v47, %v4639_v42  ;;  %v5191_v18 = vld [vmem:[%s6791_s13 + $0x5d8] sm:$0xf] }
 0x191   : > { %3738 = vmatpush.bf16.msrb.mxu2 %v4448_v23  ;;  %v4976_v19 = vor.u32 %v6110_v8, %v4975_v7  ;;  %v4664_v23 = vor.u32 %v6032_v13, %v4663_v12  ;;  %v4939_v5 = vld [vmem:[%s6791_s13 + $0x3e0] sm:$0xf]  ;;  %v5108_v7 = vor.u32 %v6143_v55, %v5107_v54  ;;  %v4831_v8 = vld [vmem:[%s6791_s13 + $0x308] sm:$0xf]  ;;  %v6074_v13 = vld [vmem:[%s6791_s13 + $0x310] sm:$0xf0] }
 0x192   : > { %3751 = vmatpush.bf16.msrb.mxu3 %v4544_v29  ;;  %v6029_v29 = vld [vmem:[%s6791_s13 + $0x1a8] sm:$0xf0]  ;;  %v3520_v30 = vadd.f32 %v3519_v6, %v3507_v22  ;;  %v4927_v22 = vld [vmem:[%s6791_s13 + $0x3c8] sm:$0xf] }
 0x193   : > { %3758 = vmatpush.bf16.msra.mxu0 %v4712_v20  ;;  %v4867_v20 = vld [vmem:[%s6791_s13 + $0x350] sm:$0xf]  ;;  %v5071_v47 = vld [vmem:[%s6791_s13 + $0x4e8] sm:$0xf]  ;;  %v6185_v54 = vld [vmem:[%s6791_s13 + $0x688] sm:$0xf0] }
 0x194   : > { %3771 = vmatpush.bf16.msra.mxu1 %v4808_v25  ;;  %3739 = vmatmul.bf16.vlgmr.msrb.gmra.mxu2 %v6967_v24  ;;  %v6059_v24 = vld [vmem:[%s6791_s13 + $0x298] sm:$0xf0]  ;;  %v4963_v25 = vld [vmem:[%s6791_s13 + $0x410] sm:$0xf]  ;;  %v4868_v32 = vor.u32 %v6083_v21, %v4867_v20 }
 0x195   : > { %3783 = vmatpush.bf16.msra.mxu2 %v4916_v45  ;;  %3752 = vmatmul.bf16.vlgmr.msrb.gmra.mxu3 %v6973_v31  ;;  %v4676_v31 = vor.u32 %v6035_v61, %v4675_v60  ;;  %v4772_v9 = vor.u32 %v6059_v24, %v4771_v63  ;;  %v4651_v45 = vld [vmem:[%s6791_s13 + $0x1a0] sm:$0xf]  ;;  %v3521_v44 = vpop.f32.mrf.mxu1  ;;  %v6077_v61 = vld [vmem:[%s6791_s13 + $0x328] sm:$0xf0]  ;;  %v6167_v63 = vld [vmem:[%s6791_s13 + $0x5f8] sm:$0xf0] }
 0x196   : > { %3796 = vmatpush.bf16.msra.mxu3 %v5012_v35  ;;  %v4964_v35 = vor.u32 %v6107_v26, %v4963_v25  ;;  %v4652_v40 = vor.u32 %v6029_v29, %v4651_v45  ;;  %v5299_v20 = vld [vmem:[%s6791_s13 + $0x6b0] sm:$0xf]  ;;  %v6191_v21 = vld [vmem:[%s6791_s13 + $0x6b8] sm:$0xf0]  ;;  %v5083_v29 = vld [vmem:[%s6791_s13 + $0x500] sm:$0xf] }
 0x197   : > { %3759 = vmatpush.bf16.msra.mxu0 %v4700_v39  ;;  %v7581_v39 = vadd.f32 %v3941_v43, %v3520_v30  ;;  %v3532_v50 = vpop.f32.mrf.mxu2  ;;  %v3508_v24 = vpop.f32.mrf.mxu0  ;;  %v6098_v43 = vld [vmem:[%s6791_s13 + $0x3d0] sm:$0xf0]  ;;  %v5395_v25 = vld [vmem:[%s6791_s13 + $0x770] sm:$0xf]  ;;  %v6215_v26 = vld [vmem:[%s6791_s13 + $0x778] sm:$0xf0] }
 0x198   : > { %3772 = vmatpush.bf16.msra.mxu1 %v4796_v41  ;;  %v6104_v41 = vld [vmem:[%s6791_s13 + $0x400] sm:$0xf0]  ;;  %v6137_v30 = vld [vmem:[%s6791_s13 + $0x508] sm:$0xf0]  ;;  %v5396_v37 = vor.u32 %v6215_v26, %v5395_v25  ;;  %v5383_v44 = vld [vmem:[%s6791_s13 + $0x758] sm:$0xf] }
 0x199   : > { %3784 = vmatpush.bf16.msra.mxu2 %v4904_v46  ;;  %v4748_v46 = vor.u32 %v6053_v33, %v4747_v59  ;;  %v4952_v60 = vor.u32 %v6104_v41, %v4951_v14  ;;  %v5300_v59 = vor.u32 %v6191_v21, %v5299_v20  ;;  %v4928_v33 = vor.u32 %v6098_v43, %v4927_v22  ;;  %v6188_v14 = vld [vmem:[%s6791_s13 + $0x6a0] sm:$0xf0]  ;;  %v5251_v20 = vld [vmem:[%s6791_s13 + $0x650] sm:$0xf]  ;;  %v6179_v21 = vld [vmem:[%s6791_s13 + $0x658] sm:$0xf0] }
 0x19a   : > { %3797 = vmatpush.bf16.msra.mxu3 %v5000_v49  ;;  %v6050_v49 = vld [vmem:[%s6791_s13 + $0x250] sm:$0xf0]  ;;  %v5084_v42 = vor.u32 %v6137_v30, %v5083_v29  ;;  %v5347_v43 = vld [vmem:[%s6791_s13 + $0x710] sm:$0xf]  ;;  %v5252_v29 = vor.u32 %v6179_v21, %v5251_v20  ;;  %v5131_v30 = vld [vmem:[%s6791_s13 + $0x560] sm:$0xf] }
 0x19b   : > { %3760 = vmatpush.bf16.msra.mxu0 %v4688_v53  ;;  %v4843_v53 = vld [vmem:[%s6791_s13 + $0x320] sm:$0xf]  ;;  %v5779_v20 = vld [vmem:[%s6791_s13 + $0xa70] sm:$0xf]  ;;  %v6311_v21 = vld [vmem:[%s6791_s13 + $0xa78] sm:$0xf0] }
 0x19c   : > { %3773 = vmatpush.bf16.msra.mxu1 %v4784_v57  ;;  %v3533_v57 = vadd.f32 %v3532_v50, %v7244_v3  ;;  %v4736_v3 = vor.u32 %v6050_v49, %v4735_v48  ;;  %v6134_v48 = vld [vmem:[%s6791_s13 + $0x4f0] sm:$0xf0]  ;;  %v5167_v49 = vld [vmem:[%s6791_s13 + $0x5a8] sm:$0xf] }
 0x19d   : > { %3785 = vmatpush.bf16.msra.mxu2 %v4892_v62  ;;  %v5203_v62 = vld [vmem:[%s6791_s13 + $0x5f0] sm:$0xf]  ;;  %v6158_v50 = vld [vmem:[%s6791_s13 + $0x5b0] sm:$0xf0]  ;;  %v5072_v55 = vor.u32 %v6134_v48, %v5071_v47  ;;  %v5227_v48 = vld [vmem:[%s6791_s13 + $0x620] sm:$0xf] }
 0x19e   : > { %3798 = vmatpush.bf16.msra.mxu3 %v4988_v2  ;;  %v3545_v2 = vpop.f32.mrf.mxu3  ;;  %v5204_v12 = vor.u32 %v6167_v63, %v5203_v62  ;;  %v5059_v62 = vld [vmem:[%s6791_s13 + $0x4d0] sm:$0xf]  ;;  %v6131_v63 = vld [vmem:[%s6791_s13 + $0x4d8] sm:$0xf0] }
 0x19f   : > { %3761 = vmatpush.bf16.msra.mxu0 %v4676_v31  ;;  %v6101_v31 = vld [vmem:[%s6791_s13 + $0x3e8] sm:$0xf0]  ;;  %v7598_v6 = vadd.f32 %v3545_v2, %v3533_v57  ;;  %v5371_v57 = vld [vmem:[%s6791_s13 + $0x740] sm:$0xf]  ;;  %v5155_v2 = vld [vmem:[%s6791_s13 + $0x590] sm:$0xf] }
 0x1a0   : > { %3774 = vmatpush.bf16.msra.mxu1 %v4772_v9  ;;  %v4844_v9 = vor.u32 %v6077_v61, %v4843_v53  ;;  %v4940_v38 = vor.u32 %v6101_v31, %v4939_v5  ;;  %v5275_v53 = vld [vmem:[%s6791_s13 + $0x680] sm:$0xf]  ;;  %v5168_v61 = vor.u32 %v6158_v50, %v5167_v49  ;;  %v5263_v5 = vld [vmem:[%s6791_s13 + $0x668] sm:$0xf]  ;;  %v6182_v31 = vld [vmem:[%s6791_s13 + $0x670] sm:$0xf0] }
 0x1a1   : > { %3786 = vmatpush.bf16.msra.mxu2 %v4880_v16  ;;  %v5095_v16 = vld [vmem:[%s6791_s13 + $0x518] sm:$0xf]  ;;  %v5276_v24 = vor.u32 %v6185_v54, %v5275_v53  ;;  %v6239_v49 = vld [vmem:[%s6791_s13 + $0x838] sm:$0xf0]  ;;  %v6173_v53 = vld [vmem:[%s6791_s13 + $0x628] sm:$0xf0] }
 0x1a2   : > { %3799 = vmatpush.bf16.msra.mxu3 %v4976_v19  ;;  %v6164_v19 = vld [vmem:[%s6791_s13 + $0x5e0] sm:$0xf0]  ;;  %v5587_v54 = vld [vmem:[%s6791_s13 + $0x8f0] sm:$0xf] }
 0x1a3   : > { %3762 = vmatpush.bf16.msra.mxu0 %v4664_v23  ;;  %v5096_v23 = vor.u32 %v6140_v17, %v5095_v16  ;;  %v5192_v45 = vor.u32 %v6164_v19, %v5191_v18  ;;  %v6128_v16 = vld [vmem:[%s6791_s13 + $0x4c0] sm:$0xf0]  ;;  %v5264_v17 = vor.u32 %v6182_v31, %v5263_v5  ;;  %v5228_v31 = vor.u32 %v6173_v53, %v5227_v48  ;;  %v5443_v53 = vld [vmem:[%s6791_s13 + $0x7d0] sm:$0xf] }
 0x1a4   : > { %3775 = vmatpush.bf16.msra.mxu1 %v4760_v27  ;;  %v4832_v27 = vor.u32 %v6074_v13, %v4831_v8  ;;  %v6206_v8 = vld [vmem:[%s6791_s13 + $0x730] sm:$0xf0]  ;;  %v5047_v13 = vld [vmem:[%s6791_s13 + $0x4b8] sm:$0xf]  ;;  %v6152_v18 = vld [vmem:[%s6791_s13 + $0x580] sm:$0xf0] }
 0x1a5   : > { %3787 = vmatpush.bf16.msra.mxu2 %v4868_v32  ;;  %v3534_v32 = vpop.f32.mrf.mxu2 }
 0x1a6   : > { %3800 = vmatpush.bf16.msra.mxu3 %v4964_v35  ;;  %v5179_v35 = vld [vmem:[%s6791_s13 + $0x5c0] sm:$0xf]  ;;  %v3547_v41 = vpop.f32.mrf.mxu3  ;;  %v6149_v32 = vld [vmem:[%s6791_s13 + $0x568] sm:$0xf0] }
 0x1a7   : > { %3763 = vmatpush.bf16.msra.mxu0 %v4652_v40  ;;  %v5287_v40 = vld [vmem:[%s6791_s13 + $0x698] sm:$0xf] }
 0x1a8   : > { %3776 = vmatpush.bf16.msra.mxu1 %v4748_v46  ;;  %v5180_v46 = vor.u32 %v6161_v36, %v5179_v35  ;;  %v6176_v35 = vld [vmem:[%s6791_s13 + $0x640] sm:$0xf0] }
 0x1a9   : > { %3788 = vmatpush.bf16.msra.mxu2 %v4856_v51 }
 0x1aa   : > { %3801 = vmatpush.bf16.msra.mxu3 %v4952_v60  ;;  %v6209_v60 = vld [vmem:[%s6791_s13 + $0x748] sm:$0xf0] }
 0x1ab   : > { %3764 = vmatpush.bf16.msra.mxu0 %v4640_v4  ;;  %v5372_v4 = vor.u32 %v6209_v60, %v5371_v57 }
 0x1ac   : > { %3777 = vmatpush.bf16.msra.mxu1 %v4736_v3  ;;  %v3558_v3 = vpop.f32.mrf.mxu1 }
 0x1ad   : > { %3789 = vmatpush.bf16.msra.mxu2 %v4844_v9  ;;  %v3559_v9 = vadd.f32 %v3558_v3, %v7598_v6  ;;  %v5048_v6 = vor.u32 %v6128_v16, %v5047_v13  ;;  %v6260_v13 = vld [vmem:[%s6791_s13 + $0x8e0] sm:$0xf0]  ;;  %v5683_v16 = vld [vmem:[%s6791_s13 + $0x9b0] sm:$0xf] }
 0x1ae   : > { %3802 = vmatpush.bf16.msra.mxu3 %v4940_v38  ;;  %3765 = vmatmul.bf16.vlgmr.msra.gmra.mxu0 %v7035_v52  ;;  %v6212_v52 = vld [vmem:[%s6791_s13 + $0x760] sm:$0xf0]  ;;  %v5143_v38 = vld [vmem:[%s6791_s13 + $0x578] sm:$0xf] }
 0x1af   : > { %3809 = vmatpush.bf16.msrb.mxu0 %v5108_v7  ;;  %3778 = vmatmul.bf16.vlgmr.msra.gmra.mxu1 %v7042_v58  ;;  %v5288_v58 = vor.u32 %v6188_v14, %v5287_v40  ;;  %v5384_v51 = vor.u32 %v6212_v52, %v5383_v44  ;;  %v5359_v7 = vld [vmem:[%s6791_s13 + $0x728] sm:$0xf]  ;;  %v3571_v22 = vpop.f32.mrf.mxu0  ;;  %v5144_v26 = vor.u32 %v6152_v18, %v5143_v38  ;;  %v6200_v40 = vld [vmem:[%s6791_s13 + $0x700] sm:$0xf0]  ;;  %v6122_v44 = vld [vmem:[%s6791_s13 + $0x490] sm:$0xf0] }
 0x1b0   : > { %3822 = vmatpush.bf16.msrb.mxu1 %v5204_v12  ;;  %v5360_v19 = vor.u32 %v6206_v8, %v5359_v7  ;;  %v3572_v25 = vadd.f32 %v3571_v22, %v3559_v9  ;;  %v5023_v14 = vld [vmem:[%s6791_s13 + $0x488] sm:$0xf]  ;;  %v5479_v7 = vld [vmem:[%s6791_s13 + $0x818] sm:$0xf]  ;;  %v6236_v8 = vld [vmem:[%s6791_s13 + $0x820] sm:$0xf0] }
 0x1b1   : > { %3790 = vmatpush.bf16.msra.mxu2 %v4832_v27  ;;  %v5035_v27 = vld [vmem:[%s6791_s13 + $0x4a0] sm:$0xf]  ;;  %v5119_v52 = vld [vmem:[%s6791_s13 + $0x548] sm:$0xf]  ;;  %v6194_v18 = vld [vmem:[%s6791_s13 + $0x6d0] sm:$0xf0] }
 0x1b2   : > { %3803 = vmatpush.bf16.msra.mxu3 %v4928_v33  ;;  %v5239_v33 = vld [vmem:[%s6791_s13 + $0x638] sm:$0xf]  ;;  %v5311_v38 = vld [vmem:[%s6791_s13 + $0x6c8] sm:$0xf] }
 0x1b3   : > { %3810 = vmatpush.bf16.msrb.mxu0 %v5096_v23  ;;  %v6203_v23 = vld [vmem:[%s6791_s13 + $0x718] sm:$0xf0]  ;;  %v5240_v47 = vor.u32 %v6176_v35, %v5239_v33 }
 0x1b4   : > { %3823 = vmatpush.bf16.msrb.mxu1 %v5192_v45  ;;  %3791 = vmatmul.bf16.vlgmr.msra.gmra.mxu2 %v7040_v56  ;;  %v6155_v56 = vld [vmem:[%s6791_s13 + $0x598] sm:$0xf0]  ;;  %v6125_v45 = vld [vmem:[%s6791_s13 + $0x4a8] sm:$0xf0]  ;;  %v3560_v41 = vpop.f32.mrf.mxu1 }
 0x1b5   : > { %3835 = vmatpush.bf16.msrb.mxu2 %v5300_v59  ;;  %3804 = vmatmul.bf16.vlgmr.msra.gmra.mxu3 %v7051_v1  ;;  %v5060_v1 = vor.u32 %v6131_v63, %v5059_v62  ;;  %v5156_v12 = vor.u32 %v6155_v56, %v5155_v2  ;;  %v5348_v59 = vor.u32 %v6203_v23, %v5347_v43  ;;  %v5323_v62 = vld [vmem:[%s6791_s13 + $0x6e0] sm:$0xf]  ;;  %v6197_v63 = vld [vmem:[%s6791_s13 + $0x6e8] sm:$0xf0]  ;;  %v5551_v41 = vld [vmem:[%s6791_s13 + $0x8a8] sm:$0xf] }
 0x1b6   : > { %3848 = vmatpush.bf16.msrb.mxu3 %v5396_v37  ;;  %v5036_v36 = vor.u32 %v6125_v45, %v5035_v27  ;;  %v5335_v37 = vld [vmem:[%s6791_s13 + $0x6f8] sm:$0xf]  ;;  %v5324_v9 = vor.u32 %v6197_v63, %v5323_v62  ;;  %v5467_v43 = vld [vmem:[%s6791_s13 + $0x800] sm:$0xf]  ;;  %v6233_v23 = vld [vmem:[%s6791_s13 + $0x808] sm:$0xf0] }
 0x1b7   : > { %3811 = vmatpush.bf16.msrb.mxu0 %v5084_v42  ;;  %v5132_v42 = vor.u32 %v6149_v32, %v5131_v30  ;;  %v3584_v50 = vpop.f32.mrf.mxu2  ;;  %v5563_v27 = vld [vmem:[%s6791_s13 + $0x8c0] sm:$0xf]  ;;  %v6257_v45 = vld [vmem:[%s6791_s13 + $0x8c8] sm:$0xf0]  ;;  %v5780_v30 = vor.u32 %v6311_v21, %v5779_v20  ;;  %v5671_v32 = vld [vmem:[%s6791_s13 + $0x998] sm:$0xf]  ;;  %v5468_v35 = vor.u32 %v6233_v23, %v5467_v43 }
 0x1b8   : > { %3824 = vmatpush.bf16.msrb.mxu1 %v5180_v46  ;;  %v6146_v46 = vld [vmem:[%s6791_s13 + $0x550] sm:$0xf0]  ;;  %v3585_v57 = vadd.f32 %v3584_v50, %v3572_v25  ;;  %v3597_v60 = vpop.f32.mrf.mxu3  ;;  %v6472_v50 = vld [vmem:[#allocation1 + $0x9] sm:$0xff] }
 0x1b9   : > { %3836 = vmatpush.bf16.msrb.mxu2 %v5288_v58  ;;  %v5491_v58 = vld [vmem:[%s6791_s13 + $0x830] sm:$0xf]  ;;  %v5120_v2 = vor.u32 %v6146_v46, %v5119_v52  ;;  %v5659_v52 = vld [vmem:[%s6791_s13 + $0x980] sm:$0xf]  ;;  %v6281_v46 = vld [vmem:[%s6791_s13 + $0x988] sm:$0xf0] }
 0x1ba   : > { %3849 = vmatpush.bf16.msrb.mxu3 %v5384_v51  ;;  %v5336_v51 = vor.u32 %v6200_v40, %v5335_v37  ;;  %v5492_v56 = vor.u32 %v6239_v49, %v5491_v58  ;;  %v7670_v5 = vadd.f32 %v3597_v60, %v3585_v57  ;;  %v5564_v37 = vor.u32 %v6257_v45, %v5563_v27  ;;  %v5455_v40 = vld [vmem:[%s6791_s13 + $0x7e8] sm:$0xf]  ;;  %v5755_v58 = vld [vmem:[%s6791_s13 + $0xa40] sm:$0xf]  ;;  %v6305_v49 = vld [vmem:[%s6791_s13 + $0xa48] sm:$0xf0] }
 0x1bb   : > { %3812 = vmatpush.bf16.msrb.mxu0 %v5072_v55  ;;  %v6263_v55 = vld [vmem:[%s6791_s13 + $0x8f8] sm:$0xf0]  ;;  %v5539_v57 = vld [vmem:[%s6791_s13 + $0x890] sm:$0xf]  ;;  %v5647_v62 = vld [vmem:[%s6791_s13 + $0x968] sm:$0xf] }
 0x1bc   : > { %3825 = vmatpush.bf16.msrb.mxu1 %v5168_v61  ;;  %v5024_v61 = vor.u32 %v6122_v44, %v5023_v14  ;;  %v5588_v3 = vor.u32 %v6263_v55, %v5587_v54  ;;  %v6230_v14 = vld [vmem:[%s6791_s13 + $0x7f0] sm:$0xf0]  ;;  %v6227_v54 = vld [vmem:[%s6791_s13 + $0x7d8] sm:$0xf0]  ;;  %v5660_v55 = vor.u32 %v6281_v46, %v5659_v52  ;;  %v5515_v23 = vld [vmem:[%s6791_s13 + $0x860] sm:$0xf] }
 0x1bd   : > { %3837 = vmatpush.bf16.msrb.mxu2 %v5276_v24  ;;  %v3573_v24 = vpop.f32.mrf.mxu0  ;;  %v5456_v48 = vor.u32 %v6230_v14, %v5455_v40  ;;  %v6251_v60 = vld [vmem:[%s6791_s13 + $0x898] sm:$0xf0]  ;;  %v6278_v63 = vld [vmem:[%s6791_s13 + $0x970] sm:$0xf0]  ;;  %v5623_v27 = vld [vmem:[%s6791_s13 + $0x938] sm:$0xf] }
 0x1be   : > { %3850 = vmatpush.bf16.msrb.mxu3 %v5372_v4  ;;  %v5215_v4 = vld [vmem:[%s6791_s13 + $0x608] sm:$0xf]  ;;  %v6272_v45 = vld [vmem:[%s6791_s13 + $0x940] sm:$0xf0]  ;;  %v5611_v14 = vld [vmem:[%s6791_s13 + $0x920] sm:$0xf] }
 0x1bf   : > { %3813 = vmatpush.bf16.msrb.mxu0 %v5060_v1  ;;  %v6170_v1 = vld [vmem:[%s6791_s13 + $0x610] sm:$0xf0]  ;;  %v5624_v40 = vor.u32 %v6272_v45, %v5623_v27  ;;  %v6269_v52 = vld [vmem:[%s6791_s13 + $0x928] sm:$0xf0]  ;;  %v5959_v46 = vld [vmem:[%s6791_s13 + $0xbd8] sm:$0xf] }
 0x1c0   : > { %3826 = vmatpush.bf16.msrb.mxu1 %v5156_v12  ;;  %v5575_v12 = vld [vmem:[%s6791_s13 + $0x8d8] sm:$0xf]  ;;  %v5216_v22 = vor.u32 %v6170_v1, %v5215_v4  ;;  %v3599_v33 = vpop.f32.mrf.mxu3  ;;  %v6302_v4 = vld [vmem:[%s6791_s13 + $0xa30] sm:$0xf0]  ;;  %v6476_v45 = vld [vmem:[#allocation1 + $0x2d] sm:$0xff] }
 0x1c1   : > { %3838 = vmatpush.bf16.msrb.mxu2 %v5264_v17  ;;  %v6287_v17 = vld [vmem:[%s6791_s13 + $0x9b8] sm:$0xf0]  ;;  %v5431_v1 = vld [vmem:[%s6791_s13 + $0x7b8] sm:$0xf] }
 0x1c2   : > { %3851 = vmatpush.bf16.msrb.mxu3 %v5360_v19  ;;  %v5480_v19 = vor.u32 %v6236_v8, %v5479_v7  ;;  %v5684_v25 = vor.u32 %v6287_v17, %v5683_v16  ;;  %v6224_v7 = vld [vmem:[%s6791_s13 + $0x7c0] sm:$0xf0]  ;;  %v5648_v8 = vor.u32 %v6278_v63, %v5647_v62  ;;  %v5635_v16 = vld [vmem:[%s6791_s13 + $0x950] sm:$0xf]  ;;  %v6275_v17 = vld [vmem:[%s6791_s13 + $0x958] sm:$0xf0] }
 0x1c3   : > { %3814 = vmatpush.bf16.msrb.mxu0 %v5048_v6  ;;  %v5576_v6 = vor.u32 %v6260_v13, %v5575_v12  ;;  %v6248_v12 = vld [vmem:[%s6791_s13 + $0x880] sm:$0xf0]  ;;  %v5636_v43 = vor.u32 %v6275_v17, %v5635_v16  ;;  %v5599_v62 = vld [vmem:[%s6791_s13 + $0x908] sm:$0xf]  ;;  %v5863_v63 = vld [vmem:[%s6791_s13 + $0xb18] sm:$0xf] }
 0x1c4   : > { %3827 = vmatpush.bf16.msrb.mxu1 %v5144_v26  ;;  %v5312_v26 = vor.u32 %v6194_v18, %v5311_v38  ;;  %v5731_v18 = vld [vmem:[%s6791_s13 + $0xa10] sm:$0xf] }
 0x1c5   : > { %3839 = vmatpush.bf16.msrb.mxu2 %v5252_v29  ;;  %v3586_v29 = vpop.f32.mrf.mxu2  ;;  %v6473_v16 = vld [vmem:[#allocation1 + $0x12] sm:$0xff] }
 0x1c6   : > { %3852 = vmatpush.bf16.msrb.mxu3 %v5348_v59  ;;  %v6284_v59 = vld [vmem:[%s6791_s13 + $0x9a0] sm:$0xf0] }
 0x1c7   : > { %3815 = vmatpush.bf16.msrb.mxu0 %v5036_v36  ;;  %v6308_v36 = vld [vmem:[%s6791_s13 + $0xa60] sm:$0xf0] }
 0x1c8   : > { %3828 = vmatpush.bf16.msrb.mxu1 %v5132_v42  ;;  %v6254_v42 = vld [vmem:[%s6791_s13 + $0x8b0] sm:$0xf0] }
 0x1c9   : > { %3840 = vmatpush.bf16.msrb.mxu2 %v5240_v47  ;;  %v6471_v47 = vld [vmem:[#allocation1] sm:$0xff] }
 0x1ca   : > { %3853 = vmatpush.bf16.msrb.mxu3 %v5336_v51  ;;  %v5552_v51 = vor.u32 %v6254_v42, %v5551_v41  ;;  %v6335_v41 = vld [vmem:[%s6791_s13 + $0xb38] sm:$0xf0] }
 0x1cb   : > { %3816 = vmatpush.bf16.msrb.mxu0 %v5024_v61  ;;  %v5756_v61 = vor.u32 %v6305_v49, %v5755_v58 }
 0x1cc   : > { %3829 = vmatpush.bf16.msrb.mxu1 %v5120_v2  ;;  %v3610_v24 = vpop.f32.mrf.mxu1  ;;  %v5444_v2 = vor.u32 %v6227_v54, %v5443_v53 }
 0x1cd   : > { %3841 = vmatpush.bf16.msrb.mxu2 %v5228_v31  ;;  %v3611_v31 = vadd.f32 %v3610_v24, %v7670_v5  ;;  %v5432_v5 = vor.u32 %v6224_v7, %v5431_v1  ;;  %v6332_v24 = vld [vmem:[%s6791_s13 + $0xb20] sm:$0xf0]  ;;  %v6290_v1 = vld [vmem:[%s6791_s13 + $0x9d0] sm:$0xf0] }
 0x1ce   : > { %3854 = vmatpush.bf16.msrb.mxu3 %v5324_v9  ;;  %3817 = vmatmul.bf16.vlgmr.msrb.gmra.mxu0 %v7049_v0  ;;  %v5767_v0 = vld [vmem:[%s6791_s13 + $0xa58] sm:$0xf]  ;;  %v5864_v7 = vor.u32 %v6332_v24, %v5863_v63 }
 0x1cf   : > { %3861 = vmatpush.bf16.msra.mxu0 %v5492_v56  ;;  %3830 = vmatmul.bf16.vlgmr.msrb.gmra.mxu1 %v7033_v15  ;;  %v5672_v15 = vor.u32 %v6284_v59, %v5671_v32  ;;  %v5768_v44 = vor.u32 %v6308_v36, %v5767_v0  ;;  %v5743_v56 = vld [vmem:[%s6791_s13 + $0xa28] sm:$0xf]  ;;  %v5527_v9 = vld [vmem:[%s6791_s13 + $0x878] sm:$0xf]  ;;  %v3623_v38 = vpop.f32.mrf.mxu0  ;;  %v6296_v32 = vld [vmem:[%s6791_s13 + $0xa00] sm:$0xf0] }
 0x1d0   : > { %3874 = vmatpush.bf16.msra.mxu1 %v5588_v3  ;;  %v5540_v3 = vor.u32 %v6251_v60, %v5539_v57  ;;  %v5744_v13 = vor.u32 %v6302_v4, %v5743_v56  ;;  %v3624_v20 = vadd.f32 %v3623_v38, %v3611_v31  ;;  %v5528_v21 = vor.u32 %v6248_v12, %v5527_v9  ;;  %v5407_v59 = vld [vmem:[%s6791_s13 + $0x788] sm:$0xf]  ;;  %v6218_v0 = vld [vmem:[%s6791_s13 + $0x790] sm:$0xf0]  ;;  %v5947_v4 = vld [vmem:[%s6791_s13 + $0xbc0] sm:$0xf] }
 0x1d1   : > { %3842 = vmatpush.bf16.msrb.mxu2 %v5216_v22  ;;  %v5419_v22 = vld [vmem:[%s6791_s13 + $0x7a0] sm:$0xf]  ;;  %v5503_v36 = vld [vmem:[%s6791_s13 + $0x848] sm:$0xf]  ;;  %v5408_v49 = vor.u32 %v6218_v0, %v5407_v59  ;;  %v5612_v60 = vor.u32 %v6269_v52, %v5611_v14  ;;  %v6266_v56 = vld [vmem:[%s6791_s13 + $0x910] sm:$0xf0] }
 0x1d2   : > { %3855 = vmatpush.bf16.msrb.mxu3 %v5312_v26  ;;  %v6353_v31 = vld [vmem:[%s6791_s13 + $0xbc8] sm:$0xf0]  ;;  %v5851_v12 = vld [vmem:[%s6791_s13 + $0xb00] sm:$0xf]  ;;  %v5935_v38 = vld [vmem:[%s6791_s13 + $0xba8] sm:$0xf] }
 0x1d3   : > { %3862 = vmatpush.bf16.msra.mxu0 %v5480_v19  ;;  %v6299_v19 = vld [vmem:[%s6791_s13 + $0xa18] sm:$0xf0]  ;;  %v5948_v9 = vor.u32 %v6353_v31, %v5947_v4  ;;  %v5911_v59 = vld [vmem:[%s6791_s13 + $0xb78] sm:$0xf]  ;;  %v6320_v14 = vld [vmem:[%s6791_s13 + $0xac0] sm:$0xf0] }
 0x1d4   : > { %3875 = vmatpush.bf16.msra.mxu1 %v5576_v6  ;;  %3843 = vmatmul.bf16.vlgmr.msrb.gmra.mxu2 %v6471_v47  ;;  %v6221_v6 = vld [vmem:[%s6791_s13 + $0x7a8] sm:$0xf0]  ;;  %v5732_v26 = vor.u32 %v6299_v19, %v5731_v18  ;;  %v3612_v33 = vpop.f32.mrf.mxu1  ;;  %v6356_v47 = vld [vmem:[%s6791_s13 + $0xbe0] sm:$0xf0]  ;;  %v3942_v31 = vperm.slane %v7563_v10, 1 }
 0x1d5   : > { %3887 = vmatpush.bf16.msra.mxu2 %v5684_v25  ;;  %3856 = vmatmul.bf16.vlgmr.msrb.gmra.mxu3 %v6472_v50  ;;  %v6245_v25 = vld [vmem:[%s6791_s13 + $0x868] sm:$0xf0]  ;;  %v5420_v29 = vor.u32 %v6221_v6, %v5419_v22  ;;  %v5707_v50 = vld [vmem:[%s6791_s13 + $0x9e0] sm:$0xf]  ;;  %v5839_v6 = vld [vmem:[%s6791_s13 + $0xae8] sm:$0xf] }
 0x1d6   : > { %3900 = vmatpush.bf16.msra.mxu3 %v5780_v30  ;;  %v5719_v30 = vld [vmem:[%s6791_s13 + $0x9f8] sm:$0xf]  ;;  %v6344_v33 = vld [vmem:[%s6791_s13 + $0xb80] sm:$0xf0] }
 0x1d7   : > { %3863 = vmatpush.bf16.msra.mxu0 %v5468_v35  ;;  %v5516_v35 = vor.u32 %v6245_v25, %v5515_v23  ;;  %v3636_v42 = vpop.f32.mrf.mxu2  ;;  %v3625_v53 = vpop.f32.mrf.mxu0  ;;  %v6474_v19 = vld [vmem:[#allocation1 + $0x1b] sm:$0xff]  ;;  %v6347_v25 = vld [vmem:[%s6791_s13 + $0xb98] sm:$0xf0] }
 0x1d8   : > { %3876 = vmatpush.bf16.msra.mxu1 %v5564_v37  ;;  %v6242_v37 = vld [vmem:[%s6791_s13 + $0x850] sm:$0xf0]  ;;  %v3649_v58 = vpop.f32.mrf.mxu3  ;;  %v5923_v23 = vld [vmem:[%s6791_s13 + $0xb90] sm:$0xf] }
 0x1d9   : > { %3888 = vmatpush.bf16.msra.mxu2 %v5672_v15  ;;  %v5875_v15 = vld [vmem:[%s6791_s13 + $0xb30] sm:$0xf]  ;;  %v5504_v54 = vor.u32 %v6242_v37, %v5503_v36  ;;  %v5912_v37 = vor.u32 %v6344_v33, %v5911_v59 }
 0x1da   : > { %3901 = vmatpush.bf16.msra.mxu3 %v5768_v44  ;;  %v5720_v44 = vor.u32 %v6296_v32, %v5719_v30  ;;  %v5827_v30 = vld [vmem:[%s6791_s13 + $0xad0] sm:$0xf]  ;;  %v6323_v32 = vld [vmem:[%s6791_s13 + $0xad8] sm:$0xf0] }
 0x1db   : > { %3864 = vmatpush.bf16.msra.mxu0 %v5456_v48  ;;  %v3637_v48 = vadd.f32 %v3636_v42, %v3624_v20  ;;  %v5828_v0 = vor.u32 %v6323_v32, %v5827_v30 }
 0x1dc   : > { %3877 = vmatpush.bf16.msra.mxu1 %v5552_v51  ;;  %v6293_v51 = vld [vmem:[%s6791_s13 + $0x9e8] sm:$0xf0] }
 0x1dd   : > { %3889 = vmatpush.bf16.msra.mxu2 %v5660_v55  ;;  %v5876_v55 = vor.u32 %v6335_v41, %v5875_v15  ;;  %v3650_v57 = vadd.f32 %v3649_v58, %v3637_v48  ;;  %v5899_v15 = vld [vmem:[%s6791_s13 + $0xb60] sm:$0xf]  ;;  %v6341_v41 = vld [vmem:[%s6791_s13 + $0xb68] sm:$0xf0]  ;;  %v5887_v58 = vld [vmem:[%s6791_s13 + $0xb48] sm:$0xf] }
 0x1de   : > { %3902 = vmatpush.bf16.msra.mxu3 %v5756_v61  ;;  %v5960_v61 = vor.u32 %v6356_v47, %v5959_v46  ;;  %v5900_v46 = vor.u32 %v6341_v41, %v5899_v15  ;;  %v5803_v47 = vld [vmem:[%s6791_s13 + $0xaa0] sm:$0xf]  ;;  %v6317_v48 = vld [vmem:[%s6791_s13 + $0xaa8] sm:$0xf0] }
 0x1df   : > { %3865 = vmatpush.bf16.msra.mxu0 %v5444_v2  ;;  %v5708_v2 = vor.u32 %v6293_v51, %v5707_v50  ;;  %v3638_v18 = vpop.f32.mrf.mxu2  ;;  %v5804_v50 = vor.u32 %v6317_v48, %v5803_v47 }
 0x1e0   : > { %3878 = vmatpush.bf16.msra.mxu1 %v5540_v3  ;;  %v5695_v3 = vld [vmem:[%s6791_s13 + $0x9c8] sm:$0xf]  ;;  %v3651_v20 = vpop.f32.mrf.mxu3 }
 0x1e1   : > { %3890 = vmatpush.bf16.msra.mxu2 %v5648_v8  ;;  %v5600_v8 = vor.u32 %v6266_v56, %v5599_v62  ;;  %v5696_v17 = vor.u32 %v6290_v1, %v5695_v3 }
 0x1e2   : > { %3903 = vmatpush.bf16.msra.mxu3 %v5744_v13  ;;  %v6329_v13 = vld [vmem:[%s6791_s13 + $0xb08] sm:$0xf0] }
 0x1e3   : > { %3866 = vmatpush.bf16.msra.mxu0 %v5432_v5  ;;  %v6350_v5 = vld [vmem:[%s6791_s13 + $0xbb0] sm:$0xf0] }
 0x1e4   : > { %3879 = vmatpush.bf16.msra.mxu1 %v5528_v21  ;;  %v5852_v21 = vor.u32 %v6329_v13, %v5851_v12  ;;  %v5936_v22 = vor.u32 %v6350_v5, %v5935_v38 }
 0x1e5   : > { %3891 = vmatpush.bf16.msra.mxu2 %v5636_v43  ;;  %v6326_v43 = vld [vmem:[%s6791_s13 + $0xaf0] sm:$0xf0] }
 0x1e6   : > { %3904 = vmatpush.bf16.msra.mxu3 %v5732_v26  ;;  %v6475_v26 = vld [vmem:[#allocation1 + $0x24] sm:$0xff]  ;;  %v5840_v27 = vor.u32 %v6326_v43, %v5839_v6 }
 0x1e7   : > { %3867 = vmatpush.bf16.msra.mxu0 %v5420_v29  ;;  %v5924_v29 = vor.u32 %v6347_v25, %v5923_v23 }
 0x1e8   : > { %3880 = vmatpush.bf16.msra.mxu1 %v5516_v35 }
 0x1e9   : > { %3892 = vmatpush.bf16.msra.mxu2 %v5624_v40  ;;  %v5815_v40 = vld [vmem:[%s6791_s13 + $0xab8] sm:$0xf] }
 0x1ea   : > { %3905 = vmatpush.bf16.msra.mxu3 %v5720_v44  ;;  %v5816_v44 = vor.u32 %v6320_v14, %v5815_v40 }
 0x1eb   : > { %3868 = vmatpush.bf16.msra.mxu0 %v5408_v49  ;;  %v6338_v49 = vld [vmem:[%s6791_s13 + $0xb50] sm:$0xf0] }
 0x1ec   : > { %3881 = vmatpush.bf16.msra.mxu1 %v5504_v54  ;;  %v3662_v35 = vpop.f32.mrf.mxu1  ;;  %v5888_v53 = vor.u32 %v6338_v49, %v5887_v58  ;;  %v5791_v54 = vld [vmem:[%s6791_s13 + $0xa88] sm:$0xf] }
 0x1ed   : > { %3893 = vmatpush.bf16.msra.mxu2 %v5612_v60  ;;  %v3663_v36 = vadd.f32 %v3662_v35, %v3650_v57 }
 0x1ee   : > { %3906 = vmatpush.bf16.msra.mxu3 %v5708_v2  ;;  %3869 = vmatmul.bf16.vlgmr.msra.gmra.mxu0 %v6473_v16 }
 0x1ef   : > { %3913 = vmatpush.bf16.msrb.mxu0 %v5876_v55  ;;  %3882 = vmatmul.bf16.vlgmr.msra.gmra.mxu1 %v6474_v19  ;;  %v3675_v42 = vpop.f32.mrf.mxu0  ;;  %v6314_v55 = vld [vmem:[%s6791_s13 + $0xa90] sm:$0xf0] }
 0x1f0   : > { %3927 = vmatpush.bf16.msrb.mxu1 %v5960_v61  ;;  %v3676_v52 = vadd.f32 %v3675_v42, %v3663_v36  ;;  %v5792_v62 = vor.u32 %v6314_v55, %v5791_v54  ;;  %v3943_v55 = vperm.slane %v7563_v10, 2 }
 0x1f1   : > { %3894 = vmatpush.bf16.msra.mxu2 %v5600_v8 }
 0x1f2   : > { %3907 = vmatpush.bf16.msra.mxu3 %v5696_v17 }
 0x1f3   : > { %3914 = vmatpush.bf16.msrb.mxu0 %v5864_v7 }
 0x1f4   : > { %3928 = vmatpush.bf16.msrb.mxu1 %v5948_v9  ;;  %3895 = vmatmul.bf16.vlgmr.msra.gmra.mxu2 %v6475_v26  ;;  %v3664_v51 = vpop.f32.mrf.mxu1 }
 0x1f5   : > { %3908 = vmatmul.bf16.vlgmr.msra.gmra.mxu3 %v6476_v45 }
 0x1f7   : > { %3915 = vmatpush.bf16.msrb.mxu0 %v5852_v21  ;;  %v3688_v57 = vpop.f32.mrf.mxu2  ;;  %v3677_v63 = vpop.f32.mrf.mxu0 }
 0x1f8   : > { %3929 = vmatpush.bf16.msrb.mxu1 %v5936_v22  ;;  %v3689_v60 = vadd.f32 %v3688_v57, %v3676_v52  ;;  %v3701_v61 = vpop.f32.mrf.mxu3 }
 0x1fa   : > { %v3702_v24 = vadd.f32 %v3701_v61, %v3689_v60 }
 0x1fb   : > { %3916 = vmatpush.bf16.msrb.mxu0 %v5840_v27 }
 0x1fc   : > { %3930 = vmatpush.bf16.msrb.mxu1 %v5924_v29 }
 0x1ff   : > { %3917 = vmatpush.bf16.msrb.mxu0 %v5828_v0  ;;  %v3690_v2 = vpop.f32.mrf.mxu2 }
 0x200   : > { %3931 = vmatpush.bf16.msrb.mxu1 %v5912_v37  ;;  %v3703_v56 = vpop.f32.mrf.mxu3 }
 0x203   : > { %3918 = vmatpush.bf16.msrb.mxu0 %v5816_v44 }
 0x204   : > { %3932 = vmatpush.bf16.msrb.mxu1 %v5900_v46 }
 0x207   : > { %3919 = vmatpush.bf16.msrb.mxu0 %v5804_v50 }
 0x208   : > { %3933 = vmatpush.bf16.msrb.mxu1 %v5888_v53 }
 0x20b   : > { %5963 = vmatmul.msk.bf16.vlgmr.msrb.gmra.mxu1 %vm3312_vm0, %v7531_v28  ;;  %3920 = vmatpush.bf16.msrb.mxu0 %v5792_v62  ;;  %v3727_v28 = vpop.f32.mrf.mxu0 }
 0x20e   : > { %3921 = vmatmul.bf16.vlgmr.msrb.gmra.mxu0 %v7537_v34  ;;  %v3714_v34 = vpop.f32.mrf.mxu1 }
 0x20f   : > { %v3715_v4 = vadd.f32 %v3714_v34, %v3702_v24 }
 0x211   : > { %v3728_v3 = vadd.f32 %v3727_v28, %v3715_v4 }
 0x213   : > { %v7789_v1 = vadd.f32 %v3942_v31, %v3728_v3  ;;  %v3729_v7 = vpop.f32.mrf.mxu0 }
 0x216   : > { %v3716_v8 = vpop.f32.mrf.mxu1 }
 0x217   : > { %v3740_v9 = vpop.f32.mrf.mxu2 }
 0x218   : > { %v3741_v12 = vadd.f32 %v3740_v9, %v7283_v11  ;;  %v3753_v13 = vpop.f32.mrf.mxu3 }
 0x21a   : > { %v3754_v16 = vadd.f32 %v3753_v13, %v3741_v12 }
 0x21f   : > { %v3742_v17 = vpop.f32.mrf.mxu2 }
 0x220   : > { %v3755_v38 = vpop.f32.mrf.mxu3 }
 0x22b   : > { %v3766_v5 = vpop.f32.mrf.mxu0 }
 0x22c   : > { %v3767_v18 = vadd.f32 %v3766_v5, %v3754_v16  ;;  %v3779_v19 = vpop.f32.mrf.mxu1 }
 0x22e   : > { %v3780_v20 = vadd.f32 %v3779_v19, %v3767_v18 }
 0x233   : > { %v3768_v21 = vpop.f32.mrf.mxu0 }
 0x234   : > { %v3781_v22 = vpop.f32.mrf.mxu1 }
 0x237   : > { %v3792_v6 = vpop.f32.mrf.mxu2 }
 0x238   : > { %v3805_v43 = vpop.f32.mrf.mxu3  ;;  %v3793_v33 = vadd.f32 %v3792_v6, %v3780_v20 }
 0x23a   : > { %v3806_v36 = vadd.f32 %v3805_v43, %v3793_v33 }
 0x23f   : > { %v3794_v23 = vpop.f32.mrf.mxu2 }
 0x240   : > { %v3807_v25 = vpop.f32.mrf.mxu3 }
 0x24b   : > { %v3818_v26 = vpop.f32.mrf.mxu0 }
 0x24c   : > { %v3831_v27 = vpop.f32.mrf.mxu1  ;;  %v3819_v37 = vadd.f32 %v3818_v26, %v3806_v36 }
 0x24e   : > { %v3832_v15 = vadd.f32 %v3831_v27, %v3819_v37 }
 0x253   : > { %v3820_v45 = vpop.f32.mrf.mxu0 }
 0x254   : > { %v3833_v29 = vpop.f32.mrf.mxu1 }
 0x257   : > { %v3844_v30 = vpop.f32.mrf.mxu2 }
 0x258   : > { %v3857_v11 = vpop.f32.mrf.mxu3  ;;  %v3845_v41 = vadd.f32 %v3844_v30, %v3832_v15 }
 0x25a   : > { %v3858_v52 = vadd.f32 %v3857_v11, %v3845_v41 }
 0x25f   : > { %v3846_v32 = vpop.f32.mrf.mxu2 }
 0x260   : > { %v3859_v59 = vpop.f32.mrf.mxu3 }
 0x26b   : > { %v3870_v35 = vpop.f32.mrf.mxu0 }
 0x26c   : > { %v3883_v0 = vpop.f32.mrf.mxu1  ;;  %v3871_v46 = vadd.f32 %v3870_v35, %v3858_v52 }
 0x26e   : > { %v3884_v58 = vadd.f32 %v3883_v0, %v3871_v46 }
 0x273   : > { %v3872_v40 = vpop.f32.mrf.mxu0 }
 0x274   : > { %v3885_v14 = vpop.f32.mrf.mxu1 }
 0x277   : > { %v3896_v42 = vpop.f32.mrf.mxu2 }
 0x278   : > { %v3909_v44 = vpop.f32.mrf.mxu3  ;;  %v3897_v49 = vadd.f32 %v3896_v42, %v3884_v58 }
 0x27a   : > { %v3910_v51 = vadd.f32 %v3909_v44, %v3897_v49 }
 0x27f   : > { %v3898_v47 = vpop.f32.mrf.mxu2 }
 0x280   : > { %v3911_v48 = vpop.f32.mrf.mxu3 }
 0x288   : > { %v3935_v50 = vpop.f32.mrf.mxu1 }
 0x28b   : > { %v3922_v53 = vpop.f32.mrf.mxu0 }
 0x28c   : > { %v3923_v54 = vadd.f32 %v3922_v53, %v3910_v51 }
 0x28e   : > { %v3936_v57 = vadd.f32 %v3935_v50, %v3923_v54 }
 0x28f   : > { %3960 = sbr.rel (%p3954_p7) target bundleno = 694 (0x2b6), region = 56 }
 0x290   : > { %v7793_v60 = vadd.f32 %v3943_v55, %v3936_v57  ;;  %v3937_v61 = vpop.f32.mrf.mxu1 }
 0x293   : > { %v3924_v62 = vpop.f32.mrf.mxu0 }
 0x294   : > { %v5965_v63 = vmul.f32 -1.442695, %v7581_v39  ;;  %v5966_v24 = vmul.f32 -1.442695, %v7789_v1  ;;  %v5967_v2 = vmul.f32 -1.442695, %v7793_v60 }
 0x295   : > { %vm4023_vm13 = vcmask 1041408   ;;  %vm4025_vm14 = vcmask 1043456  }
 0x296   : > { %6477 = vpow2.f32 %v5965_v63 }
 0x297   : > { %6479 = vpow2.f32 %v5966_v24 }
 0x298   : > { %6481 = vpow2.f32 %v5967_v2 }
 0x29c   : > { %v6478_v56 = vpop.eup %6477 }
 0x29d   : > { %v6480_v28 = vpop.eup %6479  ;;  %v3970_v10 = vadd.f32 1.0, %v6478_v56 }
 0x29e   : > { %v6482_v34 = vpop.eup %6481  ;;  %v3971_v4 = vadd.f32 1.0, %v6480_v28 }
 0x29f   : > { %v3972_v31 = vadd.f32 1.0, %v6482_v34  ;;  %6483 = vrcp.f32 %v3970_v10  ;;  %vm3978_vm1 = vweird.f32 %v3970_v10  ;;  %v3982_v9 = vand.u32 2147483647, %v3970_v10 }
 0x2a0   : > { %6485 = vrcp.f32 %v3971_v4  ;;  %v3984_v13 = vand.u32 2147483648, %v3970_v10  ;;  %vm3993_vm2 = vweird.f32 %v3971_v4  ;;  %v3997_v17 = vand.u32 2147483647, %v3971_v4 }
 0x2a1   : > { %6487 = vrcp.f32 %v3972_v31  ;;  %v3999_v5 = vand.u32 2147483648, %v3971_v4  ;;  %vm4008_vm5 = vweird.f32 %v3972_v31  ;;  %v4014_v20 = vand.u32 2147483648, %v3972_v31 }
 0x2a2   : > { %v4012_v6 = vand.u32 2147483647, %v3972_v31  ;;  %v3985_v26 = vor.u32 1.1754944e-38, %v3984_v13  ;;  %vm3983_vm9 = vcmp.eq.f32.partialorder %v3982_v9, 8.507059e+37  ;;  %vm3998_vm10 = vcmp.eq.f32.partialorder %v3997_v17, 8.507059e+37 }
 0x2a3   : > { %v4000_v27 = vor.u32 1.1754944e-38, %v3999_v5  ;;  %v4015_v30 = vor.u32 1.1754944e-38, %v4014_v20 }
 0x2a4   : > { %vm4013_vm12 = vcmp.eq.f32.partialorder %v4012_v6, 8.507059e+37 }
 0x2a5   : > { %v6484_v3 = vpop.eup %6483 }
 0x2a6   : > { %v6486_v7 = vpop.eup %6485  ;;  %v3974_v8 = vmul.f32 %v6484_v3, %v3970_v10  ;;  %vm3979_vm3 = vweird.f32 %v6484_v3 }
 0x2a7   : > { %v6488_v12 = vpop.eup %6487  ;;  %v3989_v16 = vmul.f32 %v6486_v7, %v3971_v4  ;;  %vm3994_vm4 = vweird.f32 %v6486_v7  ;;  %vm7801_vm7 = vmor %vm3978_vm1, %vm3979_vm3 }
 0x2a8   : > { %v3975_v38 = vsub.f32 1.0, %v3974_v8  ;;  %v4004_v18 = vmul.f32 %v6488_v12, %v3972_v31  ;;  %vm4009_vm6 = vweird.f32 %v6488_v12  ;;  %vm3995_vm8 = vmor %vm3993_vm2, %vm3994_vm4 }
 0x2a9   : > { %v3990_v19 = vsub.f32 1.0, %v3989_v16  ;;  %vm4010_vm11 = vmor %vm4008_vm5, %vm4009_vm6 }
 0x2aa   : > { %v3976_v21 = vmul.f32 %v6484_v3, %v3975_v38  ;;  %v4005_v22 = vsub.f32 1.0, %v4004_v18 }
 0x2ab   : > { %v3991_v23 = vmul.f32 %v6486_v7, %v3990_v19 }
 0x2ac   : > { %v3977_v25 = vadd.f32 %v6484_v3, %v3976_v21  ;;  %v4006_v45 = vmul.f32 %v6488_v12, %v4005_v22 }
 0x2ad   : > { %v3992_v29 = vadd.f32 %v6486_v7, %v3991_v23 }
 0x2ae   : > { %v3981_v11 = vsel %vm7801_vm7, %v6484_v3, %v3977_v25  ;;  %v4007_v32 = vadd.f32 %v6488_v12, %v4006_v45 }
 0x2af   : > { %v3996_v59 = vsel %vm3995_vm8, %v6486_v7, %v3992_v29  ;;  %v3986_v33 = vsel %vm3983_vm9, %v3985_v26, %v3981_v11 }
 0x2b0   : > { %v4001_v35 = vsel %vm3998_vm10, %v4000_v27, %v3996_v59  ;;  %v4011_v0 = vsel %vm4010_vm11, %v6488_v12, %v4007_v32 }
 0x2b1   : > { %v4016_v36 = vsel %vm4013_vm12, %v4015_v30, %v4011_v0  ;;  %v4021_v37 = vrot.slane %v4001_v35, 6 }
 0x2b2   : > { %v4022_v40 = vrot.slane %v4016_v36, 4 }
 0x2b3   : > { %v4024_v14 = vsel %vm4023_vm13, %v3986_v33, %v4021_v37 }
 0x2b4   : > { %v4026_v15 = vsel %vm4025_vm14, %v4024_v14, %v4022_v40 }
 0x2b5   : > { %4028 = vst [vmem:[%s6809_s27] sm:$0x3f] %v4026_v15 }
 0x2b6 PF: > { %4031 = sbr.rel (%p7776_p11) target bundleno = 704 (0x2c0), region = 60 }
 0x2bb   : > { %v4035_v41 = vrot.slane %v7789_v1, 6  ;;  %v4036_v42 = vrot.slane %v7793_v60, 4  ;;  %vm4037_vm15 = vcmask 1041408   ;;  %vm4039_vm0 = vcmask 1043456  }
 0x2bd   : > { %v4038_v44 = vsel %vm4037_vm15, %v7581_v39, %v4035_v41 }
 0x2be   : > { %v4040_v52 = vsel %vm4039_vm0, %v4038_v44, %v4036_v42 }
 0x2bf   : > { %4042 = vst [vmem:[%s6809_s27] sm:$0x3f] %v4040_v52 }
 0x2c0 PF: > { %4044 = sbr.rel (%p7784_p5) target bundleno = 744 (0x2e8), region = 64 }
 0x2c5   : > { %v5969_v46 = vmul.f32 -1.442695, %v7581_v39  ;;  %v5970_v47 = vmul.f32 -1.442695, %v7789_v1  ;;  %v5971_v48 = vmul.f32 -1.442695, %v7793_v60  ;;  %v4045_v58 = vlaneseq }
 0x2c6   : > { %v4049_v62 = vstv %s7772_s25  ;;  %vm4121_vm0 = vcmask 1041408  }
 0x2c7   : > { %6489 = vpow2.f32 %v5969_v46  ;;  %v4046_v54 = vand.u32 127, %v4045_v58 }
 0x2c8   : > { %6491 = vpow2.f32 %v5970_v47 }
 0x2c9   : > { %6493 = vpow2.f32 %v5971_v48  ;;  %v4047_v61 = vadd.s32 128, %v4046_v54  ;;  %v4048_v24 = vadd.s32 256, %v4046_v54  ;;  %v4050_v2 = vadd.s32 %v4049_v62, %v4046_v54 }
 0x2cb   : > { %v4051_v28 = vadd.s32 %v4049_v62, %v4047_v61  ;;  %v4052_v18 = vadd.s32 %v4049_v62, %v4048_v24  ;;  %vm4053_vm10 = vcmp.ge.s32.totalorder %v4050_v2, 256 }
 0x2cd   : > { %v6490_v49 = vpop.eup %6489  ;;  %vm4054_vm13 = vcmp.ge.s32.totalorder %v4051_v28, 256  ;;  %vm4055_vm15 = vcmp.ge.s32.totalorder %v4052_v18, 256 }
 0x2ce   : > { %v6492_v50 = vpop.eup %6491  ;;  %v4065_v51 = vadd.f32 1.0, %v6490_v49 }
 0x2cf   : > { %v6494_v53 = vpop.eup %6493  ;;  %v4066_v55 = vadd.f32 1.0, %v6492_v50 }
 0x2d0   : > { %v4067_v57 = vadd.f32 1.0, %v6494_v53  ;;  %6495 = vrcp.f32 %v4065_v51  ;;  %vm4073_vm1 = vweird.f32 %v4065_v51  ;;  %v4077_v34 = vand.u32 2147483647, %v4065_v51 }
 0x2d1   : > { %6497 = vrcp.f32 %v4066_v55  ;;  %v4079_v31 = vand.u32 2147483648, %v4065_v51  ;;  %vm4088_vm2 = vweird.f32 %v4066_v55  ;;  %v4092_v7 = vand.u32 2147483647, %v4066_v55 }
 0x2d2   : > { %6499 = vrcp.f32 %v4067_v57  ;;  %v4094_v9 = vand.u32 2147483648, %v4066_v55  ;;  %vm4103_vm5 = vweird.f32 %v4067_v57  ;;  %v4109_v16 = vand.u32 2147483648, %v4067_v57 }
 0x2d3   : > { %v4107_v5 = vand.u32 2147483647, %v4067_v57  ;;  %v4080_v20 = vor.u32 1.1754944e-38, %v4079_v31  ;;  %vm4078_vm8 = vcmp.eq.f32.partialorder %v4077_v34, 8.507059e+37  ;;  %vm4093_vm11 = vcmp.eq.f32.partialorder %v4092_v7, 8.507059e+37 }
 0x2d4   : > { %v4095_v43 = vor.u32 1.1754944e-38, %v4094_v9  ;;  %v4110_v26 = vor.u32 1.1754944e-38, %v4109_v16 }
 0x2d5   : > { %vm4108_vm14 = vcmp.eq.f32.partialorder %v4107_v5, 8.507059e+37 }
 0x2d6   : > { %v6496_v63 = vpop.eup %6495 }
 0x2d7   : > { %v6498_v56 = vpop.eup %6497  ;;  %v4069_v10 = vmul.f32 %v6496_v63, %v4065_v51  ;;  %vm4074_vm3 = vweird.f32 %v6496_v63 }
 0x2d8   : > { %v6500_v4 = vpop.eup %6499  ;;  %v4084_v3 = vmul.f32 %v6498_v56, %v4066_v55  ;;  %vm4089_vm4 = vweird.f32 %v6498_v56  ;;  %vm7823_vm7 = vmor %vm4073_vm1, %vm4074_vm3  ;;  %vm4123_vm1 = vcmask 1043456  }
 0x2d9   : > { %v4070_v8 = vsub.f32 1.0, %v4069_v10  ;;  %v4099_v12 = vmul.f32 %v6500_v4, %v4067_v57  ;;  %vm4104_vm6 = vweird.f32 %v6500_v4  ;;  %vm7828_vm9 = vmor %vm4088_vm2, %vm4089_vm4 }
 0x2da   : > { %v4085_v13 = vsub.f32 1.0, %v4084_v3  ;;  %vm4105_vm12 = vmor %vm4103_vm5, %vm4104_vm6 }
 0x2db   : > { %v4071_v17 = vmul.f32 %v6496_v63, %v4070_v8  ;;  %v4100_v38 = vsub.f32 1.0, %v4099_v12 }
 0x2dc   : > { %v4086_v21 = vmul.f32 %v6498_v56, %v4085_v13 }
 0x2dd   : > { %v4072_v22 = vadd.f32 %v6496_v63, %v4071_v17  ;;  %v4101_v23 = vmul.f32 %v6500_v4, %v4100_v38 }
 0x2de   : > { %v4087_v25 = vadd.f32 %v6498_v56, %v4086_v21 }
 0x2df   : > { %v4076_v27 = vsel %vm7823_vm7, %v6496_v63, %v4072_v22  ;;  %v4102_v45 = vadd.f32 %v6500_v4, %v4101_v23 }
 0x2e0   : > { %v4081_v29 = vsel %vm4078_vm8, %v4080_v20, %v4076_v27  ;;  %v4091_v30 = vsel %vm7828_vm9, %v6498_v56, %v4087_v25 }
 0x2e1   : > { %v4096_v11 = vsel %vm4093_vm11, %v4095_v43, %v4091_v30  ;;  %v4106_v32 = vsel %vm4105_vm12, %v6500_v4, %v4102_v45  ;;  %v4113_v33 = vsel %vm4053_vm10, %v4081_v29, %v7581_v39 }
 0x2e2   : > { %v4111_v59 = vsel %vm4108_vm14, %v4110_v26, %v4106_v32  ;;  %v4114_v35 = vsel %vm4054_vm13, %v4096_v11, %v7789_v1 }
 0x2e3   : > { %v4115_v0 = vsel %vm4055_vm15, %v4111_v59, %v7793_v60  ;;  %v4119_v36 = vrot.slane %v4114_v35, 6 }
 0x2e4   : > { %v4120_v37 = vrot.slane %v4115_v0, 4 }
 0x2e5   : > { %v4122_v40 = vsel %vm4121_vm0, %v4113_v33, %v4119_v36 }
 0x2e6   : > { %v4124_v14 = vsel %vm4123_vm1, %v4122_v40, %v4120_v37 }
 0x2e7   : > { %4126 = vst [vmem:[%s6809_s27] sm:$0x3f] %v4124_v14 }
 0x2e8 PF: > { %s7882_s22 = sld [smem:[#allocation9_spill]]  ;;  %p18_p13 = scmp.ge.s32.totalorder %s6686_s23, 8  }
 0x2e9   : > { %s7883_s20 = sld [smem:[#allocation10_spill]]  ;;  %s7884_s18 = smov %s6621_s19 }
 0x2ea   : > { %s7886_s21 = smov %s6686_s23  ;;  %20 = sbr.rel (!%p18_p13) target bundleno = 7 (0x7), region = 116 }
 0x2ee   : > { %s7885_s19 = smov %s7882_s22 }
 0x2ef   :  { %4149 = vsyncpa [#allocation3], 1 }
 0x2f0   :  { %4151 = vsyncpa [#allocation3 + $0x1], 1 }
 0x2f1   :  { %4152 = vsyncpa [#allocation5], 1 }
 0x2f2   :  { %4154 = vsyncpa [#allocation5 + $0x1], 1 }

</bundles_post_ra>
